<compile_context>
chip_gen: v7x
topology: tpu7x:2x2x1
jax: 0.10.0
libtpu: 0.0.40
codegen_flags: <defaults>
</compile_context>

<pallas_src>
import functools

import jax
import jax.numpy as jnp
from jax.experimental import pallas as pl
from jax.experimental.pallas import tpu as pltpu


# ----------------------------- Pallas kernel --------------------------------


def _residual_kernel(band_ref, res_ref, mask_ref, w1_ref, b1_ref, w2_ref,
                     b2_ref, o_ref, *, tb, width, channels, out_relu):
    """relu(conv1) -> conv2 + bias + residual (-> relu) on one row band.

    band_ref : (1, 1, (tb+5)*wp, C)  flattened zero-padded band (2-px halo)
    res_ref  : (1, 1, tb*wp, C)      residual, laid out like the output
    mask_ref : (1, l1, 1)            1.0 inside the true image else 0.0
    w*_ref   : (9, C, C)             per-tap weight matrices (C_in x C_out)
    b*_ref   : (1, C)
    o_ref    : (1, 1, tb*wp, C)      flattened output (seam cols discarded
                                     by the wrapper)
    """
    wp = width + 4                    # padded row width (+-2 cols)
    l1 = (tb + 2) * wp + 2            # conv1 extended-output length (flat)
    lout = tb * wp                    # conv2 output length (flat)

    x2 = band_ref[...][0, 0]          # ((tb+5)*wp, C)
    res = res_ref[...][0, 0]          # (lout, C)
    m1 = mask_ref[...][0]             # (l1, 1)
    w1 = w1_ref[...]                  # (9, C, C)
    w2 = w2_ref[...]
    b1 = b1_ref[...]                  # (1, C)
    b2 = b2_ref[...]

    # ---- conv1 + bias + ReLU over the band plus a 1-pixel halo --------------
    # A 3x3 tap (kh, kw) of the flattened padded band is a contiguous row
    # slice starting at kh*wp + kw; column wrap-around only lands in seam
    # columns that are masked / never consumed by conv2's valid outputs.
    acc1 = jnp.broadcast_to(b1, (l1, channels)).astype(jnp.float32)
    for kh in range(3):
        for kw in range(3):
            s = kh * wp + kw
            acc1 = acc1 + jnp.dot(x2[s:s + l1, :], w1[3 * kh + kw],
                                  preferred_element_type=jnp.float32)
    # ReLU, then zero everything outside the true image so conv2 sees proper
    # zero padding (bias would otherwise leak in at borders / band seams).
    c1 = jnp.maximum(acc1, 0.0) * m1

    # ---- conv2 + bias + residual (+ optional ReLU) --------------------------
    acc2 = jnp.broadcast_to(b2, (lout, channels)).astype(jnp.float32)
    for kh in range(3):
        for kw in range(3):
            s = kh * wp + kw
            acc2 = acc2 + jnp.dot(c1[s:s + lout, :], w2[3 * kh + kw],
                                  preferred_element_type=jnp.float32)
    acc2 = acc2 + res.astype(jnp.float32)
    if out_relu:
        acc2 = jnp.maximum(acc2, 0.0)
    o_ref[...] = acc2.astype(o_ref.dtype)[None, None]


# ------------------------------ JAX wrapper ----------------------------------


def _weight_as_taps(w_oihw):
    """(C_out, C_in, 3, 3) torch layout -> (9, C_in, C_out) tap matrices."""
    c_out, c_in = w_oihw.shape[0], w_oihw.shape[1]
    return jnp.transpose(w_oihw, (2, 3, 1, 0)).reshape(9, c_in, c_out)


def residual_forward(x_nchw, params, out_relu=True, band_rows=None):
    """Pallas implementation of Residual.forward with Conv2d(C,C,3,pad=1)."""
    w1, b1, w2, b2 = params
    n, c, h, w = x_nchw.shape

    tb = band_rows if band_rows is not None else min(h, 32)   # band height
    nb = -(-h // tb)                                          # bands per image
    h_pad = nb * tb
    wp = w + 4
    lb = (tb + 5) * wp            # flattened band length (incl. slack row)
    l1 = (tb + 2) * wp + 2        # conv1 extended-output length
    lout = tb * wp                # conv2 output length (incl. seam cols)

    x_nhwc = jnp.transpose(x_nchw, (0, 2, 3, 1))

    # Zero-padded input: +-2 rows/cols for the two stacked 3x3 convs, plus
    # slack rows at the bottom so every band slice below stays in-bounds.
    xp = jnp.pad(x_nhwc, ((0, 0), (2, h_pad - h + 3), (2, 2), (0, 0)))

    # Overlapping row bands (2-row halo each side + 1 slack row), flattened so
    # every 3x3 tap becomes a contiguous row slice inside the kernel.
    bands = jnp.stack([xp[:, i * tb:i * tb + tb + 5] for i in range(nb)],
                      axis=1)                                  # (n,nb,tb+5,wp,c)
    bands = bands.reshape(n, nb, lb, c)

    # Residual, laid out exactly like the kernel's flattened conv2 output
    # (seam columns are zero-padded; they are discarded afterwards anyway).
    resp = jnp.pad(x_nhwc, ((0, 0), (0, h_pad - h), (0, 4), (0, 0)))
    resp = resp.reshape(n, nb, lout, c)

    # Per-band validity mask for the conv1 intermediate.
    j = jnp.arange(l1)
    p = j + wp + 1                       # flat position inside the band
    row_e = p // wp                      # extended-band row index
    col_e = p % wp
    gcol = col_e - 2                     # global image column
    col_ok = (gcol >= 0) & (gcol < w)
    grow = (jnp.arange(nb)[:, None] * tb) - 2 + row_e[None, :]
    row_ok = (grow >= 0) & (grow < h)
    mask = (row_ok & col_ok[None, :]).astype(x_nchw.dtype)[:, :, None]

    w1m, w2m = _weight_as_taps(w1), _weight_as_taps(w2)
    b1r, b2r = b1.reshape(1, c), b2.reshape(1, c)

    kernel = functools.partial(_residual_kernel, tb=tb, width=w, channels=c,
                               out_relu=out_relu)

    out = pl.pallas_call(
        kernel,
        out_shape=jax.ShapeDtypeStruct((n, nb, lout, c), x_nchw.dtype),
        grid=(n, nb),
        in_specs=[
            pl.BlockSpec((1, 1, lb, c), lambda ni, bi: (ni, bi, 0, 0)),
            pl.BlockSpec((1, 1, lout, c), lambda ni, bi: (ni, bi, 0, 0)),
            pl.BlockSpec((1, l1, 1), lambda ni, bi: (bi, 0, 0)),
            pl.BlockSpec((9, c, c), lambda ni, bi: (0, 0, 0)),   # resident
            pl.BlockSpec((1, c), lambda ni, bi: (0, 0)),         # resident
            pl.BlockSpec((9, c, c), lambda ni, bi: (0, 0, 0)),   # resident
            pl.BlockSpec((1, c), lambda ni, bi: (0, 0)),         # resident
        ],
        out_specs=pl.BlockSpec((1, 1, lout, c), lambda ni, bi: (ni, bi, 0, 0)),
        compiler_params=pltpu.CompilerParams(
            dimension_semantics=("parallel", "parallel"),
            vmem_limit_bytes=32 * 1024 * 1024),
    )(bands, resp, mask, w1m, b1r, w2m, b2r)

    # Drop seam columns / padded rows, back to NCHW.
    out = out.reshape(n, nb, tb, wp, c)[:, :, :, :w, :]
    out = out.reshape(n, h_pad, w, c)[:, :h]
    return jnp.transpose(out, (0, 3, 1, 2))


# ------------------------------- reference -----------------------------------


def _conv_ref(x_nchw, w, b):
    y = jax.lax.conv_general_dilated(
        x_nchw, w, window_strides=(1, 1), padding=((1, 1), (1, 1)),
        dimension_numbers=("NCHW", "OIHW", "NCHW"))
    return y + b.reshape(1, -1, 1, 1)


def residual_ref(x_nchw, params, out_relu=True):
    w1, b1, w2, b2 = params
    out = jnp.maximum(_conv_ref(x_nchw, w1, b1), 0.0)
    out = _conv_ref(out, w2, b2) + x_nchw
    if out_relu:
        out = jnp.maximum(out, 0.0)
    return out


# --------------------------------- main ---------------------------------------


if __name__ == "__main__":
    N, C, H, W = 2, 4, 16, 16  # small NCHW input, matches torch convention

    key = jax.random.PRNGKey(0)
    kx, k1, k2, k3, k4 = jax.random.split(key, 5)

    x = jax.random.normal(kx, (N, C, H, W), dtype=jnp.float32)
    # deterministic synthetic parameters (torch Conv2d weight layout OIHW)
    w1 = 0.1 * jax.random.normal(k1, (C, C, 3, 3), dtype=jnp.float32)
    b1 = 0.1 * jax.random.normal(k2, (C,), dtype=jnp.float32)
    w2 = 0.1 * jax.random.normal(k3, (C, C, 3, 3), dtype=jnp.float32)
    b2 = 0.1 * jax.random.normal(k4, (C,), dtype=jnp.float32)
    params = (w1, b1, w2, b2)

    fwd = jax.jit(residual_forward, static_argnames=("out_relu", "band_rows"))
    ref = jax.block_until_ready(residual_ref(x, params, True))

    # default banding (single band per image at this toy height)
    out = jax.block_until_ready(fwd(x, params, out_relu=True))
    assert out.shape == (N, C, H, W) and out.dtype == jnp.float32
    assert jnp.allclose(out, ref, rtol=1e-4, atol=1e-4), (
        float(jnp.max(jnp.abs(out - ref))))

    # multi-band path (2 row-bands per image) exercises the halo/seam handling
    out_b = jax.block_until_ready(fwd(x, params, out_relu=True, band_rows=8))
    assert jnp.allclose(out_b, ref, rtol=1e-4, atol=1e-4), (
        float(jnp.max(jnp.abs(out_b - ref))))

    print("KERNEL_OK")
</pallas_src>

<mosaic_0001>
module attributes {stable_mosaic.version = 11 : i64} {
  func.func @_residual_kernel(%arg0: i32, %arg1: i32, %arg2: memref<1x1x420x4xf32, #tpu.memory_space<vmem>>, %arg3: memref<1x1x320x4xf32, #tpu.memory_space<vmem>>, %arg4: memref<1x362x1xf32, #tpu.memory_space<vmem>>, %arg5: memref<9x4x4xf32, #tpu.memory_space<vmem>>, %arg6: memref<1x4xf32, #tpu.memory_space<vmem>>, %arg7: memref<9x4x4xf32, #tpu.memory_space<vmem>>, %arg8: memref<1x4xf32, #tpu.memory_space<vmem>>, %arg9: memref<1x1x320x4xf32, #tpu.memory_space<vmem>>) attributes {dimension_semantics = [#tpu.dimension_semantics<parallel>, #tpu.dimension_semantics<parallel>], iteration_bounds = array<i64: 2, 1>, scalar_prefetch = 0 : i64, scratch_operands = 0 : i64, tpu.core_type = #tpu.core_type<tc>, window_params = [{transform_indices = @transform_0, window_bounds = array<i64: 1, 1, 420, 4>}, {transform_indices = @transform_1, window_bounds = array<i64: 1, 1, 320, 4>}, {transform_indices = @transform_2, window_bounds = array<i64: 1, 362, 1>}, {pipeline_mode = #tpu.pipeline_mode<synchronous>, transform_indices = @transform_3, window_bounds = array<i64: 9, 4, 4>}, {pipeline_mode = #tpu.pipeline_mode<synchronous>, transform_indices = @transform_4, window_bounds = array<i64: 1, 4>}, {pipeline_mode = #tpu.pipeline_mode<synchronous>, transform_indices = @transform_5, window_bounds = array<i64: 9, 4, 4>}, {pipeline_mode = #tpu.pipeline_mode<synchronous>, transform_indices = @transform_6, window_bounds = array<i64: 1, 4>}, {transform_indices = @transform_7, window_bounds = array<i64: 1, 1, 320, 4>}]} {
    %c0 = arith.constant 0 : index
    %c0_0 = arith.constant 0 : index
    %c0_1 = arith.constant 0 : index
    %c0_2 = arith.constant 0 : index
    %0 = vector.load %arg2[%c0, %c0_0, %c0_1, %c0_2] : memref<1x1x420x4xf32, #tpu.memory_space<vmem>>, vector<1x1x420x4xf32>
    %1 = vector.shape_cast %0 : vector<1x1x420x4xf32> to vector<420x4xf32>
    %c0_3 = arith.constant 0 : index
    %c0_4 = arith.constant 0 : index
    %c0_5 = arith.constant 0 : index
    %c0_6 = arith.constant 0 : index
    %2 = vector.load %arg3[%c0_3, %c0_4, %c0_5, %c0_6] : memref<1x1x320x4xf32, #tpu.memory_space<vmem>>, vector<1x1x320x4xf32>
    %3 = vector.shape_cast %2 : vector<1x1x320x4xf32> to vector<320x4xf32>
    %c0_7 = arith.constant 0 : index
    %c0_8 = arith.constant 0 : index
    %c0_9 = arith.constant 0 : index
    %4 = vector.load %arg4[%c0_7, %c0_8, %c0_9] : memref<1x362x1xf32, #tpu.memory_space<vmem>>, vector<1x362x1xf32>
    %5 = vector.shape_cast %4 : vector<1x362x1xf32> to vector<362x1xf32>
    %c0_10 = arith.constant 0 : index
    %c0_11 = arith.constant 0 : index
    %c0_12 = arith.constant 0 : index
    %6 = vector.load %arg5[%c0_10, %c0_11, %c0_12] : memref<9x4x4xf32, #tpu.memory_space<vmem>>, vector<9x4x4xf32>
    %c0_13 = arith.constant 0 : index
    %c0_14 = arith.constant 0 : index
    %c0_15 = arith.constant 0 : index
    %7 = vector.load %arg7[%c0_13, %c0_14, %c0_15] : memref<9x4x4xf32, #tpu.memory_space<vmem>>, vector<9x4x4xf32>
    %c0_16 = arith.constant 0 : index
    %c0_17 = arith.constant 0 : index
    %8 = vector.load %arg6[%c0_16, %c0_17] : memref<1x4xf32, #tpu.memory_space<vmem>>, vector<1x4xf32>
    %c0_18 = arith.constant 0 : index
    %c0_19 = arith.constant 0 : index
    %9 = vector.load %arg8[%c0_18, %c0_19] : memref<1x4xf32, #tpu.memory_space<vmem>>, vector<1x4xf32>
    %10 = vector.shape_cast %8 : vector<1x4xf32> to vector<1x4xf32>
    %11 = vector.broadcast %10 : vector<1x4xf32> to vector<362x4xf32>
    %12 = vector.extract_strided_slice %1 {offsets = [0, 0], sizes = [362, 4], strides = [1, 1]} : vector<420x4xf32> to vector<362x4xf32>
    %13 = vector.extract_strided_slice %6 {offsets = [0, 0, 0], sizes = [1, 4, 4], strides = [1, 1, 1]} : vector<9x4x4xf32> to vector<1x4x4xf32>
    %14 = vector.shape_cast %13 : vector<1x4x4xf32> to vector<4x4xf32>
    %cst = arith.constant dense<0.000000e+00> : vector<362x4xf32>
    %15 = tpu.matmul %12, %14, %cst {dimension_numbers = #tpu.dot_dimension_numbers<[1], [0], [0], [1], [0, 0, 1, 1], [], []>} : vector<362x4xf32>, vector<4x4xf32>, vector<362x4xf32> -> vector<362x4xf32>
    %16 = arith.addf %11, %15 : vector<362x4xf32>
    %17 = vector.extract_strided_slice %1 {offsets = [1, 0], sizes = [362, 4], strides = [1, 1]} : vector<420x4xf32> to vector<362x4xf32>
    %18 = vector.extract_strided_slice %6 {offsets = [1, 0, 0], sizes = [1, 4, 4], strides = [1, 1, 1]} : vector<9x4x4xf32> to vector<1x4x4xf32>
    %19 = vector.shape_cast %18 : vector<1x4x4xf32> to vector<4x4xf32>
    %cst_20 = arith.constant dense<0.000000e+00> : vector<362x4xf32>
    %20 = tpu.matmul %17, %19, %cst_20 {dimension_numbers = #tpu.dot_dimension_numbers<[1], [0], [0], [1], [0, 0, 1, 1], [], []>} : vector<362x4xf32>, vector<4x4xf32>, vector<362x4xf32> -> vector<362x4xf32>
    %21 = arith.addf %16, %20 : vector<362x4xf32>
    %22 = vector.extract_strided_slice %1 {offsets = [2, 0], sizes = [362, 4], strides = [1, 1]} : vector<420x4xf32> to vector<362x4xf32>
    %23 = vector.extract_strided_slice %6 {offsets = [2, 0, 0], sizes = [1, 4, 4], strides = [1, 1, 1]} : vector<9x4x4xf32> to vector<1x4x4xf32>
    %24 = vector.shape_cast %23 : vector<1x4x4xf32> to vector<4x4xf32>
    %cst_21 = arith.constant dense<0.000000e+00> : vector<362x4xf32>
    %25 = tpu.matmul %22, %24, %cst_21 {dimension_numbers = #tpu.dot_dimension_numbers<[1], [0], [0], [1], [0, 0, 1, 1], [], []>} : vector<362x4xf32>, vector<4x4xf32>, vector<362x4xf32> -> vector<362x4xf32>
    %26 = arith.addf %21, %25 : vector<362x4xf32>
    %27 = vector.extract_strided_slice %1 {offsets = [20, 0], sizes = [362, 4], strides = [1, 1]} : vector<420x4xf32> to vector<362x4xf32>
    %28 = vector.extract_strided_slice %6 {offsets = [3, 0, 0], sizes = [1, 4, 4], strides = [1, 1, 1]} : vector<9x4x4xf32> to vector<1x4x4xf32>
    %29 = vector.shape_cast %28 : vector<1x4x4xf32> to vector<4x4xf32>
    %cst_22 = arith.constant dense<0.000000e+00> : vector<362x4xf32>
    %30 = tpu.matmul %27, %29, %cst_22 {dimension_numbers = #tpu.dot_dimension_numbers<[1], [0], [0], [1], [0, 0, 1, 1], [], []>} : vector<362x4xf32>, vector<4x4xf32>, vector<362x4xf32> -> vector<362x4xf32>
    %31 = arith.addf %26, %30 : vector<362x4xf32>
    %32 = vector.extract_strided_slice %1 {offsets = [21, 0], sizes = [362, 4], strides = [1, 1]} : vector<420x4xf32> to vector<362x4xf32>
    %33 = vector.extract_strided_slice %6 {offsets = [4, 0, 0], sizes = [1, 4, 4], strides = [1, 1, 1]} : vector<9x4x4xf32> to vector<1x4x4xf32>
    %34 = vector.shape_cast %33 : vector<1x4x4xf32> to vector<4x4xf32>
    %cst_23 = arith.constant dense<0.000000e+00> : vector<362x4xf32>
    %35 = tpu.matmul %32, %34, %cst_23 {dimension_numbers = #tpu.dot_dimension_numbers<[1], [0], [0], [1], [0, 0, 1, 1], [], []>} : vector<362x4xf32>, vector<4x4xf32>, vector<362x4xf32> -> vector<362x4xf32>
    %36 = arith.addf %31, %35 : vector<362x4xf32>
    %37 = vector.extract_strided_slice %1 {offsets = [22, 0], sizes = [362, 4], strides = [1, 1]} : vector<420x4xf32> to vector<362x4xf32>
    %38 = vector.extract_strided_slice %6 {offsets = [5, 0, 0], sizes = [1, 4, 4], strides = [1, 1, 1]} : vector<9x4x4xf32> to vector<1x4x4xf32>
    %39 = vector.shape_cast %38 : vector<1x4x4xf32> to vector<4x4xf32>
    %cst_24 = arith.constant dense<0.000000e+00> : vector<362x4xf32>
    %40 = tpu.matmul %37, %39, %cst_24 {dimension_numbers = #tpu.dot_dimension_numbers<[1], [0], [0], [1], [0, 0, 1, 1], [], []>} : vector<362x4xf32>, vector<4x4xf32>, vector<362x4xf32> -> vector<362x4xf32>
    %41 = arith.addf %36, %40 : vector<362x4xf32>
    %42 = vector.extract_strided_slice %1 {offsets = [40, 0], sizes = [362, 4], strides = [1, 1]} : vector<420x4xf32> to vector<362x4xf32>
    %43 = vector.extract_strided_slice %6 {offsets = [6, 0, 0], sizes = [1, 4, 4], strides = [1, 1, 1]} : vector<9x4x4xf32> to vector<1x4x4xf32>
    %44 = vector.shape_cast %43 : vector<1x4x4xf32> to vector<4x4xf32>
    %cst_25 = arith.constant dense<0.000000e+00> : vector<362x4xf32>
    %45 = tpu.matmul %42, %44, %cst_25 {dimension_numbers = #tpu.dot_dimension_numbers<[1], [0], [0], [1], [0, 0, 1, 1], [], []>} : vector<362x4xf32>, vector<4x4xf32>, vector<362x4xf32> -> vector<362x4xf32>
    %46 = arith.addf %41, %45 : vector<362x4xf32>
    %47 = vector.extract_strided_slice %1 {offsets = [41, 0], sizes = [362, 4], strides = [1, 1]} : vector<420x4xf32> to vector<362x4xf32>
    %48 = vector.extract_strided_slice %6 {offsets = [7, 0, 0], sizes = [1, 4, 4], strides = [1, 1, 1]} : vector<9x4x4xf32> to vector<1x4x4xf32>
    %49 = vector.shape_cast %48 : vector<1x4x4xf32> to vector<4x4xf32>
    %cst_26 = arith.constant dense<0.000000e+00> : vector<362x4xf32>
    %50 = tpu.matmul %47, %49, %cst_26 {dimension_numbers = #tpu.dot_dimension_numbers<[1], [0], [0], [1], [0, 0, 1, 1], [], []>} : vector<362x4xf32>, vector<4x4xf32>, vector<362x4xf32> -> vector<362x4xf32>
    %51 = arith.addf %46, %50 : vector<362x4xf32>
    %52 = vector.extract_strided_slice %1 {offsets = [42, 0], sizes = [362, 4], strides = [1, 1]} : vector<420x4xf32> to vector<362x4xf32>
    %53 = vector.extract_strided_slice %6 {offsets = [8, 0, 0], sizes = [1, 4, 4], strides = [1, 1, 1]} : vector<9x4x4xf32> to vector<1x4x4xf32>
    %54 = vector.shape_cast %53 : vector<1x4x4xf32> to vector<4x4xf32>
    %cst_27 = arith.constant dense<0.000000e+00> : vector<362x4xf32>
    %55 = tpu.matmul %52, %54, %cst_27 {dimension_numbers = #tpu.dot_dimension_numbers<[1], [0], [0], [1], [0, 0, 1, 1], [], []>} : vector<362x4xf32>, vector<4x4xf32>, vector<362x4xf32> -> vector<362x4xf32>
    %56 = arith.addf %51, %55 : vector<362x4xf32>
    %cst_28 = arith.constant 0.000000e+00 : f32
    %57 = vector.broadcast %cst_28 : f32 to vector<362x4xf32>
    %58 = arith.maximumf %56, %57 : vector<362x4xf32>
    %59 = vector.broadcast %5 : vector<362x1xf32> to vector<362x4xf32>
    %60 = arith.mulf %58, %59 : vector<362x4xf32>
    %61 = vector.shape_cast %9 : vector<1x4xf32> to vector<1x4xf32>
    %62 = vector.broadcast %61 : vector<1x4xf32> to vector<320x4xf32>
    %63 = vector.extract_strided_slice %60 {offsets = [0, 0], sizes = [320, 4], strides = [1, 1]} : vector<362x4xf32> to vector<320x4xf32>
    %64 = vector.extract_strided_slice %7 {offsets = [0, 0, 0], sizes = [1, 4, 4], strides = [1, 1, 1]} : vector<9x4x4xf32> to vector<1x4x4xf32>
    %65 = vector.shape_cast %64 : vector<1x4x4xf32> to vector<4x4xf32>
    %cst_29 = arith.constant dense<0.000000e+00> : vector<320x4xf32>
    %66 = tpu.matmul %63, %65, %cst_29 {dimension_numbers = #tpu.dot_dimension_numbers<[1], [0], [0], [1], [0, 0, 1, 1], [], []>} : vector<320x4xf32>, vector<4x4xf32>, vector<320x4xf32> -> vector<320x4xf32>
    %67 = arith.addf %62, %66 : vector<320x4xf32>
    %68 = vector.extract_strided_slice %60 {offsets = [1, 0], sizes = [320, 4], strides = [1, 1]} : vector<362x4xf32> to vector<320x4xf32>
    %69 = vector.extract_strided_slice %7 {offsets = [1, 0, 0], sizes = [1, 4, 4], strides = [1, 1, 1]} : vector<9x4x4xf32> to vector<1x4x4xf32>
    %70 = vector.shape_cast %69 : vector<1x4x4xf32> to vector<4x4xf32>
    %cst_30 = arith.constant dense<0.000000e+00> : vector<320x4xf32>
    %71 = tpu.matmul %68, %70, %cst_30 {dimension_numbers = #tpu.dot_dimension_numbers<[1], [0], [0], [1], [0, 0, 1, 1], [], []>} : vector<320x4xf32>, vector<4x4xf32>, vector<320x4xf32> -> vector<320x4xf32>
    %72 = arith.addf %67, %71 : vector<320x4xf32>
    %73 = vector.extract_strided_slice %60 {offsets = [2, 0], sizes = [320, 4], strides = [1, 1]} : vector<362x4xf32> to vector<320x4xf32>
    %74 = vector.extract_strided_slice %7 {offsets = [2, 0, 0], sizes = [1, 4, 4], strides = [1, 1, 1]} : vector<9x4x4xf32> to vector<1x4x4xf32>
    %75 = vector.shape_cast %74 : vector<1x4x4xf32> to vector<4x4xf32>
    %cst_31 = arith.constant dense<0.000000e+00> : vector<320x4xf32>
    %76 = tpu.matmul %73, %75, %cst_31 {dimension_numbers = #tpu.dot_dimension_numbers<[1], [0], [0], [1], [0, 0, 1, 1], [], []>} : vector<320x4xf32>, vector<4x4xf32>, vector<320x4xf32> -> vector<320x4xf32>
    %77 = arith.addf %72, %76 : vector<320x4xf32>
    %78 = vector.extract_strided_slice %60 {offsets = [20, 0], sizes = [320, 4], strides = [1, 1]} : vector<362x4xf32> to vector<320x4xf32>
    %79 = vector.extract_strided_slice %7 {offsets = [3, 0, 0], sizes = [1, 4, 4], strides = [1, 1, 1]} : vector<9x4x4xf32> to vector<1x4x4xf32>
    %80 = vector.shape_cast %79 : vector<1x4x4xf32> to vector<4x4xf32>
    %cst_32 = arith.constant dense<0.000000e+00> : vector<320x4xf32>
    %81 = tpu.matmul %78, %80, %cst_32 {dimension_numbers = #tpu.dot_dimension_numbers<[1], [0], [0], [1], [0, 0, 1, 1], [], []>} : vector<320x4xf32>, vector<4x4xf32>, vector<320x4xf32> -> vector<320x4xf32>
    %82 = arith.addf %77, %81 : vector<320x4xf32>
    %83 = vector.extract_strided_slice %60 {offsets = [21, 0], sizes = [320, 4], strides = [1, 1]} : vector<362x4xf32> to vector<320x4xf32>
    %84 = vector.extract_strided_slice %7 {offsets = [4, 0, 0], sizes = [1, 4, 4], strides = [1, 1, 1]} : vector<9x4x4xf32> to vector<1x4x4xf32>
    %85 = vector.shape_cast %84 : vector<1x4x4xf32> to vector<4x4xf32>
    %cst_33 = arith.constant dense<0.000000e+00> : vector<320x4xf32>
    %86 = tpu.matmul %83, %85, %cst_33 {dimension_numbers = #tpu.dot_dimension_numbers<[1], [0], [0], [1], [0, 0, 1, 1], [], []>} : vector<320x4xf32>, vector<4x4xf32>, vector<320x4xf32> -> vector<320x4xf32>
    %87 = arith.addf %82, %86 : vector<320x4xf32>
    %88 = vector.extract_strided_slice %60 {offsets = [22, 0], sizes = [320, 4], strides = [1, 1]} : vector<362x4xf32> to vector<320x4xf32>
    %89 = vector.extract_strided_slice %7 {offsets = [5, 0, 0], sizes = [1, 4, 4], strides = [1, 1, 1]} : vector<9x4x4xf32> to vector<1x4x4xf32>
    %90 = vector.shape_cast %89 : vector<1x4x4xf32> to vector<4x4xf32>
    %cst_34 = arith.constant dense<0.000000e+00> : vector<320x4xf32>
    %91 = tpu.matmul %88, %90, %cst_34 {dimension_numbers = #tpu.dot_dimension_numbers<[1], [0], [0], [1], [0, 0, 1, 1], [], []>} : vector<320x4xf32>, vector<4x4xf32>, vector<320x4xf32> -> vector<320x4xf32>
    %92 = arith.addf %87, %91 : vector<320x4xf32>
    %93 = vector.extract_strided_slice %60 {offsets = [40, 0], sizes = [320, 4], strides = [1, 1]} : vector<362x4xf32> to vector<320x4xf32>
    %94 = vector.extract_strided_slice %7 {offsets = [6, 0, 0], sizes = [1, 4, 4], strides = [1, 1, 1]} : vector<9x4x4xf32> to vector<1x4x4xf32>
    %95 = vector.shape_cast %94 : vector<1x4x4xf32> to vector<4x4xf32>
    %cst_35 = arith.constant dense<0.000000e+00> : vector<320x4xf32>
    %96 = tpu.matmul %93, %95, %cst_35 {dimension_numbers = #tpu.dot_dimension_numbers<[1], [0], [0], [1], [0, 0, 1, 1], [], []>} : vector<320x4xf32>, vector<4x4xf32>, vector<320x4xf32> -> vector<320x4xf32>
    %97 = arith.addf %92, %96 : vector<320x4xf32>
    %98 = vector.extract_strided_slice %60 {offsets = [41, 0], sizes = [320, 4], strides = [1, 1]} : vector<362x4xf32> to vector<320x4xf32>
    %99 = vector.extract_strided_slice %7 {offsets = [7, 0, 0], sizes = [1, 4, 4], strides = [1, 1, 1]} : vector<9x4x4xf32> to vector<1x4x4xf32>
    %100 = vector.shape_cast %99 : vector<1x4x4xf32> to vector<4x4xf32>
    %cst_36 = arith.constant dense<0.000000e+00> : vector<320x4xf32>
    %101 = tpu.matmul %98, %100, %cst_36 {dimension_numbers = #tpu.dot_dimension_numbers<[1], [0], [0], [1], [0, 0, 1, 1], [], []>} : vector<320x4xf32>, vector<4x4xf32>, vector<320x4xf32> -> vector<320x4xf32>
    %102 = arith.addf %97, %101 : vector<320x4xf32>
    %103 = vector.extract_strided_slice %60 {offsets = [42, 0], sizes = [320, 4], strides = [1, 1]} : vector<362x4xf32> to vector<320x4xf32>
    %104 = vector.extract_strided_slice %7 {offsets = [8, 0, 0], sizes = [1, 4, 4], strides = [1, 1, 1]} : vector<9x4x4xf32> to vector<1x4x4xf32>
    %105 = vector.shape_cast %104 : vector<1x4x4xf32> to vector<4x4xf32>
    %cst_37 = arith.constant dense<0.000000e+00> : vector<320x4xf32>
    %106 = tpu.matmul %103, %105, %cst_37 {dimension_numbers = #tpu.dot_dimension_numbers<[1], [0], [0], [1], [0, 0, 1, 1], [], []>} : vector<320x4xf32>, vector<4x4xf32>, vector<320x4xf32> -> vector<320x4xf32>
    %107 = arith.addf %102, %106 : vector<320x4xf32>
    %108 = arith.addf %107, %3 : vector<320x4xf32>
    %cst_38 = arith.constant 0.000000e+00 : f32
    %109 = vector.broadcast %cst_38 : f32 to vector<320x4xf32>
    %110 = arith.maximumf %108, %109 : vector<320x4xf32>
    %111 = vector.shape_cast %110 : vector<320x4xf32> to vector<1x1x320x4xf32>
    %c0_39 = arith.constant 0 : index
    %c0_40 = arith.constant 0 : index
    %c0_41 = arith.constant 0 : index
    %c0_42 = arith.constant 0 : index
    %112 = vector.load %arg9[%c0_39, %c0_40, %c0_41, %c0_42] : memref<1x1x320x4xf32, #tpu.memory_space<vmem>>, vector<1x1x320x4xf32>
    tpu.vector_store %arg9[%c0_39, %c0_40, %c0_41, %c0_42], %111 {strides = array<i32>} : memref<1x1x320x4xf32, #tpu.memory_space<vmem>>, vector<1x1x320x4xf32>,
    return
  }
  func.func @transform_0(%arg0: i32, %arg1: i32) -> (i32, i32, i32, i32) {
    %c0_i32 = arith.constant 0 : i32
    %c0_i32_0 = arith.constant 0 : i32
    %c0_i32_1 = arith.constant 0 : i32
    return %arg0, %arg1, %c0_i32, %c0_i32_0 : i32, i32, i32, i32
  }
  func.func @transform_1(%arg0: i32, %arg1: i32) -> (i32, i32, i32, i32) {
    %c0_i32 = arith.constant 0 : i32
    %c0_i32_0 = arith.constant 0 : i32
    %c0_i32_1 = arith.constant 0 : i32
    return %arg0, %arg1, %c0_i32, %c0_i32_0 : i32, i32, i32, i32
  }
  func.func @transform_2(%arg0: i32, %arg1: i32) -> (i32, i32, i32) {
    %c0_i32 = arith.constant 0 : i32
    %c0_i32_0 = arith.constant 0 : i32
    %c0_i32_1 = arith.constant 0 : i32
    return %arg1, %c0_i32, %c0_i32_0 : i32, i32, i32
  }
  func.func @transform_3(%arg0: i32, %arg1: i32) -> (i32, i32, i32) {
    %c0_i32 = arith.constant 0 : i32
    %c0_i32_0 = arith.constant 0 : i32
    %c0_i32_1 = arith.constant 0 : i32
    %c0_i32_2 = arith.constant 0 : i32
    return %c0_i32, %c0_i32_0, %c0_i32_1 : i32, i32, i32
  }
  func.func @transform_4(%arg0: i32, %arg1: i32) -> (i32, i32) {
    %c0_i32 = arith.constant 0 : i32
    %c0_i32_0 = arith.constant 0 : i32
    %c0_i32_1 = arith.constant 0 : i32
    return %c0_i32, %c0_i32_0 : i32, i32
  }
  func.func @transform_5(%arg0: i32, %arg1: i32) -> (i32, i32, i32) {
    %c0_i32 = arith.constant 0 : i32
    %c0_i32_0 = arith.constant 0 : i32
    %c0_i32_1 = arith.constant 0 : i32
    %c0_i32_2 = arith.constant 0 : i32
    return %c0_i32, %c0_i32_0, %c0_i32_1 : i32, i32, i32
  }
  func.func @transform_6(%arg0: i32, %arg1: i32) -> (i32, i32) {
    %c0_i32 = arith.constant 0 : i32
    %c0_i32_0 = arith.constant 0 : i32
    %c0_i32_1 = arith.constant 0 : i32
    return %c0_i32, %c0_i32_0 : i32, i32
  }
  func.func @transform_7(%arg0: i32, %arg1: i32) -> (i32, i32, i32, i32) {
    %c0_i32 = arith.constant 0 : i32
    %c0_i32_0 = arith.constant 0 : i32
    %c0_i32_1 = arith.constant 0 : i32
    return %arg0, %arg1, %c0_i32, %c0_i32_0 : i32, i32, i32, i32
  }
}

</mosaic_0001>

<bundles_post_ra>
// kernel: residual_forward.1
= control target key start
LH: loop header
LB: loop body
LE: loop exit
PB: predicated region body
PF: predicated region fallthrough
CT: control target
= control target key end

     0   :  { %s12786_s24 = smov 0   ;;  %s12788_s25 = smov 0   ;;  %s16320_s0 = inlined_call_operand.vmem [shape: f32[2,1,420,4], index: 0, kind: input, shape index: {}]   ;;  %s16321_s1 = inlined_call_operand.vmem [shape: f32[2,1,320,4], index: 1, kind: input, shape index: {}]   ;;  %s16322_s2 = inlined_call_operand.vmem [shape: f32[1,362,1], index: 2, kind: input, shape index: {}]   ;;  %s16323_s3 = inlined_call_operand.vmem [shape: f32[9,4,4], index: 3, kind: input, shape index: {}]   ;;  %s16324_s4 = inlined_call_operand.vmem [shape: f32[1,4], index: 4, kind: input, shape index: {}]   ;;  %s16325_s5 = inlined_call_operand.vmem [shape: f32[9,4,4], index: 5, kind: input, shape index: {}]   ;;  %s16326_s6 = inlined_call_operand.vmem [shape: f32[1,4], index: 6, kind: input, shape index: {}]   ;;  %s16327_s7 = inlined_call_operand.vmem [shape: f32[2,1,320,4], index: 7, kind: output, shape index: {}]  }
   0x1   :  { %s12790_s26 = smov 0  }
   0x2 LB: > { %s29_s27 = sadd.s32 1, %s12739_s25  ;;  %p9081_p0 = scmp.ge.s32.totalorder %s12743_s26, 1  ;;  %s12743_s26 = sphi %s12790_s26, %s17_s26   ;;  %s12739_s25 = sphi %s12788_s25, %s16763_s25   ;;  %s12735_s24 = sphi %s12786_s24, %s16762_s24  }
   0x3   : > { %p31_p1 = scmp.ge.s32.totalorder %s29_s27, 2  ;;  %p283_p2 = scmp.lt.s32.totalorder %s12743_s26, 3 }
   0x5   : > { %s16765_s27 = smov (%p31_p1, %s29_s27), 0  ;;  %p284_p3 = pnand %p9081_p0, %p283_p2 }
   0x7   : > { %287 = sbr.rel (%p284_p3) target bundleno = 1862 (0x746), region = 48 }
   0xe   : > { %v506_v0 = vld [vmem:[%s16323_s3] sm:$0xf]  ;;  %vm671_vm0 = vcmask 1043456   ;;  %p337_p4 = scmp.lt.s32.totalorder %s12735_s24, 1  ;;  %v507_v1 = vld [vmem:[%s16323_s3 + $0x4] sm:$0xf] }
   0xf   : > { %10673 = vmatprep.subr.msk.mxu0 %vm671_vm0, %v506_v0  ;;  %11870 = vmatprep.subr.msk.mxu1 %vm671_vm0, %v506_v0  ;;  %vm532_vm1 = vcmask 31744   ;;  %v12837_v5 = vld [vmem:[%s16323_s3 + $0x8] sm:$0xf]  ;;  %vm1544_vm2 = vcmask 1045504   ;;  %vm1016_vm3 = vcmask 1046528   ;;  %vm2601_vm4 = vcmask 1042432  }
  0x10   : > { %10674 = vmatpush3.msk.msra.mxu0 %vm671_vm0, %v506_v0  ;;  %s16767_s24 = smov (!%p337_p4, %s12735_s24), 1  ;;  %11871 = vmatpush3.msk.msra.mxu1 %vm671_vm0, %v506_v0  ;;  %v13042_v54 = vld [vmem:[%s16323_s3 + $0xc] sm:$0xf]  ;;  %vm3129_vm5 = vcmask 1041408  }
  0x11   : > { %10744 = vmatprep.subr.msk.mxu0 %vm671_vm0, %v507_v1  ;;  %s12646_s9 = smul.u32 424, %s16767_s24 }
  0x12   : > { %s12647_s11 = smul.u32 320, %s16767_s24 }
  0x13   : > { %s12821_s12 = scalar_lea.vmem %s16320_s0, %s12646_s9 }
  0x14   : > { %v12824_v2 = vld [vmem:[%s12821_s12] sm:$0xff]  ;;  %v12827_v3 = vld [vmem:[%s12821_s12 + $0x8] sm:$0xff]  ;;  %v12830_v4 = vld [vmem:[%s12821_s12 + $0x10] sm:$0xff]  ;;  %s16139_s14 = scalar_lea.vmem %s16321_s1, %s12647_s11  ;;  %s16153_s18 = scalar_lea.vmem %s16327_s7, %s12647_s11 }
  0x15   : > { %10675 = vmatprep.mubr.msk.f32.mxu0 %vm532_vm1, %v12824_v2  ;;  %v12845_v6 = vld [vmem:[%s12821_s12 + $0x18] sm:$0xff]  ;;  %v12848_v7 = vld [vmem:[%s12821_s12 + $0x20] sm:$0xff]  ;;  %v12857_v8 = vld [vmem:[%s12821_s12 + $0x28] sm:$0xff]  ;;  %v1545_v22 = vrot.slane %v12824_v2, 2  ;;  %v16328_v23 = vrot.slane %v12827_v3, 2  ;;  %v1017_v37 = vrot.slane %v12824_v2, 1 }
  0x16   : > { %10676 = vmatmul.mubr.msk.f32.vlgmr.msra.gmra.mrb[0].mxu0 %vm532_vm1, %v12827_v3  ;;  %v12860_v9 = vld [vmem:[%s12821_s12 + $0xa0] sm:$0xff]  ;;  %v12863_v10 = vld [vmem:[%s12821_s12 + $0x30] sm:$0xff]  ;;  %v12866_v11 = vld [vmem:[%s12821_s12 + $0xa8] sm:$0xff]  ;;  %v1018_v38 = vrot.slane %v12827_v3, 1  ;;  %v1020_v43 = vrot.slane %v12830_v4, 1  ;;  %v1022_v45 = vrot.slane %v12845_v6, 1 }
  0x17   : > { %10745 = vmatpush3.msk.msra.mxu0 %vm671_vm0, %v507_v1  ;;  %10678 = vmatprep.mubr.msk.f32.mxu0 %vm532_vm1, %v12830_v4  ;;  %v12871_v12 = vld [vmem:[%s12821_s12 + $0xb0] sm:$0xff]  ;;  %v12882_v13 = vld [vmem:[%s12821_s12 + $0x38] sm:$0xff]  ;;  %v12885_v14 = vld [vmem:[%s12821_s12 + $0x40] sm:$0xff]  ;;  %v12955_v30 = vsel %vm1544_vm2, %v1545_v22, %v16328_v23  ;;  %v1024_v49 = vrot.slane %v12848_v7, 1  ;;  %v1026_v51 = vrot.slane %v12857_v8, 1  ;;  %v1028_v56 = vrot.slane %v12863_v10, 1 }
  0x18   : > { %10815 = vmatprep.subr.msk.mxu0 %vm671_vm0, %v12837_v5  ;;  %10705 = vmatprep.mubr.msk.f32.mxu1 %vm532_vm1, %v12860_v9  ;;  %v12888_v15 = vld [vmem:[%s12821_s12 + $0xb8] sm:$0xff]  ;;  %v12891_v16 = vld [vmem:[%s12821_s12 + $0xc0] sm:$0xff]  ;;  %v12902_v17 = vld [vmem:[%s12821_s12 + $0x48] sm:$0xff]  ;;  %v1019_v44 = vsel %vm1016_vm3, %v1017_v37, %v1018_v38  ;;  %v1021_v48 = vsel %vm1016_vm3, %v1018_v38, %v1020_v43  ;;  %v1023_v50 = vsel %vm1016_vm3, %v1020_v43, %v1022_v45  ;;  %v1030_v58 = vrot.slane %v12882_v13, 1 }
  0x19   : > { %10706 = vmatmul.mubr.msk.f32.vlgmr.msra.gmra.mrb[0].mxu1 %vm532_vm1, %v12866_v11  ;;  %v12905_v18 = vld [vmem:[%s12821_s12 + $0x50] sm:$0xff]  ;;  %v12908_v19 = vld [vmem:[%s12821_s12 + $0xc8] sm:$0xff]  ;;  %v12922_v21 = vld [vmem:[%s12821_s12 + $0x58] sm:$0xff]  ;;  %v1025_v55 = vsel %vm1016_vm3, %v1022_v45, %v1024_v49  ;;  %v1027_v57 = vsel %vm1016_vm3, %v1024_v49, %v1026_v51  ;;  %v13071_v61 = vsel %vm1016_vm3, %v1026_v51, %v1028_v56  ;;  %v1032_v62 = vrot.slane %v12885_v14, 1 }
  0x1a   : > { %10679 = vmatmul.mubr.msk.f32.gmra.mrb[2].mxu0 %vm532_vm1, %v12845_v6  ;;  %10708 = vmatprep.mubr.msk.f32.mxu1 %vm532_vm1, %v12871_v12  ;;  %v12911_v20 = vld [vmem:[%s12821_s12 + $0xd0] sm:$0xff]  ;;  %v12927_v24 = vld [vmem:[%s12821_s12 + $0x60] sm:$0xff]  ;;  %v12930_v25 = vld [vmem:[%s12821_s12 + $0xd8] sm:$0xff]  ;;  %v13075_v63 = vsel %vm1016_vm3, %v1028_v56, %v1030_v58  ;;  %v1034_v0 = vrot.slane %v12902_v17, 1  ;;  %v1036_v22 = vrot.slane %v12905_v18, 1  ;;  %v1038_v38 = vrot.slane %v12922_v21, 1 }
  0x1b   : > { %10681 = vmatprep.mubr.msk.f32.mxu0 %vm532_vm1, %v12848_v7  ;;  %v12933_v26 = vld [vmem:[%s12821_s12 + $0xe0] sm:$0xff]  ;;  %v12944_v27 = vld [vmem:[%s12821_s12 + $0x68] sm:$0xff]  ;;  %v12947_v28 = vld [vmem:[%s12821_s12 + $0x70] sm:$0xff] }
  0x1c   : > { %v12950_v29 = vld [vmem:[%s12821_s12 + $0xe8] sm:$0xff]  ;;  %v12958_v31 = vld [vmem:[%s12821_s12 + $0xf0] sm:$0xff]  ;;  %v12969_v32 = vld [vmem:[%s12821_s12 + $0x78] sm:$0xff]  ;;  %v13097_v37 = vsel %vm1016_vm3, %v1032_v62, %v1034_v0  ;;  %v13115_v45 = vsel %vm1016_vm3, %v1034_v0, %v1036_v22  ;;  %v13119_v49 = vsel %vm1016_vm3, %v1036_v22, %v1038_v38  ;;  %v1044_v56 = vrot.slane %v12947_v28, 1 }
  0x1d   : > { %10709 = vmatmul.mubr.msk.f32.gmra.mrb[2].mxu1 %vm532_vm1, %v12888_v15  ;;  %v12972_v33 = vld [vmem:[%s12821_s12 + $0x80] sm:$0xff]  ;;  %v12975_v34 = vld [vmem:[%s12821_s12 + $0xf8] sm:$0xff]  ;;  %v12989_v36 = vld [vmem:[%s12821_s12 + $0x88] sm:$0xff] }
  0x1e   : > { %10682 = vmatmul.mubr.msk.f32.gmra.mrb[4].mxu0 %vm532_vm1, %v12857_v8  ;;  %10711 = vmatprep.mubr.msk.f32.mxu1 %vm532_vm1, %v12891_v16  ;;  %v12978_v35 = vld [vmem:[%s12821_s12 + $0x100] sm:$0xff]  ;;  %v12994_v39 = vld [vmem:[%s12821_s12 + $0x90] sm:$0xff]  ;;  %v12997_v40 = vld [vmem:[%s12821_s12 + $0x108] sm:$0xff]  ;;  %v1048_v0 = vrot.slane %v12972_v33, 1 }
  0x1f   : > { %10684 = vmatprep.mubr.msk.f32.mxu0 %vm532_vm1, %v12863_v10  ;;  %v13000_v41 = vld [vmem:[%s12821_s12 + $0x110] sm:$0xff]  ;;  %v13011_v42 = vld [vmem:[%s12821_s12 + $0x98] sm:$0xff]  ;;  %v13020_v47 = vld [vmem:[%s12821_s12 + $0x120] sm:$0xff]  ;;  %v1052_v23 = vrot.slane %v12994_v39, 1 }
  0x20   : > { %v13017_v46 = vld [vmem:[%s12821_s12 + $0x118] sm:$0xff]  ;;  %v13034_v52 = vld [vmem:[%s12821_s12 + $0x128] sm:$0xff]  ;;  %v13037_v53 = vld [vmem:[%s12821_s12 + $0x130] sm:$0xff] }
  0x21   : > { %10712 = vmatmul.mubr.msk.f32.gmra.mrb[4].mxu1 %vm532_vm1, %v12908_v19  ;;  %v13057_v59 = vld [vmem:[%s12821_s12 + $0x138] sm:$0xff]  ;;  %v13062_v60 = vld [vmem:[%s12821_s12 + $0x140] sm:$0xff]  ;;  %v13079_v1 = vld [vmem:[%s12821_s12 + $0x148] sm:$0xff] }
  0x22   : > { %10685 = vmatmul.mubr.msk.f32.gmra.mrb[6].mxu0 %vm532_vm1, %v12882_v13  ;;  %10714 = vmatprep.mubr.msk.f32.mxu1 %vm532_vm1, %v12911_v20  ;;  %v13082_v2 = vld [vmem:[%s12821_s12 + $0x150] sm:$0xff]  ;;  %v13101_v43 = vld [vmem:[%s12821_s12 + $0x158] sm:$0xff]  ;;  %v13123_v51 = vld [vmem:[%s12821_s12 + $0x168] sm:$0xff] }
  0x23   : > { %10687 = vmatprep.mubr.msk.f32.mxu0 %vm532_vm1, %v12885_v14 }
  0x25   : > { %10715 = vmatmul.mubr.msk.f32.gmra.mrb[6].mxu1 %vm532_vm1, %v12930_v25 }
  0x26   : > { %10688 = vmatmul.mubr.msk.f32.gmra.mrb[8].mxu0 %vm532_vm1, %v12902_v17  ;;  %10717 = vmatprep.mubr.msk.f32.mxu1 %vm532_vm1, %v12933_v26 }
  0x27   : > { %10690 = vmatprep.mubr.msk.f32.mxu0 %vm532_vm1, %v12905_v18 }
  0x29   : > { %10718 = vmatmul.mubr.msk.f32.gmra.mrb[8].mxu1 %vm532_vm1, %v12950_v29 }
  0x2a   : > { %10691 = vmatmul.mubr.msk.f32.gmra.mrb[10].mxu0 %vm532_vm1, %v12922_v21  ;;  %10720 = vmatprep.mubr.msk.f32.mxu1 %vm532_vm1, %v12958_v31 }
  0x2b   : > { %10693 = vmatprep.mubr.msk.f32.mxu0 %vm532_vm1, %v12927_v24 }
  0x2d   : > { %10721 = vmatmul.mubr.msk.f32.gmra.mrb[10].mxu1 %vm532_vm1, %v12975_v34 }
  0x2e   : > { %10694 = vmatmul.mubr.msk.f32.gmra.mrb[12].mxu0 %vm532_vm1, %v12944_v27  ;;  %10723 = vmatprep.mubr.msk.f32.mxu1 %vm532_vm1, %v12978_v35 }
  0x2f   : > { %10696 = vmatprep.mubr.msk.f32.mxu0 %vm532_vm1, %v12947_v28 }
  0x31   : > { %10724 = vmatmul.mubr.msk.f32.gmra.mrb[12].mxu1 %vm532_vm1, %v12997_v40 }
  0x32   : > { %10697 = vmatmul.mubr.msk.f32.gmra.mrb[14].mxu0 %vm532_vm1, %v12969_v32  ;;  %10726 = vmatprep.mubr.msk.f32.mxu1 %vm532_vm1, %v13000_v41 }
  0x33   : > { %10699 = vmatprep.mubr.msk.f32.mxu0 %vm532_vm1, %v12972_v33 }
  0x35   : > { %10727 = vmatmul.mubr.msk.f32.gmra.mrb[14].mxu1 %vm532_vm1, %v13017_v46 }
  0x36   : > { %10700 = vmatmul.mubr.msk.f32.gmra.mrb[16].mxu0 %vm532_vm1, %v12989_v36  ;;  %10729 = vmatprep.mubr.msk.f32.mxu1 %vm532_vm1, %v13020_v47 }
  0x37   : > { %10702 = vmatprep.mubr.msk.f32.mxu0 %vm532_vm1, %v12994_v39 }
  0x39   : > { %10730 = vmatmul.mubr.msk.f32.gmra.mrb[16].mxu1 %vm532_vm1, %v13034_v52 }
  0x3a   : > { %10703 = vmatmul.mubr.msk.f32.gmra.mrb[18].mxu0 %vm532_vm1, %v13011_v42  ;;  %10732 = vmatprep.mubr.msk.f32.mxu1 %vm532_vm1, %v13037_v53 }
  0x3b   : > { %10746 = vmatprep.mubr.msk.f32.mxu0 %vm532_vm1, %v1019_v44  ;;  %v13104_v44 = vld [vmem:[%s12821_s12 + $0x160] sm:$0xff] }
  0x3d   : > { %10733 = vmatmul.mubr.msk.f32.gmra.mrb[18].mxu1 %vm532_vm1, %v13057_v59 }
  0x3e   : > { %10747 = vmatmul.mubr.msk.f32.vlgmr.msra.gmra.mrb[0].mxu0 %vm532_vm1, %v1021_v48  ;;  %10735 = vmatprep.mubr.msk.f32.mxu1 %vm532_vm1, %v13062_v60  ;;  %v1040_v48 = vrot.slane %v12927_v24, 1 }
  0x3f   : > { %10816 = vmatpush3.msk.msra.mxu0 %vm671_vm0, %v12837_v5  ;;  %10749 = vmatprep.mubr.msk.f32.mxu0 %vm532_vm1, %v1023_v50  ;;  %v13093_v5 = vsel %vm1016_vm3, %v1030_v58, %v1032_v62  ;;  %v1042_v50 = vrot.slane %v12944_v27, 1  ;;  %v1046_v58 = vrot.slane %v12969_v32, 1 }
  0x40   : > { %10886 = vmatprep.subr.msk.mxu0 %vm671_vm0, %v13042_v54 }
  0x41   : > { %10736 = vmatmul.mubr.msk.f32.gmra.mrb[20].mxu1 %vm532_vm1, %v13079_v1  ;;  %v13144_v62 = vsel %vm1016_vm3, %v1042_v50, %v1044_v56  ;;  %v13148_v22 = vsel %vm1016_vm3, %v1044_v56, %v1046_v58 }
  0x42   : > { %10750 = vmatmul.mubr.msk.f32.gmra.mrb[2].mxu0 %vm532_vm1, %v1025_v55  ;;  %10738 = vmatprep.mubr.msk.f32.mxu1 %vm532_vm1, %v13082_v2  ;;  %v13132_v55 = vsel %vm1016_vm3, %v1038_v38, %v1040_v48  ;;  %16476 = vst [vmem:[#allocation3_spill] sm:$0xff] %v13144_v62  ;;  %16477 = vst [vmem:[#allocation4_spill] sm:$0xff] %v13148_v22  ;;  %v1050_v38 = vrot.slane %v12989_v36, 1 }
  0x43   : > { %10752 = vmatprep.mubr.msk.f32.mxu0 %vm532_vm1, %v1027_v57  ;;  %v13136_v57 = vsel %vm1016_vm3, %v1040_v48, %v1042_v50  ;;  %v13156_v48 = vsel %vm1016_vm3, %v1046_v58, %v1048_v0 }
  0x44   : > { %16475 = vst [vmem:[#allocation2_spill] sm:$0xff] %v13136_v57  ;;  %16478 = vst [vmem:[#allocation5_spill] sm:$0xff] %v13156_v48  ;;  %v13160_v50 = vsel %vm1016_vm3, %v1048_v0, %v1050_v38  ;;  %v13168_v56 = vsel %vm1016_vm3, %v1050_v38, %v1052_v23 }
  0x45   : > { %10739 = vmatmul.mubr.msk.f32.gmra.mrb[22].mxu1 %vm532_vm1, %v13101_v43  ;;  %16479 = vst [vmem:[#allocation6_spill] sm:$0xff] %v13160_v50  ;;  %16480 = vst [vmem:[#allocation7_spill] sm:$0xff] %v13168_v56 }
  0x46   : > { %10753 = vmatmul.mubr.msk.f32.gmra.mrb[4].mxu0 %vm532_vm1, %v13071_v61  ;;  %10741 = vmatprep.mubr.msk.f32.mxu1 %vm532_vm1, %v13104_v44 }
  0x47   : > { %10755 = vmatprep.mubr.msk.f32.mxu0 %vm532_vm1, %v13075_v63 }
  0x49   : > { %10742 = vmatmul.mubr.msk.f32.gmra.mrb[24].mxu1 %vm532_vm1, %v13123_v51 }
  0x4a   : > { %10756 = vmatmul.mubr.msk.f32.gmra.mrb[6].mxu0 %vm532_vm1, %v13093_v5 }
  0x4b   : > { %10758 = vmatprep.mubr.msk.f32.mxu0 %vm532_vm1, %v13097_v37 }
  0x4e   : > { %10759 = vmatmul.mubr.msk.f32.gmra.mrb[8].mxu0 %vm532_vm1, %v13115_v45 }
  0x4f   : > { %10761 = vmatprep.mubr.msk.f32.mxu0 %vm532_vm1, %v13119_v49 }
  0x52   : > { %10762 = vmatmul.mubr.msk.f32.gmra.mrb[10].mxu0 %vm532_vm1, %v13132_v55 }
  0x53   : > { %10764 = vmatprep.mubr.msk.f32.mxu0 %vm532_vm1, %v13136_v57  ;;  %v1054_v57 = vrot.slane %v13011_v42, 1 }
  0x55   : > { %v13172_v58 = vsel %vm1016_vm3, %v1052_v23, %v1054_v57 }
  0x56   : > { %10765 = vmatmul.mubr.msk.f32.gmra.mrb[12].mxu0 %vm532_vm1, %v13144_v62  ;;  %16481 = vst [vmem:[#allocation8_spill] sm:$0xff] %v13172_v58  ;;  %v1058_v62 = vrot.slane %v12866_v11, 1 }
  0x57   : > { %10767 = vmatprep.mubr.msk.f32.mxu0 %vm532_vm1, %v13148_v22  ;;  %v1056_v22 = vrot.slane %v12860_v9, 1 }
  0x59   : > { %v13180_v0 = vsel %vm1016_vm3, %v1054_v57, %v1056_v22  ;;  %v13184_v38 = vsel %vm1016_vm3, %v1056_v22, %v1058_v62 }
  0x5a   : > { %10768 = vmatmul.mubr.msk.f32.gmra.mrb[14].mxu0 %vm532_vm1, %v13156_v48  ;;  %16482 = vst [vmem:[#allocation9_spill] sm:$0xff] %v13180_v0  ;;  %16483 = vst [vmem:[#allocation10_spill] sm:$0xff] %v13184_v38  ;;  %v1062_v48 = vrot.slane %v12888_v15, 1 }
  0x5b   : > { %10770 = vmatprep.mubr.msk.f32.mxu0 %vm532_vm1, %v13160_v50  ;;  %v1060_v50 = vrot.slane %v12871_v12, 1 }
  0x5d   : > { %v13192_v23 = vsel %vm1016_vm3, %v1058_v62, %v1060_v50  ;;  %v13196_v57 = vsel %vm1016_vm3, %v1060_v50, %v1062_v48 }
  0x5e   : > { %10771 = vmatmul.mubr.msk.f32.gmra.mrb[16].mxu0 %vm532_vm1, %v13168_v56  ;;  %16484 = vst [vmem:[#allocation11_spill] sm:$0xff] %v13192_v23  ;;  %16485 = vst [vmem:[#allocation12_spill] sm:$0xff] %v13196_v57  ;;  %v1066_v56 = vrot.slane %v12908_v19, 1 }
  0x5f   : > { %10773 = vmatprep.mubr.msk.f32.mxu0 %vm532_vm1, %v13172_v58  ;;  %v1064_v58 = vrot.slane %v12891_v16, 1 }
  0x61   : > { %v13204_v22 = vsel %vm1016_vm3, %v1062_v48, %v1064_v58  ;;  %v13208_v62 = vsel %vm1016_vm3, %v1064_v58, %v1066_v56 }
  0x62   : > { %10774 = vmatmul.mubr.msk.f32.gmra.mrb[18].mxu0 %vm532_vm1, %v13180_v0  ;;  %16486 = vst [vmem:[#allocation13_spill] sm:$0xff] %v13204_v22  ;;  %16487 = vst [vmem:[#allocation14_spill] sm:$0xff] %v13208_v62  ;;  %v1070_v0 = vrot.slane %v12930_v25, 1 }
  0x63   : > { %10776 = vmatprep.mubr.msk.f32.mxu0 %vm532_vm1, %v13184_v38  ;;  %v1068_v38 = vrot.slane %v12911_v20, 1 }
  0x65   : > { %v13216_v50 = vsel %vm1016_vm3, %v1066_v56, %v1068_v38  ;;  %v13220_v48 = vsel %vm1016_vm3, %v1068_v38, %v1070_v0 }
  0x66   : > { %10777 = vmatmul.mubr.msk.f32.gmra.mrb[20].mxu0 %vm532_vm1, %v13192_v23  ;;  %16488 = vst [vmem:[#allocation15_spill] sm:$0xff] %v13216_v50  ;;  %16489 = vst [vmem:[#allocation16_spill] sm:$0xff] %v13220_v48  ;;  %v1074_v23 = vrot.slane %v12950_v29, 1 }
  0x67   : > { %10779 = vmatprep.mubr.msk.f32.mxu0 %vm532_vm1, %v13196_v57  ;;  %v1072_v57 = vrot.slane %v12933_v26, 1 }
  0x69   : > { %v13228_v58 = vsel %vm1016_vm3, %v1070_v0, %v1072_v57  ;;  %v13232_v56 = vsel %vm1016_vm3, %v1072_v57, %v1074_v23 }
  0x6a   : > { %10780 = vmatmul.mubr.msk.f32.gmra.mrb[22].mxu0 %vm532_vm1, %v13204_v22  ;;  %16490 = vst [vmem:[#allocation17_spill] sm:$0xff] %v13228_v58  ;;  %16491 = vst [vmem:[#allocation18_spill] sm:$0xff] %v13232_v56  ;;  %v1078_v22 = vrot.slane %v12975_v34, 1 }
  0x6b   : > { %10782 = vmatprep.mubr.msk.f32.mxu0 %vm532_vm1, %v13208_v62  ;;  %v1076_v62 = vrot.slane %v12958_v31, 1 }
  0x6d   : > { %v13240_v38 = vsel %vm1016_vm3, %v1074_v23, %v1076_v62  ;;  %v13244_v0 = vsel %vm1016_vm3, %v1076_v62, %v1078_v22 }
  0x6e   : > { %10783 = vmatmul.mubr.msk.f32.gmra.mrb[24].mxu0 %vm532_vm1, %v13216_v50  ;;  %16492 = vst [vmem:[#allocation19_spill] sm:$0xff] %v13240_v38  ;;  %16493 = vst [vmem:[#allocation20_spill] sm:$0xff] %v13244_v0  ;;  %v1082_v50 = vrot.slane %v12997_v40, 1 }
  0x6f   : > { %10785 = vmatprep.mubr.msk.f32.mxu0 %vm532_vm1, %v13220_v48  ;;  %v1080_v48 = vrot.slane %v12978_v35, 1 }
  0x71   : > { %v13252_v57 = vsel %vm1016_vm3, %v1078_v22, %v1080_v48  ;;  %v13256_v23 = vsel %vm1016_vm3, %v1080_v48, %v1082_v50 }
  0x72   : > { %10786 = vmatmul.mubr.msk.f32.gmra.mrb[26].mxu0 %vm532_vm1, %v13228_v58  ;;  %16494 = vst [vmem:[#allocation21_spill] sm:$0xff] %v13252_v57  ;;  %16495 = vst [vmem:[#allocation22_spill] sm:$0xff] %v13256_v23  ;;  %v1086_v58 = vrot.slane %v13017_v46, 1 }
  0x73   : > { %10788 = vmatprep.mubr.msk.f32.mxu0 %vm532_vm1, %v13232_v56  ;;  %v1084_v56 = vrot.slane %v13000_v41, 1 }
  0x75   : > { %v13264_v62 = vsel %vm1016_vm3, %v1082_v50, %v1084_v56  ;;  %v13268_v22 = vsel %vm1016_vm3, %v1084_v56, %v1086_v58 }
  0x76   : > { %10789 = vmatmul.mubr.msk.f32.gmra.mrb[28].mxu0 %vm532_vm1, %v13240_v38  ;;  %16496 = vst [vmem:[#allocation23_spill] sm:$0xff] %v13264_v62  ;;  %16497 = vst [vmem:[#allocation24_spill] sm:$0xff] %v13268_v22  ;;  %v1090_v38 = vrot.slane %v13034_v52, 1 }
  0x77   : > { %10791 = vmatprep.mubr.msk.f32.mxu0 %vm532_vm1, %v13244_v0  ;;  %v1088_v0 = vrot.slane %v13020_v47, 1 }
  0x79   : > { %v13276_v48 = vsel %vm1016_vm3, %v1086_v58, %v1088_v0  ;;  %v13280_v50 = vsel %vm1016_vm3, %v1088_v0, %v1090_v38 }
  0x7a   : > { %10792 = vmatmul.mubr.msk.f32.gmra.mrb[30].mxu0 %vm532_vm1, %v13252_v57  ;;  %16498 = vst [vmem:[#allocation25_spill] sm:$0xff] %v13276_v48  ;;  %16499 = vst [vmem:[#allocation26_spill] sm:$0xff] %v13280_v50  ;;  %v1094_v57 = vrot.slane %v13057_v59, 1 }
  0x7b   : > { %10794 = vmatprep.mubr.msk.f32.mxu0 %vm532_vm1, %v13256_v23  ;;  %v1092_v23 = vrot.slane %v13037_v53, 1 }
  0x7d   : > { %v13288_v56 = vsel %vm1016_vm3, %v1090_v38, %v1092_v23  ;;  %v13292_v58 = vsel %vm1016_vm3, %v1092_v23, %v1094_v57 }
  0x7e   : > { %10795 = vmatmul.mubr.msk.f32.gmra.mrb[32].mxu0 %vm532_vm1, %v13264_v62  ;;  %16500 = vst [vmem:[#allocation27_spill] sm:$0xff] %v13288_v56  ;;  %16501 = vst [vmem:[#allocation28_spill] sm:$0xff] %v13292_v58  ;;  %v1098_v62 = vrot.slane %v13079_v1, 1 }
  0x7f   : > { %10797 = vmatprep.mubr.msk.f32.mxu0 %vm532_vm1, %v13268_v22  ;;  %v1096_v22 = vrot.slane %v13062_v60, 1 }
  0x81   : > { %v13300_v0 = vsel %vm1016_vm3, %v1094_v57, %v1096_v22  ;;  %v13304_v38 = vsel %vm1016_vm3, %v1096_v22, %v1098_v62 }
  0x82   : > { %10798 = vmatmul.mubr.msk.f32.gmra.mrb[34].mxu0 %vm532_vm1, %v13276_v48  ;;  %16502 = vst [vmem:[#allocation29_spill] sm:$0xff] %v13304_v38  ;;  %v1102_v48 = vrot.slane %v13101_v43, 1 }
  0x83   : > { %10800 = vmatprep.mubr.msk.f32.mxu0 %vm532_vm1, %v13280_v50  ;;  %v1100_v50 = vrot.slane %v13082_v2, 1 }
  0x85   : > { %v13312_v23 = vsel %vm1016_vm3, %v1098_v62, %v1100_v50  ;;  %v13316_v57 = vsel %vm1016_vm3, %v1100_v50, %v1102_v48  ;;  %v1548_v50 = vrot.slane %v12830_v4, 2 }
  0x86   : > { %10801 = vmatmul.mubr.msk.f32.gmra.mrb[36].mxu0 %vm532_vm1, %v13288_v56  ;;  %16503 = vst [vmem:[#allocation30_spill] sm:$0xff] %v13312_v23  ;;  %16504 = vst [vmem:[#allocation31_spill] sm:$0xff] %v13316_v57  ;;  %v13319_v56 = vrot.slane %v13123_v51, 1 }
  0x87   : > { %10803 = vmatprep.mubr.msk.f32.mxu0 %vm532_vm1, %v13292_v58  ;;  %v1104_v58 = vrot.slane %v13104_v44, 1 }
  0x89   : > { %v13326_v22 = vsel %vm1016_vm3, %v1102_v48, %v1104_v58  ;;  %v13330_v62 = vsel %vm1016_vm3, %v1104_v58, %v13319_v56  ;;  %v16507_v48 = vrot.slane %v12827_v3, 2 }
  0x8a   : > { %10804 = vmatmul.mubr.msk.f32.gmra.mrb[38].mxu0 %vm532_vm1, %v13300_v0  ;;  %16505 = vst [vmem:[#allocation32_spill] sm:$0xff] %v13326_v22  ;;  %16506 = vst [vmem:[#allocation33_spill] sm:$0xff] %v13330_v62 }
  0x8b   : > { %10806 = vmatprep.mubr.msk.f32.mxu0 %vm532_vm1, %v13304_v38  ;;  %v1549_v58 = vsel %vm1544_vm2, %v16507_v48, %v1548_v50  ;;  %v13351_v38 = vld [vmem:[%s16323_s3 + $0x10] sm:$0xf]  ;;  %v1558_v48 = vrot.slane %v12882_v13, 2 }
  0x8e   : > { %10807 = vmatmul.mubr.msk.f32.gmra.mrb[40].mxu0 %vm532_vm1, %v13312_v23  ;;  %v1550_v23 = vrot.slane %v12845_v6, 2 }
  0x8f   : > { %10809 = vmatprep.mubr.msk.f32.mxu0 %vm532_vm1, %v13316_v57  ;;  %v1552_v57 = vrot.slane %v12848_v7, 2 }
  0x91   : > { %v1553_v3 = vsel %vm1544_vm2, %v1550_v23, %v1552_v57 }
  0x92   : > { %10810 = vmatmul.mubr.msk.f32.gmra.mrb[42].mxu0 %vm532_vm1, %v13326_v22  ;;  %v1551_v22 = vsel %vm1544_vm2, %v1548_v50, %v1550_v23 }
  0x93   : > { %10812 = vmatprep.mubr.msk.f32.mxu0 %vm532_vm1, %v13330_v62  ;;  %v1554_v62 = vrot.slane %v12857_v8, 2 }
  0x95   : > { %v1555_v50 = vsel %vm1544_vm2, %v1552_v57, %v1554_v62 }
  0x96   : > { %10813 = vmatmul.mubr.msk.f32.gmra.mrb[44].mxu0 %vm532_vm1, %v13319_v56 }
  0x97   : > { %10817 = vmatprep.mubr.msk.f32.mxu0 %vm532_vm1, %v12955_v30  ;;  %v1556_v30 = vrot.slane %v12863_v10, 2 }
  0x99   : > { %v13370_v23 = vsel %vm1544_vm2, %v1556_v30, %v1558_v48 }
  0x9a   : > { %10818 = vmatmul.mubr.msk.f32.vlgmr.msra.gmra.mrb[0].mxu0 %vm532_vm1, %v1549_v58  ;;  %v13366_v58 = vsel %vm1544_vm2, %v1554_v62, %v1556_v30  ;;  %16509 = vst [vmem:[#allocation35_spill] sm:$0xff] %v13370_v23 }
  0x9b   : > { %10887 = vmatpush3.msk.msra.mxu0 %vm671_vm0, %v13042_v54  ;;  %10820 = vmatprep.mubr.msk.f32.mxu0 %vm532_vm1, %v1551_v22  ;;  %16508 = vst [vmem:[#allocation34_spill] sm:$0xff] %v13366_v58  ;;  %v1560_v54 = vrot.slane %v12885_v14, 2  ;;  %v1562_v22 = vrot.slane %v12902_v17, 2 }
  0x9c   : > { %10957 = vmatprep.subr.msk.mxu0 %vm671_vm0, %v13351_v38 }
  0x9d   : > { %v13378_v57 = vsel %vm1544_vm2, %v1558_v48, %v1560_v54  ;;  %v13382_v62 = vsel %vm1544_vm2, %v1560_v54, %v1562_v22 }
  0x9e   : > { %10821 = vmatmul.mubr.msk.f32.gmra.mrb[2].mxu0 %vm532_vm1, %v1553_v3  ;;  %16510 = vst [vmem:[#allocation36_spill] sm:$0xff] %v13378_v57  ;;  %v1564_v3 = vrot.slane %v12905_v18, 2  ;;  %16511 = vst [vmem:[#allocation37_spill] sm:$0xff] %v13382_v62 }
  0x9f   : > { %10823 = vmatprep.mubr.msk.f32.mxu0 %vm532_vm1, %v1555_v50  ;;  %v1566_v50 = vrot.slane %v12922_v21, 2 }
  0xa0   : > { %v13390_v30 = vsel %vm1544_vm2, %v1562_v22, %v1564_v3 }
  0xa1   : > { %16512 = vst [vmem:[#allocation38_spill] sm:$0xff] %v13390_v30  ;;  %v13394_v48 = vsel %vm1544_vm2, %v1564_v3, %v1566_v50 }
  0xa2   : > { %10824 = vmatmul.mubr.msk.f32.gmra.mrb[4].mxu0 %vm532_vm1, %v13366_v58  ;;  %16513 = vst [vmem:[#allocation39_spill] sm:$0xff] %v13394_v48  ;;  %v1570_v58 = vrot.slane %v12944_v27, 2 }
  0xa3   : > { %10826 = vmatprep.mubr.msk.f32.mxu0 %vm532_vm1, %v13370_v23  ;;  %v1568_v23 = vrot.slane %v12927_v24, 2 }
  0xa5   : > { %v13402_v54 = vsel %vm1544_vm2, %v1566_v50, %v1568_v23  ;;  %v13406_v22 = vsel %vm1544_vm2, %v1568_v23, %v1570_v58 }
  0xa6   : > { %10827 = vmatmul.mubr.msk.f32.gmra.mrb[6].mxu0 %vm532_vm1, %v13378_v57  ;;  %16514 = vst [vmem:[#allocation40_spill] sm:$0xff] %v13402_v54  ;;  %16515 = vst [vmem:[#allocation41_spill] sm:$0xff] %v13406_v22  ;;  %v1574_v57 = vrot.slane %v12969_v32, 2 }
  0xa7   : > { %10829 = vmatprep.mubr.msk.f32.mxu0 %vm532_vm1, %v13382_v62  ;;  %v1572_v62 = vrot.slane %v12947_v28, 2 }
  0xa9   : > { %v13414_v3 = vsel %vm1544_vm2, %v1570_v58, %v1572_v62  ;;  %v13418_v50 = vsel %vm1544_vm2, %v1572_v62, %v1574_v57 }
  0xaa   : > { %10830 = vmatmul.mubr.msk.f32.gmra.mrb[8].mxu0 %vm532_vm1, %v13390_v30  ;;  %16516 = vst [vmem:[#allocation42_spill] sm:$0xff] %v13414_v3  ;;  %16517 = vst [vmem:[#allocation43_spill] sm:$0xff] %v13418_v50  ;;  %v1578_v30 = vrot.slane %v12989_v36, 2 }
  0xab   : > { %10832 = vmatprep.mubr.msk.f32.mxu0 %vm532_vm1, %v13394_v48  ;;  %v1576_v48 = vrot.slane %v12972_v33, 2 }
  0xad   : > { %v13426_v23 = vsel %vm1544_vm2, %v1574_v57, %v1576_v48  ;;  %v13430_v58 = vsel %vm1544_vm2, %v1576_v48, %v1578_v30 }
  0xae   : > { %10833 = vmatmul.mubr.msk.f32.gmra.mrb[10].mxu0 %vm532_vm1, %v13402_v54  ;;  %16518 = vst [vmem:[#allocation44_spill] sm:$0xff] %v13426_v23  ;;  %16519 = vst [vmem:[#allocation45_spill] sm:$0xff] %v13430_v58  ;;  %v1582_v54 = vrot.slane %v13011_v42, 2 }
  0xaf   : > { %10835 = vmatprep.mubr.msk.f32.mxu0 %vm532_vm1, %v13406_v22  ;;  %v1580_v22 = vrot.slane %v12994_v39, 2 }
  0xb1   : > { %v13438_v62 = vsel %vm1544_vm2, %v1578_v30, %v1580_v22  ;;  %v13442_v57 = vsel %vm1544_vm2, %v1580_v22, %v1582_v54 }
  0xb2   : > { %10836 = vmatmul.mubr.msk.f32.gmra.mrb[12].mxu0 %vm532_vm1, %v13414_v3  ;;  %16520 = vst [vmem:[#allocation46_spill] sm:$0xff] %v13438_v62  ;;  %16521 = vst [vmem:[#allocation47_spill] sm:$0xff] %v13442_v57  ;;  %v1586_v3 = vrot.slane %v12866_v11, 2 }
  0xb3   : > { %10838 = vmatprep.mubr.msk.f32.mxu0 %vm532_vm1, %v13418_v50  ;;  %v1584_v50 = vrot.slane %v12860_v9, 2 }
  0xb5   : > { %v13450_v48 = vsel %vm1544_vm2, %v1582_v54, %v1584_v50  ;;  %v13454_v30 = vsel %vm1544_vm2, %v1584_v50, %v1586_v3 }
  0xb6   : > { %10839 = vmatmul.mubr.msk.f32.gmra.mrb[14].mxu0 %vm532_vm1, %v13426_v23  ;;  %16522 = vst [vmem:[#allocation48_spill] sm:$0xff] %v13450_v48  ;;  %16523 = vst [vmem:[#allocation49_spill] sm:$0xff] %v13454_v30  ;;  %v1590_v23 = vrot.slane %v12888_v15, 2 }
  0xb7   : > { %10841 = vmatprep.mubr.msk.f32.mxu0 %vm532_vm1, %v13430_v58  ;;  %v1588_v58 = vrot.slane %v12871_v12, 2 }
  0xb9   : > { %v13462_v22 = vsel %vm1544_vm2, %v1586_v3, %v1588_v58  ;;  %v13466_v54 = vsel %vm1544_vm2, %v1588_v58, %v1590_v23 }
  0xba   : > { %10842 = vmatmul.mubr.msk.f32.gmra.mrb[16].mxu0 %vm532_vm1, %v13438_v62  ;;  %16524 = vst [vmem:[#allocation50_spill] sm:$0xff] %v13462_v22  ;;  %16525 = vst [vmem:[#allocation51_spill] sm:$0xff] %v13466_v54  ;;  %v1594_v62 = vrot.slane %v12908_v19, 2 }
  0xbb   : > { %10844 = vmatprep.mubr.msk.f32.mxu0 %vm532_vm1, %v13442_v57  ;;  %v1592_v57 = vrot.slane %v12891_v16, 2 }
  0xbd   : > { %v13474_v50 = vsel %vm1544_vm2, %v1590_v23, %v1592_v57  ;;  %v13478_v3 = vsel %vm1544_vm2, %v1592_v57, %v1594_v62 }
  0xbe   : > { %10845 = vmatmul.mubr.msk.f32.gmra.mrb[18].mxu0 %vm532_vm1, %v13450_v48  ;;  %16526 = vst [vmem:[#allocation52_spill] sm:$0xff] %v13474_v50  ;;  %16527 = vst [vmem:[#allocation53_spill] sm:$0xff] %v13478_v3  ;;  %v1598_v48 = vrot.slane %v12930_v25, 2 }
  0xbf   : > { %10847 = vmatprep.mubr.msk.f32.mxu0 %vm532_vm1, %v13454_v30  ;;  %v1596_v30 = vrot.slane %v12911_v20, 2 }
  0xc1   : > { %v13486_v58 = vsel %vm1544_vm2, %v1594_v62, %v1596_v30  ;;  %v13490_v23 = vsel %vm1544_vm2, %v1596_v30, %v1598_v48 }
  0xc2   : > { %10848 = vmatmul.mubr.msk.f32.gmra.mrb[20].mxu0 %vm532_vm1, %v13462_v22  ;;  %16528 = vst [vmem:[#allocation54_spill] sm:$0xff] %v13486_v58  ;;  %16529 = vst [vmem:[#allocation55_spill] sm:$0xff] %v13490_v23  ;;  %v1602_v22 = vrot.slane %v12950_v29, 2 }
  0xc3   : > { %10850 = vmatprep.mubr.msk.f32.mxu0 %vm532_vm1, %v13466_v54  ;;  %v1600_v54 = vrot.slane %v12933_v26, 2 }
  0xc5   : > { %v13498_v57 = vsel %vm1544_vm2, %v1598_v48, %v1600_v54  ;;  %v13502_v62 = vsel %vm1544_vm2, %v1600_v54, %v1602_v22 }
  0xc6   : > { %10851 = vmatmul.mubr.msk.f32.gmra.mrb[22].mxu0 %vm532_vm1, %v13474_v50  ;;  %16530 = vst [vmem:[#allocation56_spill] sm:$0xff] %v13498_v57  ;;  %16531 = vst [vmem:[#allocation57_spill] sm:$0xff] %v13502_v62  ;;  %v1606_v50 = vrot.slane %v12975_v34, 2 }
  0xc7   : > { %10853 = vmatprep.mubr.msk.f32.mxu0 %vm532_vm1, %v13478_v3  ;;  %v1604_v3 = vrot.slane %v12958_v31, 2 }
  0xc9   : > { %v13510_v30 = vsel %vm1544_vm2, %v1602_v22, %v1604_v3  ;;  %v13514_v48 = vsel %vm1544_vm2, %v1604_v3, %v1606_v50 }
  0xca   : > { %10854 = vmatmul.mubr.msk.f32.gmra.mrb[24].mxu0 %vm532_vm1, %v13486_v58  ;;  %16532 = vst [vmem:[#allocation58_spill] sm:$0xff] %v13510_v30  ;;  %16533 = vst [vmem:[#allocation59_spill] sm:$0xff] %v13514_v48  ;;  %v1610_v58 = vrot.slane %v12997_v40, 2 }
  0xcb   : > { %10856 = vmatprep.mubr.msk.f32.mxu0 %vm532_vm1, %v13490_v23  ;;  %v1608_v23 = vrot.slane %v12978_v35, 2 }
  0xcd   : > { %v13522_v54 = vsel %vm1544_vm2, %v1606_v50, %v1608_v23  ;;  %v13526_v22 = vsel %vm1544_vm2, %v1608_v23, %v1610_v58 }
  0xce   : > { %10857 = vmatmul.mubr.msk.f32.gmra.mrb[26].mxu0 %vm532_vm1, %v13498_v57  ;;  %16534 = vst [vmem:[#allocation60_spill] sm:$0xff] %v13522_v54  ;;  %16535 = vst [vmem:[#allocation61_spill] sm:$0xff] %v13526_v22  ;;  %v1614_v57 = vrot.slane %v13017_v46, 2 }
  0xcf   : > { %10859 = vmatprep.mubr.msk.f32.mxu0 %vm532_vm1, %v13502_v62  ;;  %v1612_v62 = vrot.slane %v13000_v41, 2 }
  0xd1   : > { %v13534_v3 = vsel %vm1544_vm2, %v1610_v58, %v1612_v62  ;;  %v13538_v50 = vsel %vm1544_vm2, %v1612_v62, %v1614_v57 }
  0xd2   : > { %10860 = vmatmul.mubr.msk.f32.gmra.mrb[28].mxu0 %vm532_vm1, %v13510_v30  ;;  %16536 = vst [vmem:[#allocation62_spill] sm:$0xff] %v13534_v3  ;;  %16537 = vst [vmem:[#allocation63_spill] sm:$0xff] %v13538_v50  ;;  %v1618_v30 = vrot.slane %v13034_v52, 2 }
  0xd3   : > { %10862 = vmatprep.mubr.msk.f32.mxu0 %vm532_vm1, %v13514_v48  ;;  %v1616_v48 = vrot.slane %v13020_v47, 2 }
  0xd5   : > { %v13546_v23 = vsel %vm1544_vm2, %v1614_v57, %v1616_v48  ;;  %v13550_v58 = vsel %vm1544_vm2, %v1616_v48, %v1618_v30 }
  0xd6   : > { %10863 = vmatmul.mubr.msk.f32.gmra.mrb[30].mxu0 %vm532_vm1, %v13522_v54  ;;  %16538 = vst [vmem:[#allocation64_spill] sm:$0xff] %v13546_v23  ;;  %16539 = vst [vmem:[#allocation65_spill] sm:$0xff] %v13550_v58  ;;  %v1622_v54 = vrot.slane %v13057_v59, 2 }
  0xd7   : > { %10865 = vmatprep.mubr.msk.f32.mxu0 %vm532_vm1, %v13526_v22  ;;  %v1620_v22 = vrot.slane %v13037_v53, 2 }
  0xd9   : > { %v13558_v62 = vsel %vm1544_vm2, %v1618_v30, %v1620_v22  ;;  %v13562_v57 = vsel %vm1544_vm2, %v1620_v22, %v1622_v54 }
  0xda   : > { %10866 = vmatmul.mubr.msk.f32.gmra.mrb[32].mxu0 %vm532_vm1, %v13534_v3  ;;  %16540 = vst [vmem:[#allocation66_spill] sm:$0xff] %v13558_v62  ;;  %16541 = vst [vmem:[#allocation67_spill] sm:$0xff] %v13562_v57  ;;  %v1626_v3 = vrot.slane %v13079_v1, 2 }
  0xdb   : > { %10868 = vmatprep.mubr.msk.f32.mxu0 %vm532_vm1, %v13538_v50  ;;  %v1624_v50 = vrot.slane %v13062_v60, 2 }
  0xdd   : > { %v13570_v48 = vsel %vm1544_vm2, %v1622_v54, %v1624_v50  ;;  %v13574_v30 = vsel %vm1544_vm2, %v1624_v50, %v1626_v3 }
  0xde   : > { %10869 = vmatmul.mubr.msk.f32.gmra.mrb[34].mxu0 %vm532_vm1, %v13546_v23  ;;  %16542 = vst [vmem:[#allocation68_spill] sm:$0xff] %v13570_v48  ;;  %16543 = vst [vmem:[#allocation69_spill] sm:$0xff] %v13574_v30  ;;  %v1630_v23 = vrot.slane %v13101_v43, 2 }
  0xdf   : > { %10871 = vmatprep.mubr.msk.f32.mxu0 %vm532_vm1, %v13550_v58  ;;  %v1628_v58 = vrot.slane %v13082_v2, 2 }
  0xe1   : > { %v13582_v22 = vsel %vm1544_vm2, %v1626_v3, %v1628_v58  ;;  %v13586_v54 = vsel %vm1544_vm2, %v1628_v58, %v1630_v23  ;;  %v2075_v58 = vrot.slane %v12845_v6, 4 }
  0xe2   : > { %10872 = vmatmul.mubr.msk.f32.gmra.mrb[36].mxu0 %vm532_vm1, %v13558_v62  ;;  %16544 = vst [vmem:[#allocation70_spill] sm:$0xff] %v13582_v22  ;;  %16545 = vst [vmem:[#allocation71_spill] sm:$0xff] %v13586_v54  ;;  %v13589_v62 = vrot.slane %v13123_v51, 2 }
  0xe3   : > { %10874 = vmatprep.mubr.msk.f32.mxu0 %vm532_vm1, %v13562_v57  ;;  %v1632_v57 = vrot.slane %v13104_v44, 2 }
  0xe4   : > { %16546 = vst [vmem:[#allocation72_spill] sm:$0xff] %v13589_v62 }
  0xe5   : > { %v13596_v50 = vsel %vm1544_vm2, %v1630_v23, %v1632_v57  ;;  %v13600_v3 = vsel %vm1544_vm2, %v1632_v57, %v13589_v62  ;;  %v2079_v23 = vrot.slane %v12857_v8, 4  ;;  %v2081_v57 = vrot.slane %v12863_v10, 4 }
  0xe6   : > { %10875 = vmatmul.mubr.msk.f32.gmra.mrb[38].mxu0 %vm532_vm1, %v13570_v48  ;;  %16547 = vst [vmem:[#allocation73_spill] sm:$0xff] %v13596_v50  ;;  %16548 = vst [vmem:[#allocation74_spill] sm:$0xff] %v13600_v3  ;;  %v2083_v48 = vrot.slane %v12882_v13, 4  ;;  %v2085_v10 = vrot.slane %v12885_v14, 4 }
  0xe7   : > { %10877 = vmatprep.mubr.msk.f32.mxu0 %vm532_vm1, %v13574_v30  ;;  %v2074_v30 = vrot.slane %v12830_v4, 4 }
  0xea   : > { %10878 = vmatmul.mubr.msk.f32.gmra.mrb[40].mxu0 %vm532_vm1, %v13582_v22  ;;  %v2077_v22 = vrot.slane %v12848_v7, 4  ;;  %v13621_v7 = vld [vmem:[%s16323_s3 + $0x14] sm:$0xf] }
  0xeb   : > { %10880 = vmatprep.mubr.msk.f32.mxu0 %vm532_vm1, %v13586_v54  ;;  %v2076_v54 = vsel %vm671_vm0, %v2074_v30, %v2075_v58  ;;  %v2082_v30 = vsel %vm671_vm0, %v2079_v23, %v2081_v57 }
  0xec   : > { %v2078_v4 = vsel %vm671_vm0, %v2075_v58, %v2077_v22  ;;  %v2086_v58 = vsel %vm671_vm0, %v2083_v48, %v2085_v10 }
  0xee   : > { %10881 = vmatmul.mubr.msk.f32.gmra.mrb[42].mxu0 %vm532_vm1, %v13596_v50  ;;  %v2080_v50 = vsel %vm671_vm0, %v2077_v22, %v2079_v23  ;;  %v2084_v22 = vsel %vm671_vm0, %v2081_v57, %v2083_v48  ;;  %v2091_v23 = vrot.slane %v12922_v21, 4  ;;  %v2093_v57 = vrot.slane %v12927_v24, 4 }
  0xef   : > { %10883 = vmatprep.mubr.msk.f32.mxu0 %vm532_vm1, %v13600_v3 }
  0xf0   : > { %v2094_v48 = vsel %vm671_vm0, %v2091_v23, %v2093_v57 }
  0xf2   : > { %10884 = vmatmul.mubr.msk.f32.gmra.mrb[44].mxu0 %vm532_vm1, %v13589_v62  ;;  %v14165_v62 = vld [vmem:[%s12821_s12 + $0x168] sm:$0xff] }
  0xf3   : > { %10888 = vmatprep.mubr.msk.f32.mxu0 %vm532_vm1, %v2076_v54  ;;  %v2087_v54 = vrot.slane %v12902_v17, 4 }
  0xf6   : > { %10889 = vmatmul.mubr.msk.f32.vlgmr.msra.gmra.mrb[0].mxu0 %vm532_vm1, %v2078_v4 }
  0xf7   : > { %10958 = vmatpush3.msk.msra.mxu0 %vm671_vm0, %v13351_v38  ;;  %10891 = vmatprep.mubr.msk.f32.mxu0 %vm532_vm1, %v2080_v50  ;;  %v2089_v38 = vrot.slane %v12905_v18, 4  ;;  %v2088_v50 = vsel %vm671_vm0, %v2085_v10, %v2087_v54  ;;  %v2097_v10 = vrot.slane %v12947_v28, 4 }
  0xf8   : > { %11028 = vmatprep.subr.msk.mxu0 %vm671_vm0, %v13621_v7 }
  0xf9   : > { %v2090_v4 = vsel %vm671_vm0, %v2087_v54, %v2089_v38 }
  0xfa   : > { %10892 = vmatmul.mubr.msk.f32.gmra.mrb[2].mxu0 %vm532_vm1, %v2082_v30  ;;  %v2092_v30 = vsel %vm671_vm0, %v2089_v38, %v2091_v23  ;;  %v2101_v38 = vrot.slane %v12972_v33, 4 }
  0xfb   : > { %10894 = vmatprep.mubr.msk.f32.mxu0 %vm532_vm1, %v2084_v22  ;;  %v2095_v22 = vrot.slane %v12944_v27, 4 }
  0xfd   : > { %v2098_v54 = vsel %vm671_vm0, %v2095_v22, %v2097_v10 }
  0xfe   : > { %10895 = vmatmul.mubr.msk.f32.gmra.mrb[4].mxu0 %vm532_vm1, %v2086_v58  ;;  %v2096_v58 = vsel %vm671_vm0, %v2093_v57, %v2095_v22  ;;  %v2105_v57 = vrot.slane %v12994_v39, 4 }
  0xff   : > { %10897 = vmatprep.mubr.msk.f32.mxu0 %vm532_vm1, %v2088_v50  ;;  %v2099_v50 = vrot.slane %v12969_v32, 4 }
 0x101   : > { %v2102_v23 = vsel %vm671_vm0, %v2099_v50, %v2101_v38 }
 0x102   : > { %10898 = vmatmul.mubr.msk.f32.gmra.mrb[6].mxu0 %vm532_vm1, %v2090_v4  ;;  %v2100_v4 = vsel %vm671_vm0, %v2097_v10, %v2099_v50  ;;  %v2109_v10 = vrot.slane %v12860_v9, 4 }
 0x103   : > { %10900 = vmatprep.mubr.msk.f32.mxu0 %vm532_vm1, %v2092_v30  ;;  %v2103_v30 = vrot.slane %v12989_v36, 4 }
 0x105   : > { %v2106_v22 = vsel %vm671_vm0, %v2103_v30, %v2105_v57 }
 0x106   : > { %10901 = vmatmul.mubr.msk.f32.gmra.mrb[8].mxu0 %vm532_vm1, %v2094_v48  ;;  %v2104_v48 = vsel %vm671_vm0, %v2101_v38, %v2103_v30  ;;  %v2113_v38 = vrot.slane %v12871_v12, 4 }
 0x107   : > { %10903 = vmatprep.mubr.msk.f32.mxu0 %vm532_vm1, %v2096_v58  ;;  %v2107_v58 = vrot.slane %v13011_v42, 4 }
 0x109   : > { %v2110_v50 = vsel %vm671_vm0, %v2107_v58, %v2109_v10 }
 0x10a   : > { %10904 = vmatmul.mubr.msk.f32.gmra.mrb[10].mxu0 %vm532_vm1, %v2098_v54  ;;  %v2108_v54 = vsel %vm671_vm0, %v2105_v57, %v2107_v58  ;;  %v2119_v57 = vrot.slane %v12908_v19, 4  ;;  %v2125_v19 = vrot.slane %v12933_v26, 4 }
 0x10b   : > { %10906 = vmatprep.mubr.msk.f32.mxu0 %vm532_vm1, %v2100_v4  ;;  %v2111_v4 = vrot.slane %v12866_v11, 4  ;;  %v2117_v11 = vrot.slane %v12891_v16, 4 }
 0x10d   : > { %v2114_v9 = vsel %vm671_vm0, %v2111_v4, %v2113_v38  ;;  %v2120_v58 = vsel %vm671_vm0, %v2117_v11, %v2119_v57 }
 0x10e   : > { %10907 = vmatmul.mubr.msk.f32.gmra.mrb[12].mxu0 %vm532_vm1, %v2102_v23  ;;  %v2112_v23 = vsel %vm671_vm0, %v2109_v10, %v2111_v4 }
 0x10f   : > { %10909 = vmatprep.mubr.msk.f32.mxu0 %vm532_vm1, %v2104_v48  ;;  %v2115_v48 = vrot.slane %v12888_v15, 4  ;;  %v2121_v15 = vrot.slane %v12911_v20, 4 }
 0x111   : > { %v2116_v30 = vsel %vm671_vm0, %v2113_v38, %v2115_v48  ;;  %v2118_v12 = vsel %vm671_vm0, %v2115_v48, %v2117_v11  ;;  %v2122_v16 = vsel %vm671_vm0, %v2119_v57, %v2121_v15 }
 0x112   : > { %10910 = vmatmul.mubr.msk.f32.gmra.mrb[14].mxu0 %vm532_vm1, %v2106_v22  ;;  %v2123_v22 = vrot.slane %v12930_v25, 4  ;;  %v2129_v25 = vrot.slane %v12958_v31, 4 }
 0x113   : > { %10912 = vmatprep.mubr.msk.f32.mxu0 %vm532_vm1, %v2108_v54  ;;  %v2127_v54 = vrot.slane %v12950_v29, 4  ;;  %v2133_v29 = vrot.slane %v12978_v35, 4 }
 0x114   : > { %v2124_v10 = vsel %vm671_vm0, %v2121_v15, %v2123_v22  ;;  %v2126_v20 = vsel %vm671_vm0, %v2123_v22, %v2125_v19 }
 0x115   : > { %v2128_v4 = vsel %vm671_vm0, %v2125_v19, %v2127_v54  ;;  %v2130_v26 = vsel %vm671_vm0, %v2127_v54, %v2129_v25  ;;  %v13742_v54 = vld [vmem:[%s12821_s12 + $0x170] sm:$0xff] }
 0x116   : > { %10913 = vmatmul.mubr.msk.f32.gmra.mrb[16].mxu0 %vm532_vm1, %v2110_v50  ;;  %v2131_v50 = vrot.slane %v12975_v34, 4  ;;  %v2137_v34 = vrot.slane %v13000_v41, 4 }
 0x117   : > { %10915 = vmatprep.mubr.msk.f32.mxu0 %vm532_vm1, %v2112_v23  ;;  %v2135_v23 = vrot.slane %v12997_v40, 4  ;;  %v2141_v40 = vrot.slane %v13020_v47, 4 }
 0x118   : > { %v2132_v38 = vsel %vm671_vm0, %v2129_v25, %v2131_v50  ;;  %v2134_v31 = vsel %vm671_vm0, %v2131_v50, %v2133_v29 }
 0x119   : > { %v2136_v48 = vsel %vm671_vm0, %v2133_v29, %v2135_v23  ;;  %v2138_v35 = vsel %vm671_vm0, %v2135_v23, %v2137_v34  ;;  %v13765_v23 = vld [vmem:[%s12821_s12 + $0x20] sm:$0xff] }
 0x11a   : > { %10916 = vmatmul.mubr.msk.f32.gmra.mrb[18].mxu0 %vm532_vm1, %v2114_v9  ;;  %v2139_v9 = vrot.slane %v13017_v46, 4  ;;  %v2145_v46 = vrot.slane %v13037_v53, 4 }
 0x11b   : > { %10918 = vmatprep.mubr.msk.f32.mxu0 %vm532_vm1, %v2116_v30  ;;  %v2143_v30 = vrot.slane %v13034_v52, 4  ;;  %v2149_v52 = vrot.slane %v13062_v60, 4 }
 0x11c   : > { %v2140_v11 = vsel %vm671_vm0, %v2137_v34, %v2139_v9  ;;  %v2142_v41 = vsel %vm671_vm0, %v2139_v9, %v2141_v40 }
 0x11d   : > { %v2144_v57 = vsel %vm671_vm0, %v2141_v40, %v2143_v30  ;;  %v2146_v47 = vsel %vm671_vm0, %v2143_v30, %v2145_v46  ;;  %v13782_v30 = vld [vmem:[%s16323_s3 + $0x18] sm:$0xf] }
 0x11e   : > { %10919 = vmatmul.mubr.msk.f32.gmra.mrb[20].mxu0 %vm532_vm1, %v2118_v12  ;;  %v2147_v12 = vrot.slane %v13057_v59, 4  ;;  %v2153_v59 = vrot.slane %v13082_v2, 4  ;;  %v13745_v2 = vld [vmem:[%s12821_s12 + $0x178] sm:$0xff] }
 0x11f   : > { %10921 = vmatprep.mubr.msk.f32.mxu0 %vm532_vm1, %v2120_v58  ;;  %v2151_v58 = vrot.slane %v13079_v1, 4  ;;  %v2157_v1 = vrot.slane %v13104_v44, 4  ;;  %v2163_v44 = vrot.slane %v13745_v2, 4 }
 0x120   : > { %v2148_v15 = vsel %vm671_vm0, %v2145_v46, %v2147_v12  ;;  %v2150_v53 = vsel %vm671_vm0, %v2147_v12, %v2149_v52 }
 0x121   : > { %v2152_v22 = vsel %vm671_vm0, %v2149_v52, %v2151_v58  ;;  %v2154_v60 = vsel %vm671_vm0, %v2151_v58, %v2153_v59 }
 0x122   : > { %10922 = vmatmul.mubr.msk.f32.gmra.mrb[22].mxu0 %vm532_vm1, %v2122_v16  ;;  %v2155_v16 = vrot.slane %v13101_v43, 4 }
 0x123   : > { %10924 = vmatprep.mubr.msk.f32.mxu0 %vm532_vm1, %v2124_v10  ;;  %v2159_v10 = vrot.slane %v13123_v51, 4 }
 0x124   : > { %v2156_v19 = vsel %vm671_vm0, %v2153_v59, %v2155_v16  ;;  %v2158_v43 = vsel %vm671_vm0, %v2155_v16, %v2157_v1 }
 0x125   : > { %v2160_v25 = vsel %vm671_vm0, %v2157_v1, %v2159_v10 }
 0x126   : > { %10925 = vmatmul.mubr.msk.f32.gmra.mrb[24].mxu0 %vm532_vm1, %v2126_v20  ;;  %v2161_v20 = vrot.slane %v13742_v54, 4 }
 0x127   : > { %10927 = vmatprep.mubr.msk.f32.mxu0 %vm532_vm1, %v2128_v4 }
 0x128   : > { %v2162_v4 = vsel %vm671_vm0, %v2159_v10, %v2161_v20  ;;  %v2164_v50 = vsel %vm671_vm0, %v2161_v20, %v2163_v44  ;;  %v13833_v10 = vld [vmem:[%s12821_s12 + $0xa8] sm:$0xff] }
 0x12a   : > { %10928 = vmatmul.mubr.msk.f32.gmra.mrb[26].mxu0 %vm532_vm1, %v2130_v26  ;;  %v13758_v26 = vld [vmem:[%s12821_s12 + $0x10] sm:$0xff] }
 0x12b   : > { %10930 = vmatprep.mubr.msk.f32.mxu0 %vm532_vm1, %v2132_v38  ;;  %v2602_v29 = vrot.slane %v13758_v26, 5  ;;  %v2603_v38 = vrot.slane %v12845_v6, 5  ;;  %v13774_v6 = vld [vmem:[%s12821_s12 + $0x30] sm:$0xff] }
 0x12d   : > { %v2604_v34 = vsel %vm2601_vm4, %v2602_v29, %v2603_v38  ;;  %v13852_v29 = vld [vmem:[%s12821_s12 + $0xc0] sm:$0xff] }
 0x12e   : > { %10931 = vmatmul.mubr.msk.f32.gmra.mrb[28].mxu0 %vm532_vm1, %v2134_v31  ;;  %v2605_v31 = vrot.slane %v13765_v23, 5 }
 0x12f   : > { %10933 = vmatprep.mubr.msk.f32.mxu0 %vm532_vm1, %v2136_v48  ;;  %v2607_v48 = vrot.slane %v12857_v8, 5 }
 0x130   : > { %v2606_v9 = vsel %vm2601_vm4, %v2603_v38, %v2605_v31  ;;  %v2645_v38 = vrot.slane %v13852_v29, 5 }
 0x131   : > { %v2608_v40 = vsel %vm2601_vm4, %v2605_v31, %v2607_v48 }
 0x132   : > { %10934 = vmatmul.mubr.msk.f32.gmra.mrb[30].mxu0 %vm532_vm1, %v2138_v35  ;;  %v2609_v35 = vrot.slane %v13774_v6, 5 }
 0x133   : > { %10936 = vmatprep.mubr.msk.f32.mxu0 %vm532_vm1, %v2140_v11  ;;  %v2611_v11 = vrot.slane %v12882_v13, 5  ;;  %v2615_v13 = vrot.slane %v12902_v17, 5  ;;  %v2621_v17 = vrot.slane %v12927_v24, 5 }
 0x134   : > { %v2610_v8 = vsel %vm2601_vm4, %v2607_v48, %v2609_v35 }
 0x135   : > { %v2612_v46 = vsel %vm2601_vm4, %v2609_v35, %v2611_v11  ;;  %v13864_v35 = vld [vmem:[%s12821_s12 + $0xd0] sm:$0xff] }
 0x136   : > { %10937 = vmatmul.mubr.msk.f32.gmra.mrb[32].mxu0 %vm532_vm1, %v2142_v41  ;;  %v2613_v41 = vrot.slane %v12885_v14, 5 }
 0x137   : > { %10939 = vmatprep.mubr.msk.f32.mxu0 %vm532_vm1, %v2144_v57 }
 0x138   : > { %v2614_v57 = vsel %vm2601_vm4, %v2611_v11, %v2613_v41  ;;  %v2616_v12 = vsel %vm2601_vm4, %v2613_v41, %v2615_v13 }
 0x13a   : > { %10940 = vmatmul.mubr.msk.f32.gmra.mrb[34].mxu0 %vm532_vm1, %v2146_v47  ;;  %v2619_v47 = vrot.slane %v12922_v21, 5  ;;  %v2625_v21 = vrot.slane %v12947_v28, 5 }
 0x13b   : > { %10942 = vmatprep.mubr.msk.f32.mxu0 %vm532_vm1, %v2148_v15  ;;  %v2623_v15 = vrot.slane %v12944_v27, 5  ;;  %v2629_v27 = vrot.slane %v12972_v33, 5 }
 0x13d   : > { %v2624_v58 = vsel %vm2601_vm4, %v2621_v17, %v2623_v15  ;;  %v2626_v24 = vsel %vm2601_vm4, %v2623_v15, %v2625_v21 }
 0x13e   : > { %10943 = vmatmul.mubr.msk.f32.gmra.mrb[36].mxu0 %vm532_vm1, %v2150_v53  ;;  %v2627_v53 = vrot.slane %v12969_v32, 5  ;;  %v2633_v32 = vrot.slane %v12994_v39, 5  ;;  %v2639_v39 = vrot.slane %v13833_v10, 5 }
 0x13f   : > { %10945 = vmatprep.mubr.msk.f32.mxu0 %vm532_vm1, %v2152_v22  ;;  %v2631_v22 = vrot.slane %v12989_v36, 5  ;;  %v13828_v36 = vld [vmem:[%s12821_s12 + $0xa0] sm:$0xff] }
 0x140   : > { %v2628_v59 = vsel %vm2601_vm4, %v2625_v21, %v2627_v53  ;;  %v2630_v28 = vsel %vm2601_vm4, %v2627_v53, %v2629_v27  ;;  %v2637_v1 = vrot.slane %v13828_v36, 5  ;;  %v13900_v53 = vld [vmem:[%s12821_s12 + $0x100] sm:$0xff] }
 0x141   : > { %v2632_v16 = vsel %vm2601_vm4, %v2629_v27, %v2631_v22  ;;  %v2634_v33 = vsel %vm2601_vm4, %v2631_v22, %v2633_v32 }
 0x142   : > { %10946 = vmatmul.mubr.msk.f32.gmra.mrb[38].mxu0 %vm532_vm1, %v2154_v60  ;;  %v2635_v60 = vrot.slane %v13011_v42, 5 }
 0x143   : > { %10948 = vmatprep.mubr.msk.f32.mxu0 %vm532_vm1, %v2156_v19 }
 0x144   : > { %v2636_v19 = vsel %vm2601_vm4, %v2633_v32, %v2635_v60  ;;  %v2638_v42 = vsel %vm2601_vm4, %v2635_v60, %v2637_v1  ;;  %v13912_v32 = vld [vmem:[%s12821_s12 + $0x110] sm:$0xff] }
 0x146   : > { %10949 = vmatmul.mubr.msk.f32.gmra.mrb[40].mxu0 %vm532_vm1, %v2158_v43  ;;  %v13840_v43 = vld [vmem:[%s12821_s12 + $0xb0] sm:$0xff] }
 0x147   : > { %10951 = vmatprep.mubr.msk.f32.mxu0 %vm532_vm1, %v2160_v25  ;;  %v2641_v20 = vrot.slane %v13840_v43, 5  ;;  %v2640_v25 = vsel %vm2601_vm4, %v2637_v1, %v2639_v39  ;;  %v3169_v3 = vrot.slane %v13840_v43, 6 }
 0x14a   : > { %10952 = vmatmul.mubr.msk.f32.gmra.mrb[42].mxu0 %vm532_vm1, %v2162_v4 }
 0x14b   : > { %10954 = vmatprep.mubr.msk.f32.mxu0 %vm532_vm1, %v2164_v50  ;;  %v2642_v50 = vsel %vm2601_vm4, %v2639_v39, %v2641_v20  ;;  %v13924_v39 = vld [vmem:[%s12821_s12 + $0x120] sm:$0xff] }
 0x14e   : > { %10955 = vmatmul.mubr.msk.f32.gmra.mrb[44].mxu0 %vm532_vm1, %v2163_v44  ;;  %v13845_v44 = vld [vmem:[%s12821_s12 + $0xb8] sm:$0xff] }
 0x14f   : > { %10959 = vmatprep.mubr.msk.f32.mxu0 %vm532_vm1, %v2604_v34  ;;  %v2643_v4 = vrot.slane %v13845_v44, 5  ;;  %v13857_v34 = vld [vmem:[%s12821_s12 + $0xc8] sm:$0xff] }
 0x150   : > { %v2647_v48 = vrot.slane %v13857_v34, 5 }
 0x151   : > { %v2644_v31 = vsel %vm2601_vm4, %v2641_v20, %v2643_v4 }
 0x152   : > { %10960 = vmatmul.mubr.msk.f32.vlgmr.msra.gmra.mrb[0].mxu0 %vm532_vm1, %v2606_v9  ;;  %v2646_v9 = vsel %vm2601_vm4, %v2643_v4, %v2645_v38  ;;  %v2648_v11 = vsel %vm2601_vm4, %v2645_v38, %v2647_v48  ;;  %v13936_v38 = vld [vmem:[%s12821_s12 + $0x130] sm:$0xff] }
 0x153   : > { %11029 = vmatpush3.msk.msra.mxu0 %vm671_vm0, %v13621_v7  ;;  %10962 = vmatprep.mubr.msk.f32.mxu0 %vm532_vm1, %v2608_v40  ;;  %v2617_v7 = vrot.slane %v12905_v18, 5  ;;  %v2622_v18 = vsel %vm2601_vm4, %v2619_v47, %v2621_v17  ;;  %v2649_v40 = vrot.slane %v13864_v35, 5  ;;  %v13888_v17 = vld [vmem:[%s12821_s12 + $0xf0] sm:$0xff] }
 0x154   : > { %11099 = vmatprep.subr.msk.mxu0 %vm671_vm0, %v13782_v30 }
 0x155   : > { %v2618_v14 = vsel %vm2601_vm4, %v2615_v13, %v2617_v7  ;;  %v2620_v52 = vsel %vm2601_vm4, %v2617_v7, %v2619_v47  ;;  %v13876_v13 = vld [vmem:[%s12821_s12 + $0xe0] sm:$0xff] }
 0x156   : > { %10963 = vmatmul.mubr.msk.f32.gmra.mrb[2].mxu0 %vm532_vm1, %v2610_v8  ;;  %v13869_v8 = vld [vmem:[%s12821_s12 + $0xd8] sm:$0xff] }
 0x157   : > { %10965 = vmatprep.mubr.msk.f32.mxu0 %vm532_vm1, %v2612_v46  ;;  %v2651_v41 = vrot.slane %v13869_v8, 5  ;;  %v2650_v46 = vsel %vm2601_vm4, %v2647_v48, %v2649_v40 }
 0x159   : > { %v2652_v7 = vsel %vm2601_vm4, %v2649_v40, %v2651_v41 }
 0x15a   : > { %10966 = vmatmul.mubr.msk.f32.gmra.mrb[4].mxu0 %vm532_vm1, %v2614_v57  ;;  %v2653_v57 = vrot.slane %v13876_v13, 5 }
 0x15b   : > { %10968 = vmatprep.mubr.msk.f32.mxu0 %vm532_vm1, %v2616_v12  ;;  %v13881_v12 = vld [vmem:[%s12821_s12 + $0xe8] sm:$0xff] }
 0x15c   : > { %v2655_v47 = vrot.slane %v13881_v12, 5 }
 0x15e   : > { %10969 = vmatmul.mubr.msk.f32.gmra.mrb[6].mxu0 %vm532_vm1, %v2618_v14  ;;  %v2654_v14 = vsel %vm2601_vm4, %v2651_v41, %v2653_v57  ;;  %v2656_v15 = vsel %vm2601_vm4, %v2653_v57, %v2655_v47  ;;  %v13948_v41 = vld [vmem:[%s12821_s12 + $0x140] sm:$0xff] }
 0x15f   : > { %10971 = vmatprep.mubr.msk.f32.mxu0 %vm532_vm1, %v2620_v52  ;;  %v2657_v52 = vrot.slane %v13888_v17, 5 }
 0x162   : > { %10972 = vmatmul.mubr.msk.f32.gmra.mrb[8].mxu0 %vm532_vm1, %v2622_v18  ;;  %v13893_v18 = vld [vmem:[%s12821_s12 + $0xf8] sm:$0xff] }
 0x163   : > { %10974 = vmatprep.mubr.msk.f32.mxu0 %vm532_vm1, %v2624_v58  ;;  %v2659_v21 = vrot.slane %v13893_v18, 5  ;;  %v2658_v58 = vsel %vm2601_vm4, %v2655_v47, %v2657_v52 }
 0x165   : > { %v2660_v27 = vsel %vm2601_vm4, %v2657_v52, %v2659_v21  ;;  %v13960_v52 = vld [vmem:[%s12821_s12 + $0x150] sm:$0xff] }
 0x166   : > { %10975 = vmatmul.mubr.msk.f32.gmra.mrb[10].mxu0 %vm532_vm1, %v2626_v24  ;;  %v2661_v24 = vrot.slane %v13900_v53, 5 }
 0x167   : > { %10977 = vmatprep.mubr.msk.f32.mxu0 %vm532_vm1, %v2628_v59  ;;  %v13905_v59 = vld [vmem:[%s12821_s12 + $0x108] sm:$0xff] }
 0x168   : > { %v2663_v22 = vrot.slane %v13905_v59, 5 }
 0x16a   : > { %10978 = vmatmul.mubr.msk.f32.gmra.mrb[12].mxu0 %vm532_vm1, %v2630_v28  ;;  %v2662_v28 = vsel %vm2601_vm4, %v2659_v21, %v2661_v24  ;;  %v2664_v60 = vsel %vm2601_vm4, %v2661_v24, %v2663_v22 }
 0x16b   : > { %10980 = vmatprep.mubr.msk.f32.mxu0 %vm532_vm1, %v2632_v16  ;;  %v2665_v16 = vrot.slane %v13912_v32, 5 }
 0x16e   : > { %10981 = vmatmul.mubr.msk.f32.gmra.mrb[14].mxu0 %vm532_vm1, %v2634_v33  ;;  %v13917_v33 = vld [vmem:[%s12821_s12 + $0x118] sm:$0xff] }
 0x16f   : > { %10983 = vmatprep.mubr.msk.f32.mxu0 %vm532_vm1, %v2636_v19  ;;  %v2667_v1 = vrot.slane %v13917_v33, 5  ;;  %v2666_v19 = vsel %vm2601_vm4, %v2663_v22, %v2665_v16  ;;  %v13972_v22 = vld [vmem:[%s12821_s12 + $0x160] sm:$0xff] }
 0x171   : > { %v2668_v20 = vsel %vm2601_vm4, %v2665_v16, %v2667_v1 }
 0x172   : > { %10984 = vmatmul.mubr.msk.f32.gmra.mrb[16].mxu0 %vm532_vm1, %v2638_v42  ;;  %v2669_v42 = vrot.slane %v13924_v39, 5 }
 0x173   : > { %10986 = vmatprep.mubr.msk.f32.mxu0 %vm532_vm1, %v2640_v25  ;;  %v13929_v25 = vld [vmem:[%s12821_s12 + $0x128] sm:$0xff] }
 0x174   : > { %v2671_v4 = vrot.slane %v13929_v25, 5 }
 0x176   : > { %10987 = vmatmul.mubr.msk.f32.gmra.mrb[18].mxu0 %vm532_vm1, %v2642_v50  ;;  %v2670_v50 = vsel %vm2601_vm4, %v2667_v1, %v2669_v42  ;;  %v2672_v48 = vsel %vm2601_vm4, %v2669_v42, %v2671_v4 }
 0x177   : > { %10989 = vmatprep.mubr.msk.f32.mxu0 %vm532_vm1, %v2644_v31  ;;  %v2673_v31 = vrot.slane %v13936_v38, 5 }
 0x17a   : > { %10990 = vmatmul.mubr.msk.f32.gmra.mrb[20].mxu0 %vm532_vm1, %v2646_v9  ;;  %v13941_v9 = vld [vmem:[%s12821_s12 + $0x138] sm:$0xff] }
 0x17b   : > { %10992 = vmatprep.mubr.msk.f32.mxu0 %vm532_vm1, %v2648_v11  ;;  %v2675_v40 = vrot.slane %v13941_v9, 5  ;;  %v2674_v11 = vsel %vm2601_vm4, %v2671_v4, %v2673_v31 }
 0x17d   : > { %v2676_v57 = vsel %vm2601_vm4, %v2673_v31, %v2675_v40  ;;  %v12703_v31 = vld [vmem:[%s12821_s12 + $0x18] sm:$0xff] }
 0x17e   : > { %10993 = vmatmul.mubr.msk.f32.gmra.mrb[22].mxu0 %vm532_vm1, %v2650_v46  ;;  %v2677_v46 = vrot.slane %v13948_v41, 5 }
 0x17f   : > { %10995 = vmatprep.mubr.msk.f32.mxu0 %vm532_vm1, %v2652_v7  ;;  %v13953_v7 = vld [vmem:[%s12821_s12 + $0x148] sm:$0xff] }
 0x180   : > { %v2679_v47 = vrot.slane %v13953_v7, 5 }
 0x182   : > { %10996 = vmatmul.mubr.msk.f32.gmra.mrb[24].mxu0 %vm532_vm1, %v2654_v14  ;;  %v2678_v14 = vsel %vm2601_vm4, %v2675_v40, %v2677_v46  ;;  %v2680_v21 = vsel %vm2601_vm4, %v2677_v46, %v2679_v47  ;;  %v3133_v40 = vrot.slane %v13765_v23, 6  ;;  %v13994_v46 = vld [vmem:[%s12821_s12 + $0x28] sm:$0xff] }
 0x183   : > { %10998 = vmatprep.mubr.msk.f32.mxu0 %vm532_vm1, %v2656_v15  ;;  %v2681_v15 = vrot.slane %v13960_v52, 5 }
 0x186   : > { %10999 = vmatmul.mubr.msk.f32.gmra.mrb[26].mxu0 %vm532_vm1, %v2658_v58  ;;  %v13965_v58 = vld [vmem:[%s12821_s12 + $0x158] sm:$0xff] }
 0x187   : > { %11001 = vmatprep.mubr.msk.f32.mxu0 %vm532_vm1, %v2660_v27  ;;  %v2683_v24 = vrot.slane %v13965_v58, 5  ;;  %v2682_v27 = vsel %vm2601_vm4, %v2679_v47, %v2681_v15  ;;  %v3137_v47 = vrot.slane %v13774_v6, 6 }
 0x189   : > { %v2684_v16 = vsel %vm2601_vm4, %v2681_v15, %v2683_v24  ;;  %v14003_v15 = vld [vmem:[%s12821_s12 + $0x38] sm:$0xff] }
 0x18a   : > { %11002 = vmatmul.mubr.msk.f32.gmra.mrb[28].mxu0 %vm532_vm1, %v2662_v28  ;;  %v2685_v28 = vrot.slane %v13972_v22, 5  ;;  %v3139_v23 = vrot.slane %v14003_v15, 6 }
 0x18b   : > { %11004 = vmatprep.mubr.msk.f32.mxu0 %vm532_vm1, %v2664_v60  ;;  %v2687_v60 = vrot.slane %v13123_v51, 5 }
 0x18c   : > { %v2686_v1 = vsel %vm2601_vm4, %v2683_v24, %v2685_v28 }
 0x18d   : > { %v2688_v42 = vsel %vm2601_vm4, %v2685_v28, %v2687_v60 }
 0x18e   : > { %11005 = vmatmul.mubr.msk.f32.gmra.mrb[30].mxu0 %vm532_vm1, %v2666_v19  ;;  %v2689_v19 = vrot.slane %v13742_v54, 5 }
 0x18f   : > { %11007 = vmatprep.mubr.msk.f32.mxu0 %vm532_vm1, %v2668_v20  ;;  %v2691_v20 = vrot.slane %v13745_v2, 5 }
 0x190   : > { %v2690_v4 = vsel %vm2601_vm4, %v2687_v60, %v2689_v19  ;;  %v14022_v60 = vld [vmem:[%s12821_s12 + $0x48] sm:$0xff] }
 0x191   : > { %v2692_v51 = vsel %vm2601_vm4, %v2689_v19, %v2691_v20  ;;  %v14031_v19 = vld [vmem:[%s12821_s12 + $0x50] sm:$0xff] }
 0x192   : > { %11008 = vmatmul.mubr.msk.f32.gmra.mrb[32].mxu0 %vm532_vm1, %v2670_v50  ;;  %v3130_v50 = vrot.slane %v13758_v26, 6 }
 0x193   : > { %11010 = vmatprep.mubr.msk.f32.mxu0 %vm532_vm1, %v2672_v48  ;;  %v3131_v48 = vrot.slane %v12703_v31, 6  ;;  %v14043_v31 = vld [vmem:[%s12821_s12 + $0x60] sm:$0xff] }
 0x195   : > { %v3134_v26 = vsel %vm3129_vm5, %v3131_v48, %v3133_v40 }
 0x196   : > { %11011 = vmatmul.mubr.msk.f32.gmra.mrb[34].mxu0 %vm532_vm1, %v2674_v11  ;;  %v3132_v11 = vsel %vm3129_vm5, %v3130_v50, %v3131_v48  ;;  %v3149_v48 = vrot.slane %v14043_v31, 6 }
 0x197   : > { %11013 = vmatprep.mubr.msk.f32.mxu0 %vm532_vm1, %v2676_v57  ;;  %v3135_v57 = vrot.slane %v13994_v46, 6 }
 0x199   : > { %v3138_v24 = vsel %vm3129_vm5, %v3135_v57, %v3137_v47 }
 0x19a   : > { %11014 = vmatmul.mubr.msk.f32.gmra.mrb[36].mxu0 %vm532_vm1, %v2678_v14  ;;  %v3136_v14 = vsel %vm3129_vm5, %v3133_v40, %v3135_v57 }
 0x19b   : > { %11016 = vmatprep.mubr.msk.f32.mxu0 %vm532_vm1, %v2680_v21  ;;  %v14009_v21 = vld [vmem:[%s16323_s3 + $0x1c] sm:$0xf] }
 0x19e   : > { %11017 = vmatmul.mubr.msk.f32.gmra.mrb[38].mxu0 %vm532_vm1, %v2682_v27  ;;  %v14017_v27 = vld [vmem:[%s12821_s12 + $0x40] sm:$0xff] }
 0x19f   : > { %11019 = vmatprep.mubr.msk.f32.mxu0 %vm532_vm1, %v2684_v16  ;;  %v3141_v28 = vrot.slane %v14017_v27, 6  ;;  %v3140_v16 = vsel %vm3129_vm5, %v3137_v47, %v3139_v23  ;;  %v14055_v47 = vld [vmem:[%s12821_s12 + $0x70] sm:$0xff] }
 0x1a2   : > { %11020 = vmatmul.mubr.msk.f32.gmra.mrb[40].mxu0 %vm532_vm1, %v2686_v1  ;;  %v3143_v1 = vrot.slane %v14022_v60, 6 }
 0x1a3   : > { %11022 = vmatprep.mubr.msk.f32.mxu0 %vm532_vm1, %v2688_v42  ;;  %v3145_v42 = vrot.slane %v14031_v19, 6 }
 0x1a5   : > { %v3146_v50 = vsel %vm3129_vm5, %v3143_v1, %v3145_v42 }
 0x1a6   : > { %11023 = vmatmul.mubr.msk.f32.gmra.mrb[42].mxu0 %vm532_vm1, %v2690_v4  ;;  %v14036_v4 = vld [vmem:[%s12821_s12 + $0x58] sm:$0xff] }
 0x1a7   : > { %11025 = vmatprep.mubr.msk.f32.mxu0 %vm532_vm1, %v2692_v51  ;;  %v3147_v51 = vrot.slane %v14036_v4, 6 }
 0x1a9   : > { %v3148_v40 = vsel %vm3129_vm5, %v3145_v42, %v3147_v51 }
 0x1aa   : > { %11026 = vmatmul.mubr.msk.f32.gmra.mrb[44].mxu0 %vm532_vm1, %v2691_v20  ;;  %v3144_v20 = vsel %vm3129_vm5, %v3141_v28, %v3143_v1  ;;  %v14067_v1 = vld [vmem:[%s12821_s12 + $0x80] sm:$0xff] }
 0x1ab   : > { %11030 = vmatprep.mubr.msk.f32.mxu0 %vm532_vm1, %v3132_v11  ;;  %v14048_v11 = vld [vmem:[%s12821_s12 + $0x68] sm:$0xff] }
 0x1ac   : > { %v3151_v57 = vrot.slane %v14048_v11, 6 }
 0x1ae   : > { %11031 = vmatmul.mubr.msk.f32.vlgmr.msra.gmra.mrb[0].mxu0 %vm532_vm1, %v3134_v26  ;;  %v3150_v26 = vsel %vm3129_vm5, %v3147_v51, %v3149_v48 }
 0x1af   : > { %11100 = vmatpush3.msk.msra.mxu0 %vm671_vm0, %v13782_v30  ;;  %11033 = vmatprep.mubr.msk.f32.mxu0 %vm532_vm1, %v3136_v14  ;;  %v3142_v30 = vsel %vm3129_vm5, %v3139_v23, %v3141_v28  ;;  %v3153_v14 = vrot.slane %v14055_v47, 6  ;;  %v3152_v23 = vsel %vm3129_vm5, %v3149_v48, %v3151_v57  ;;  %v14079_v48 = vld [vmem:[%s12821_s12 + $0x90] sm:$0xff] }
 0x1b0   : > { %11170 = vmatprep.subr.msk.mxu0 %vm671_vm0, %v14009_v21 }
 0x1b2   : > { %11034 = vmatmul.mubr.msk.f32.gmra.mrb[2].mxu0 %vm532_vm1, %v3138_v24  ;;  %v14060_v24 = vld [vmem:[%s12821_s12 + $0x78] sm:$0xff] }
 0x1b3   : > { %11036 = vmatprep.mubr.msk.f32.mxu0 %vm532_vm1, %v3140_v16  ;;  %v3155_v28 = vrot.slane %v14060_v24, 6  ;;  %v3154_v16 = vsel %vm3129_vm5, %v3151_v57, %v3153_v14 }
 0x1b5   : > { %v3156_v42 = vsel %vm3129_vm5, %v3153_v14, %v3155_v28 }
 0x1b6   : > { %11037 = vmatmul.mubr.msk.f32.gmra.mrb[4].mxu0 %vm532_vm1, %v3142_v30  ;;  %v3157_v30 = vrot.slane %v14067_v1, 6 }
 0x1b7   : > { %11039 = vmatprep.mubr.msk.f32.mxu0 %vm532_vm1, %v3144_v20  ;;  %v14072_v20 = vld [vmem:[%s12821_s12 + $0x88] sm:$0xff] }
 0x1b8   : > { %v3159_v51 = vrot.slane %v14072_v20, 6 }
 0x1ba   : > { %11040 = vmatmul.mubr.msk.f32.gmra.mrb[6].mxu0 %vm532_vm1, %v3146_v50  ;;  %v3158_v50 = vsel %vm3129_vm5, %v3155_v28, %v3157_v30  ;;  %v3160_v57 = vsel %vm3129_vm5, %v3157_v30, %v3159_v51 }
 0x1bb   : > { %11042 = vmatprep.mubr.msk.f32.mxu0 %vm532_vm1, %v3148_v40  ;;  %v3161_v40 = vrot.slane %v14079_v48, 6 }
 0x1be   : > { %11043 = vmatmul.mubr.msk.f32.gmra.mrb[8].mxu0 %vm532_vm1, %v3150_v26  ;;  %v14084_v26 = vld [vmem:[%s12821_s12 + $0x98] sm:$0xff] }
 0x1bf   : > { %11045 = vmatprep.mubr.msk.f32.mxu0 %vm532_vm1, %v3152_v23  ;;  %v3163_v14 = vrot.slane %v14084_v26, 6  ;;  %v3162_v23 = vsel %vm3129_vm5, %v3159_v51, %v3161_v40 }
 0x1c1   : > { %v3164_v28 = vsel %vm3129_vm5, %v3161_v40, %v3163_v14  ;;  %v3173_v40 = vrot.slane %v13852_v29, 6 }
 0x1c2   : > { %11046 = vmatmul.mubr.msk.f32.gmra.mrb[10].mxu0 %vm532_vm1, %v3154_v16  ;;  %v3165_v16 = vrot.slane %v13828_v36, 6 }
 0x1c3   : > { %11048 = vmatprep.mubr.msk.f32.mxu0 %vm532_vm1, %v3156_v42  ;;  %v3167_v42 = vrot.slane %v13833_v10, 6 }
 0x1c4   : > { %v3166_v30 = vsel %vm3129_vm5, %v3163_v14, %v3165_v16 }
 0x1c5   : > { %v3170_v51 = vsel %vm3129_vm5, %v3167_v42, %v3169_v3 }
 0x1c6   : > { %11049 = vmatmul.mubr.msk.f32.gmra.mrb[12].mxu0 %vm532_vm1, %v3158_v50  ;;  %v3168_v50 = vsel %vm3129_vm5, %v3165_v16, %v3167_v42  ;;  %v3177_v16 = vrot.slane %v13864_v35, 6  ;;  %v3181_v42 = vrot.slane %v13876_v13, 6 }
 0x1c7   : > { %11051 = vmatprep.mubr.msk.f32.mxu0 %vm532_vm1, %v3160_v57  ;;  %v3171_v57 = vrot.slane %v13845_v44, 6 }
 0x1c9   : > { %v3174_v14 = vsel %vm3129_vm5, %v3171_v57, %v3173_v40 }
 0x1ca   : > { %11052 = vmatmul.mubr.msk.f32.gmra.mrb[14].mxu0 %vm532_vm1, %v3162_v23  ;;  %v3172_v23 = vsel %vm3129_vm5, %v3169_v3, %v3171_v57 }
 0x1cb   : > { %11054 = vmatprep.mubr.msk.f32.mxu0 %vm532_vm1, %v3164_v28  ;;  %v3175_v28 = vrot.slane %v13857_v34, 6 }
 0x1cd   : > { %v3178_v3 = vsel %vm3129_vm5, %v3175_v28, %v3177_v16 }
 0x1ce   : > { %11055 = vmatmul.mubr.msk.f32.gmra.mrb[16].mxu0 %vm532_vm1, %v3166_v30  ;;  %v3176_v30 = vsel %vm3129_vm5, %v3173_v40, %v3175_v28  ;;  %v3185_v40 = vrot.slane %v13888_v17, 6 }
 0x1cf   : > { %11057 = vmatprep.mubr.msk.f32.mxu0 %vm532_vm1, %v3168_v50  ;;  %v3179_v50 = vrot.slane %v13869_v8, 6 }
 0x1d1   : > { %v3182_v57 = vsel %vm3129_vm5, %v3179_v50, %v3181_v42 }
 0x1d2   : > { %11058 = vmatmul.mubr.msk.f32.gmra.mrb[18].mxu0 %vm532_vm1, %v3170_v51  ;;  %v3180_v51 = vsel %vm3129_vm5, %v3177_v16, %v3179_v50  ;;  %v3189_v16 = vrot.slane %v13900_v53, 6 }
 0x1d3   : > { %11060 = vmatprep.mubr.msk.f32.mxu0 %vm532_vm1, %v3172_v23  ;;  %v3183_v23 = vrot.slane %v13881_v12, 6 }
 0x1d5   : > { %v3186_v28 = vsel %vm3129_vm5, %v3183_v23, %v3185_v40 }
 0x1d6   : > { %11061 = vmatmul.mubr.msk.f32.gmra.mrb[20].mxu0 %vm532_vm1, %v3174_v14  ;;  %v3184_v14 = vsel %vm3129_vm5, %v3181_v42, %v3183_v23  ;;  %v3193_v42 = vrot.slane %v13912_v32, 6 }
 0x1d7   : > { %11063 = vmatprep.mubr.msk.f32.mxu0 %vm532_vm1, %v3176_v30  ;;  %v3187_v30 = vrot.slane %v13893_v18, 6 }
 0x1d9   : > { %v3190_v50 = vsel %vm3129_vm5, %v3187_v30, %v3189_v16 }
 0x1da   : > { %11064 = vmatmul.mubr.msk.f32.gmra.mrb[22].mxu0 %vm532_vm1, %v3178_v3  ;;  %v3188_v3 = vsel %vm3129_vm5, %v3185_v40, %v3187_v30  ;;  %v3197_v40 = vrot.slane %v13924_v39, 6 }
 0x1db   : > { %11066 = vmatprep.mubr.msk.f32.mxu0 %vm532_vm1, %v3180_v51  ;;  %v3191_v51 = vrot.slane %v13905_v59, 6 }
 0x1dd   : > { %v3194_v23 = vsel %vm3129_vm5, %v3191_v51, %v3193_v42 }
 0x1de   : > { %11067 = vmatmul.mubr.msk.f32.gmra.mrb[24].mxu0 %vm532_vm1, %v3182_v57  ;;  %v3192_v57 = vsel %vm3129_vm5, %v3189_v16, %v3191_v51  ;;  %v3201_v16 = vrot.slane %v13936_v38, 6 }
 0x1df   : > { %11069 = vmatprep.mubr.msk.f32.mxu0 %vm532_vm1, %v3184_v14  ;;  %v3195_v14 = vrot.slane %v13917_v33, 6 }
 0x1e1   : > { %v3198_v30 = vsel %vm3129_vm5, %v3195_v14, %v3197_v40 }
 0x1e2   : > { %11070 = vmatmul.mubr.msk.f32.gmra.mrb[26].mxu0 %vm532_vm1, %v3186_v28  ;;  %v3196_v28 = vsel %vm3129_vm5, %v3193_v42, %v3195_v14  ;;  %v3205_v42 = vrot.slane %v13948_v41, 6 }
 0x1e3   : > { %11072 = vmatprep.mubr.msk.f32.mxu0 %vm532_vm1, %v3188_v3  ;;  %v3199_v3 = vrot.slane %v13929_v25, 6 }
 0x1e5   : > { %v3202_v51 = vsel %vm3129_vm5, %v3199_v3, %v3201_v16 }
 0x1e6   : > { %11073 = vmatmul.mubr.msk.f32.gmra.mrb[28].mxu0 %vm532_vm1, %v3190_v50  ;;  %v3200_v50 = vsel %vm3129_vm5, %v3197_v40, %v3199_v3  ;;  %v3209_v40 = vrot.slane %v13960_v52, 6 }
 0x1e7   : > { %11075 = vmatprep.mubr.msk.f32.mxu0 %vm532_vm1, %v3192_v57  ;;  %v3203_v57 = vrot.slane %v13941_v9, 6 }
 0x1e9   : > { %v3206_v14 = vsel %vm3129_vm5, %v3203_v57, %v3205_v42 }
 0x1ea   : > { %11076 = vmatmul.mubr.msk.f32.gmra.mrb[30].mxu0 %vm532_vm1, %v3194_v23  ;;  %v3204_v23 = vsel %vm3129_vm5, %v3201_v16, %v3203_v57  ;;  %v3213_v16 = vrot.slane %v13972_v22, 6  ;;  %v3215_v57 = vrot.slane %v14165_v62, 6 }
 0x1eb   : > { %11078 = vmatprep.mubr.msk.f32.mxu0 %vm532_vm1, %v3196_v28  ;;  %v3207_v28 = vrot.slane %v13953_v7, 6 }
 0x1ed   : > { %v3210_v3 = vsel %vm3129_vm5, %v3207_v28, %v3209_v40 }
 0x1ee   : > { %11079 = vmatmul.mubr.msk.f32.gmra.mrb[32].mxu0 %vm532_vm1, %v3198_v30  ;;  %v3208_v30 = vsel %vm3129_vm5, %v3205_v42, %v3207_v28  ;;  %v3219_v28 = vrot.slane %v13745_v2, 6 }
 0x1ef   : > { %11081 = vmatprep.mubr.msk.f32.mxu0 %vm532_vm1, %v3200_v50  ;;  %v3211_v50 = vrot.slane %v13965_v58, 6 }
 0x1f1   : > { %v3214_v42 = vsel %vm3129_vm5, %v3211_v50, %v3213_v16 }
 0x1f2   : > { %11082 = vmatmul.mubr.msk.f32.gmra.mrb[34].mxu0 %vm532_vm1, %v3202_v51  ;;  %v3212_v51 = vsel %vm3129_vm5, %v3209_v40, %v3211_v50  ;;  %v14186_v50 = vld [vmem:[%s16323_s3 + $0x20] sm:$0xf] }
 0x1f3   : > { %11084 = vmatprep.mubr.msk.f32.mxu0 %vm532_vm1, %v3204_v23  ;;  %v3217_v23 = vrot.slane %v13742_v54, 6 }
 0x1f5   : > { %v3218_v40 = vsel %vm3129_vm5, %v3215_v57, %v3217_v23 }
 0x1f6   : > { %11085 = vmatmul.mubr.msk.f32.gmra.mrb[36].mxu0 %vm532_vm1, %v3206_v14  ;;  %v3216_v14 = vsel %vm3129_vm5, %v3213_v16, %v3215_v57  ;;  %v495_v16 = vld [vmem:[%s16322_s2 + $0x118] sm:$0xff] }
 0x1f7   : > { %11087 = vmatprep.mubr.msk.f32.mxu0 %vm532_vm1, %v3208_v30  ;;  %v3220_v30 = vsel %vm3129_vm5, %v3217_v23, %v3219_v28  ;;  %v16560_v57 = vld [vmem:[#allocation13_spill] sm:$0xff]  ;;  %v497_v23 = vld [vmem:[%s16322_s2 + $0x128] sm:$0xff] }
 0x1fa   : > { %11088 = vmatmul.mubr.msk.f32.gmra.mrb[38].mxu0 %vm532_vm1, %v3210_v3  ;;  %v16559_v3 = vld [vmem:[#allocation12_spill] sm:$0xff] }
 0x1fb   : > { %11090 = vmatprep.mubr.msk.f32.mxu0 %vm532_vm1, %v3212_v51  ;;  %v496_v51 = vld [vmem:[%s16322_s2 + $0x120] sm:$0xff] }
 0x1fe   : > { %11091 = vmatmul.mubr.msk.f32.gmra.mrb[40].mxu0 %vm532_vm1, %v3214_v42  ;;  %v16561_v42 = vld [vmem:[#allocation14_spill] sm:$0xff] }
 0x1ff   : > { %11093 = vmatprep.mubr.msk.f32.mxu0 %vm532_vm1, %v3216_v14  ;;  %v498_v14 = vld [vmem:[%s16322_s2 + $0x130] sm:$0xff] }
 0x202   : > { %11094 = vmatmul.mubr.msk.f32.gmra.mrb[42].mxu0 %vm532_vm1, %v3218_v40  ;;  %v16563_v40 = vld [vmem:[#allocation16_spill] sm:$0xff] }
 0x203   : > { %11096 = vmatprep.mubr.msk.f32.mxu0 %vm532_vm1, %v3220_v30  ;;  %v499_v30 = vld [vmem:[%s16322_s2 + $0x138] sm:$0xff] }
 0x206   : > { %11097 = vmatmul.mubr.msk.f32.gmra.mrb[44].mxu0 %vm532_vm1, %v3219_v28  ;;  %v16562_v28 = vld [vmem:[#allocation15_spill] sm:$0xff] }
 0x207   : > { %11101 = vmatprep.mubr.msk.f32.mxu0 %vm532_vm1, %v13994_v46  ;;  %v16551_v46 = vld [vmem:[#allocation4_spill] sm:$0xff] }
 0x20a   : > { %11102 = vmatmul.mubr.msk.f32.vlgmr.msra.gmra.mrb[0].mxu0 %vm532_vm1, %v13774_v6  ;;  %v460_v6 = vld [vmem:[%s16322_s2] sm:$0xff] }
 0x20b   : > { %11171 = vmatpush3.msk.msra.mxu0 %vm671_vm0, %v14009_v21  ;;  %11104 = vmatprep.mubr.msk.f32.mxu0 %vm532_vm1, %v14003_v15  ;;  %v488_v15 = vld [vmem:[%s16322_s2 + $0xe0] sm:$0xff]  ;;  %v16552_v21 = vld [vmem:[#allocation5_spill] sm:$0xff] }
 0x20c   : > { %11241 = vmatprep.subr.msk.mxu0 %vm671_vm0, %v14186_v50 }
 0x20e   : > { %11105 = vmatmul.mubr.msk.f32.gmra.mrb[2].mxu0 %vm532_vm1, %v14017_v27  ;;  %v16553_v27 = vld [vmem:[#allocation6_spill] sm:$0xff] }
 0x20f   : > { %11107 = vmatprep.mubr.msk.f32.mxu0 %vm532_vm1, %v14022_v60  ;;  %v489_v60 = vld [vmem:[%s16322_s2 + $0xe8] sm:$0xff] }
 0x212   : > { %11108 = vmatmul.mubr.msk.f32.gmra.mrb[4].mxu0 %vm532_vm1, %v14031_v19  ;;  %v490_v19 = vld [vmem:[%s16322_s2 + $0xf0] sm:$0xff] }
 0x213   : > { %11110 = vmatprep.mubr.msk.f32.mxu0 %vm532_vm1, %v14036_v4  ;;  %v16554_v4 = vld [vmem:[#allocation7_spill] sm:$0xff] }
 0x216   : > { %11111 = vmatmul.mubr.msk.f32.gmra.mrb[6].mxu0 %vm532_vm1, %v14043_v31  ;;  %v16555_v31 = vld [vmem:[#allocation8_spill] sm:$0xff] }
 0x217   : > { %11113 = vmatprep.mubr.msk.f32.mxu0 %vm532_vm1, %v14048_v11  ;;  %v491_v11 = vld [vmem:[%s16322_s2 + $0xf8] sm:$0xff] }
 0x21a   : > { %11114 = vmatmul.mubr.msk.f32.gmra.mrb[8].mxu0 %vm532_vm1, %v14055_v47  ;;  %v492_v47 = vld [vmem:[%s16322_s2 + $0x100] sm:$0xff] }
 0x21b   : > { %11116 = vmatprep.mubr.msk.f32.mxu0 %vm532_vm1, %v14060_v24  ;;  %v16556_v24 = vld [vmem:[#allocation9_spill] sm:$0xff] }
 0x21e   : > { %11117 = vmatmul.mubr.msk.f32.gmra.mrb[10].mxu0 %vm532_vm1, %v14067_v1  ;;  %v16557_v1 = vld [vmem:[#allocation10_spill] sm:$0xff] }
 0x21f   : > { %11119 = vmatprep.mubr.msk.f32.mxu0 %vm532_vm1, %v14072_v20  ;;  %v493_v20 = vld [vmem:[%s16322_s2 + $0x108] sm:$0xff] }
 0x222   : > { %11120 = vmatmul.mubr.msk.f32.gmra.mrb[12].mxu0 %vm532_vm1, %v14079_v48  ;;  %v494_v48 = vld [vmem:[%s16322_s2 + $0x110] sm:$0xff] }
 0x223   : > { %11122 = vmatprep.mubr.msk.f32.mxu0 %vm532_vm1, %v14084_v26  ;;  %v16558_v26 = vld [vmem:[#allocation11_spill] sm:$0xff] }
 0x226   : > { %11123 = vmatmul.mubr.msk.f32.gmra.mrb[14].mxu0 %vm532_vm1, %v13828_v36  ;;  %v12745_v36 = vmov 0  }
 0x227   : > { %11125 = vmatprep.mubr.msk.f32.mxu0 %vm532_vm1, %v13833_v10  ;;  %12673 = vset.pattern.permute.xlu0 %v12745_v36  ;;  %v462_v10 = vld [vmem:[%s16322_s2 + $0x10] sm:$0xff] }
 0x228   : > { %4794 = vperm.xlu0 %12673, %v460_v6   ;;  %12674 = vset.pattern.permute.xlu1 %v12745_v36  ;;  %v16564_v6 = vld [vmem:[#allocation17_spill] sm:$0xff]  ;;  %v16565_v36 = vld [vmem:[#allocation18_spill] sm:$0xff] }
 0x229   : > { %4804 = vperm.xlu1 %12674, %v462_v10   ;;  %v501_v10 = vld [vmem:[%s16322_s2 + $0x148] sm:$0xff] }
 0x22a   : > { %11126 = vmatmul.mubr.msk.f32.gmra.mrb[16].mxu0 %vm532_vm1, %v13840_v43  ;;  %v461_v43 = vld [vmem:[%s16322_s2 + $0x8] sm:$0xff] }
 0x22b   : > { %11128 = vmatprep.mubr.msk.f32.mxu0 %vm532_vm1, %v13845_v44  ;;  %v463_v44 = vld [vmem:[%s16322_s2 + $0x18] sm:$0xff] }
 0x22c   : > { %4799 = vperm.xlu0 %12673, %v461_v43   ;;  %v502_v43 = vld [vmem:[%s16322_s2 + $0x150] sm:$0xff] }
 0x22d   : > { %4809 = vperm.xlu1 %12674, %v463_v44   ;;  %v16566_v44 = vld [vmem:[#allocation19_spill] sm:$0xff] }
 0x22e   : > { %11129 = vmatmul.mubr.msk.f32.gmra.mrb[18].mxu0 %vm532_vm1, %v13852_v29  ;;  %v464_v29 = vld [vmem:[%s16322_s2 + $0x20] sm:$0xff] }
 0x22f   : > { %11131 = vmatprep.mubr.msk.f32.mxu0 %vm532_vm1, %v13857_v34  ;;  %v465_v34 = vld [vmem:[%s16322_s2 + $0x28] sm:$0xff] }
 0x230   : > { %4814 = vperm.xlu0 %12673, %v464_v29   ;;  %v16567_v29 = vld [vmem:[#allocation20_spill] sm:$0xff] }
 0x231   : > { %4819 = vperm.xlu1 %12674, %v465_v34   ;;  %v503_v34 = vld [vmem:[%s16322_s2 + $0x158] sm:$0xff] }
 0x232   : > { %11132 = vmatmul.mubr.msk.f32.gmra.mrb[20].mxu0 %vm532_vm1, %v13864_v35  ;;  %v466_v35 = vld [vmem:[%s16322_s2 + $0x30] sm:$0xff] }
 0x233   : > { %11134 = vmatprep.mubr.msk.f32.mxu0 %vm532_vm1, %v13869_v8  ;;  %v467_v8 = vld [vmem:[%s16322_s2 + $0x38] sm:$0xff] }
 0x234   : > { %4824 = vperm.xlu0 %12673, %v466_v35   ;;  %v504_v35 = vld [vmem:[%s16322_s2 + $0x160] sm:$0xff] }
 0x235   : > { %4829 = vperm.xlu1 %12674, %v467_v8   ;;  %v16568_v8 = vld [vmem:[#allocation21_spill] sm:$0xff] }
 0x236   : > { %11135 = vmatmul.mubr.msk.f32.gmra.mrb[22].mxu0 %vm532_vm1, %v13876_v13  ;;  %v468_v13 = vld [vmem:[%s16322_s2 + $0x40] sm:$0xff] }
 0x237   : > { %11137 = vmatprep.mubr.msk.f32.mxu0 %vm532_vm1, %v13881_v12  ;;  %v469_v12 = vld [vmem:[%s16322_s2 + $0x48] sm:$0xff] }
 0x238   : > { %4834 = vperm.xlu0 %12673, %v468_v13   ;;  %v16569_v13 = vld [vmem:[#allocation22_spill] sm:$0xff] }
 0x239   : > { %4839 = vperm.xlu1 %12674, %v469_v12   ;;  %v505_v12 = vld [vmem:[%s16322_s2 + $0x168] sm:$0x3] }
 0x23a   : > { %11138 = vmatmul.mubr.msk.f32.gmra.mrb[24].mxu0 %vm532_vm1, %v13888_v17  ;;  %v470_v17 = vld [vmem:[%s16322_s2 + $0x50] sm:$0xff] }
 0x23b   : > { %11140 = vmatprep.mubr.msk.f32.mxu0 %vm532_vm1, %v13893_v18  ;;  %v471_v18 = vld [vmem:[%s16322_s2 + $0x58] sm:$0xff] }
 0x23c   : > { %4844 = vperm.xlu0 %12673, %v470_v17   ;;  %v515_v17 = vld [vmem:[%s16325_s5] sm:$0xf] }
 0x23d   : > { %4849 = vperm.xlu1 %12674, %v471_v18   ;;  %v16570_v18 = vld [vmem:[#allocation23_spill] sm:$0xff]  ;;  %11312 = vmatprep.subr.msk.mxu1 %vm671_vm0, %v515_v17 }
 0x23e   : > { %11141 = vmatmul.mubr.msk.f32.gmra.mrb[26].mxu0 %vm532_vm1, %v13900_v53  ;;  %v472_v53 = vld [vmem:[%s16322_s2 + $0x60] sm:$0xff]  ;;  %11313 = vmatpush3.msk.msra.mxu1 %vm671_vm0, %v515_v17  ;;  %v16618_v17 = vld [vmem:[#allocation71_spill] sm:$0xff] }
 0x23f   : > { %11143 = vmatprep.mubr.msk.f32.mxu0 %vm532_vm1, %v13905_v59  ;;  %v473_v59 = vld [vmem:[%s16322_s2 + $0x68] sm:$0xff] }
 0x240   : > { %4854 = vperm.xlu0 %12673, %v472_v53   ;;  %v16571_v53 = vld [vmem:[#allocation24_spill] sm:$0xff] }
 0x241   : > { %4859 = vperm.xlu1 %12674, %v473_v59   ;;  %v16572_v59 = vld [vmem:[#allocation25_spill] sm:$0xff] }
 0x242   : > { %11144 = vmatmul.mubr.msk.f32.gmra.mrb[28].mxu0 %vm532_vm1, %v13912_v32  ;;  %v474_v32 = vld [vmem:[%s16322_s2 + $0x70] sm:$0xff] }
 0x243   : > { %11146 = vmatprep.mubr.msk.f32.mxu0 %vm532_vm1, %v13917_v33  ;;  %v14322_v33 = vld [vmem:[%s12821_s12 + $0x180] sm:$0xff] }
 0x244   : > { %4864 = vperm.xlu0 %12673, %v474_v32   ;;  %v16573_v32 = vld [vmem:[#allocation26_spill] sm:$0xff] }
 0x246   : > { %11147 = vmatmul.mubr.msk.f32.gmra.mrb[30].mxu0 %vm532_vm1, %v13924_v39  ;;  %v475_v39 = vld [vmem:[%s16322_s2 + $0x78] sm:$0xff] }
 0x247   : > { %11149 = vmatprep.mubr.msk.f32.mxu0 %vm532_vm1, %v13929_v25  ;;  %v476_v25 = vld [vmem:[%s16322_s2 + $0x80] sm:$0xff]  ;;  %4869 = vperm.xlu1 %12674, %v475_v39   ;;  %v16574_v39 = vld [vmem:[#allocation27_spill] sm:$0xff] }
 0x248   : > { %4874 = vperm.xlu0 %12673, %v476_v25   ;;  %v16575_v25 = vld [vmem:[#allocation28_spill] sm:$0xff] }
 0x24a   : > { %11150 = vmatmul.mubr.msk.f32.gmra.mrb[32].mxu0 %vm532_vm1, %v13936_v38  ;;  %v14338_v38 = vld [vmem:[%s12821_s12 + $0x190] sm:$0xff] }
 0x24b   : > { %11152 = vmatprep.mubr.msk.f32.mxu0 %vm532_vm1, %v13941_v9  ;;  %v477_v9 = vld [vmem:[%s16322_s2 + $0x88] sm:$0xff] }
 0x24c   : > { %4879 = vperm.xlu1 %12674, %v477_v9   ;;  %v16576_v9 = vld [vmem:[#allocation29_spill] sm:$0xff] }
 0x24e   : > { %11153 = vmatmul.mubr.msk.f32.gmra.mrb[34].mxu0 %vm532_vm1, %v13948_v41  ;;  %v478_v41 = vld [vmem:[%s16322_s2 + $0x90] sm:$0xff] }
 0x24f   : > { %11155 = vmatprep.mubr.msk.f32.mxu0 %vm532_vm1, %v13953_v7  ;;  %4884 = vperm.xlu0 %12673, %v478_v41   ;;  %v479_v7 = vld [vmem:[%s16322_s2 + $0x98] sm:$0xff]  ;;  %v16577_v41 = vld [vmem:[#allocation30_spill] sm:$0xff] }
 0x250   : > { %4889 = vperm.xlu1 %12674, %v479_v7   ;;  %v4014_v7 = vrot.slane %v13742_v54, 1 }
 0x252   : > { %11156 = vmatmul.mubr.msk.f32.gmra.mrb[36].mxu0 %vm532_vm1, %v13960_v52  ;;  %v480_v52 = vld [vmem:[%s16322_s2 + $0xa0] sm:$0xff] }
 0x253   : > { %11158 = vmatprep.mubr.msk.f32.mxu0 %vm532_vm1, %v13965_v58  ;;  %4894 = vperm.xlu0 %12673, %v480_v52   ;;  %v16549_v58 = vld [vmem:[#allocation2_spill] sm:$0xff]  ;;  %v16578_v52 = vld [vmem:[#allocation31_spill] sm:$0xff] }
 0x256   : > { %11159 = vmatmul.mubr.msk.f32.gmra.mrb[38].mxu0 %vm532_vm1, %v13972_v22  ;;  %v16550_v22 = vld [vmem:[#allocation3_spill] sm:$0xff] }
 0x257   : > { %11161 = vmatprep.mubr.msk.f32.mxu0 %vm532_vm1, %v14165_v62  ;;  %v14325_v62 = vld [vmem:[%s12821_s12 + $0x188] sm:$0xff] }
 0x25a   : > { %11162 = vmatmul.mubr.msk.f32.gmra.mrb[40].mxu0 %vm532_vm1, %v13742_v54 }
 0x25b   : > { %11164 = vmatprep.mubr.msk.f32.mxu0 %vm532_vm1, %v13745_v2 }
 0x25e   : > { %11165 = vmatmul.mubr.msk.f32.gmra.mrb[42].mxu0 %vm532_vm1, %v14322_v33 }
 0x25f   : > { %11167 = vmatprep.mubr.msk.f32.mxu0 %vm532_vm1, %v14325_v62 }
 0x262   : > { %11168 = vmatmul.mubr.msk.f32.gmra.mrb[44].mxu0 %vm532_vm1, %v14338_v38 }
 0x263   : > { %11172 = vmatprep.mubr.msk.f32.mxu0 %vm532_vm1, %v13071_v61  ;;  %v481_v61 = vld [vmem:[%s16322_s2 + $0xa8] sm:$0xff] }
 0x264   : > { %4899 = vperm.xlu1 %12674, %v481_v61   ;;  %v16579_v61 = vld [vmem:[#allocation32_spill] sm:$0xff] }
 0x266   : > { %11173 = vmatmul.mubr.msk.f32.vlgmr.msra.gmra.mrb[0].mxu0 %vm532_vm1, %v13075_v63  ;;  %v482_v63 = vld [vmem:[%s16322_s2 + $0xb0] sm:$0xff] }
 0x267   : > { %11242 = vmatpush3.msk.msra.mxu0 %vm671_vm0, %v14186_v50  ;;  %11175 = vmatprep.mubr.msk.f32.mxu0 %vm532_vm1, %v13093_v5  ;;  %v483_v5 = vld [vmem:[%s16322_s2 + $0xb8] sm:$0xff]  ;;  %v500_v50 = vld [vmem:[%s16322_s2 + $0x140] sm:$0xff] }
 0x268   : > { %4904 = vperm.xlu0 %12673, %v482_v63   ;;  %4909 = vperm.xlu1 %12674, %v483_v5   ;;  %v4016_v63 = vrot.slane %v13745_v2, 1  ;;  %v4018_v5 = vrot.slane %v14322_v33, 1 }
 0x26a   : > { %11176 = vmatmul.mubr.msk.f32.gmra.mrb[2].mxu0 %vm532_vm1, %v13097_v37  ;;  %v484_v37 = vld [vmem:[%s16322_s2 + $0xc0] sm:$0xff]  ;;  %v4017_v54 = vsel %vm1016_vm3, %v4014_v7, %v4016_v63 }
 0x26b   : > { %11178 = vmatprep.mubr.msk.f32.mxu0 %vm532_vm1, %v13115_v45  ;;  %v485_v45 = vld [vmem:[%s16322_s2 + $0xc8] sm:$0xff] }
 0x26c   : > { %4914 = vperm.xlu0 %12673, %v484_v37   ;;  %4919 = vperm.xlu1 %12674, %v485_v45   ;;  %v16580_v37 = vld [vmem:[#allocation33_spill] sm:$0xff]  ;;  %v4022_v45 = vrot.slane %v14338_v38, 1 }
 0x26e   : > { %11179 = vmatmul.mubr.msk.f32.gmra.mrb[4].mxu0 %vm532_vm1, %v13119_v49  ;;  %v486_v49 = vld [vmem:[%s16322_s2 + $0xd0] sm:$0xff] }
 0x26f   : > { %11181 = vmatprep.mubr.msk.f32.mxu0 %vm532_vm1, %v13132_v55  ;;  %v487_v55 = vld [vmem:[%s16322_s2 + $0xd8] sm:$0xff] }
 0x270   : > { %4924 = vperm.xlu0 %12673, %v486_v49   ;;  %4929 = vperm.xlu1 %12674, %v487_v55   ;;  %v4019_v49 = vsel %vm1016_vm3, %v4016_v63, %v4018_v5  ;;  %v16583_v55 = vld [vmem:[#allocation36_spill] sm:$0xff] }
 0x272   : > { %11182 = vmatmul.mubr.msk.f32.gmra.mrb[6].mxu0 %vm532_vm1, %v16549_v58  ;;  %v4020_v58 = vrot.slane %v14325_v62, 1 }
 0x273   : > { %11184 = vmatprep.mubr.msk.f32.mxu0 %vm532_vm1, %v16550_v22  ;;  %v16581_v22 = vld [vmem:[#allocation34_spill] sm:$0xff] }
 0x274   : > { %4934 = vperm.xlu0 %12673, %v488_v15   ;;  %4939 = vperm.xlu1 %12674, %v489_v60   ;;  %v4021_v2 = vsel %vm1016_vm3, %v4018_v5, %v4020_v58  ;;  %v16584_v15 = vld [vmem:[#allocation37_spill] sm:$0xff]  ;;  %v16587_v60 = vld [vmem:[#allocation40_spill] sm:$0xff] }
 0x276   : > { %11185 = vmatmul.mubr.msk.f32.gmra.mrb[8].mxu0 %vm532_vm1, %v16551_v46  ;;  %v16582_v46 = vld [vmem:[#allocation35_spill] sm:$0xff] }
 0x277   : > { %11187 = vmatprep.mubr.msk.f32.mxu0 %vm532_vm1, %v16552_v21  ;;  %v16585_v21 = vld [vmem:[#allocation38_spill] sm:$0xff] }
 0x278   : > { %4944 = vperm.xlu0 %12673, %v490_v19   ;;  %4949 = vperm.xlu1 %12674, %v491_v11   ;;  %v16588_v19 = vld [vmem:[#allocation41_spill] sm:$0xff]  ;;  %v16591_v11 = vld [vmem:[#allocation44_spill] sm:$0xff] }
 0x27a   : > { %11188 = vmatmul.mubr.msk.f32.gmra.mrb[10].mxu0 %vm532_vm1, %v16553_v27  ;;  %v16586_v27 = vld [vmem:[#allocation39_spill] sm:$0xff] }
 0x27b   : > { %11190 = vmatprep.mubr.msk.f32.mxu0 %vm532_vm1, %v16554_v4  ;;  %v16589_v4 = vld [vmem:[#allocation42_spill] sm:$0xff] }
 0x27c   : > { %4954 = vperm.xlu0 %12673, %v492_v47   ;;  %4959 = vperm.xlu1 %12674, %v493_v20   ;;  %v16592_v47 = vld [vmem:[#allocation45_spill] sm:$0xff]  ;;  %v16595_v20 = vld [vmem:[#allocation48_spill] sm:$0xff] }
 0x27e   : > { %11191 = vmatmul.mubr.msk.f32.gmra.mrb[12].mxu0 %vm532_vm1, %v16555_v31  ;;  %v16590_v31 = vld [vmem:[#allocation43_spill] sm:$0xff] }
 0x27f   : > { %11193 = vmatprep.mubr.msk.f32.mxu0 %vm532_vm1, %v16556_v24  ;;  %v16593_v24 = vld [vmem:[#allocation46_spill] sm:$0xff] }
 0x280   : > { %4964 = vperm.xlu0 %12673, %v494_v48   ;;  %4969 = vperm.xlu1 %12674, %v495_v16   ;;  %v16596_v48 = vld [vmem:[#allocation49_spill] sm:$0xff]  ;;  %v16599_v16 = vld [vmem:[#allocation52_spill] sm:$0xff] }
 0x282   : > { %11194 = vmatmul.mubr.msk.f32.gmra.mrb[14].mxu0 %vm532_vm1, %v16557_v1  ;;  %v16594_v1 = vld [vmem:[#allocation47_spill] sm:$0xff] }
 0x283   : > { %11196 = vmatprep.mubr.msk.f32.mxu0 %vm532_vm1, %v16558_v26  ;;  %v16597_v26 = vld [vmem:[#allocation50_spill] sm:$0xff] }
 0x284   : > { %4974 = vperm.xlu0 %12673, %v496_v51   ;;  %4979 = vperm.xlu1 %12674, %v497_v23   ;;  %v16600_v51 = vld [vmem:[#allocation53_spill] sm:$0xff]  ;;  %v16603_v23 = vld [vmem:[#allocation56_spill] sm:$0xff] }
 0x286   : > { %11197 = vmatmul.mubr.msk.f32.gmra.mrb[16].mxu0 %vm532_vm1, %v16559_v3  ;;  %v16598_v3 = vld [vmem:[#allocation51_spill] sm:$0xff] }
 0x287   : > { %11199 = vmatprep.mubr.msk.f32.mxu0 %vm532_vm1, %v16560_v57  ;;  %v16601_v57 = vld [vmem:[#allocation54_spill] sm:$0xff] }
 0x288   : > { %4984 = vperm.xlu0 %12673, %v498_v14   ;;  %4989 = vperm.xlu1 %12674, %v499_v30   ;;  %v16604_v14 = vld [vmem:[#allocation57_spill] sm:$0xff]  ;;  %v16607_v30 = vld [vmem:[#allocation60_spill] sm:$0xff] }
 0x28a   : > { %11200 = vmatmul.mubr.msk.f32.gmra.mrb[18].mxu0 %vm532_vm1, %v16561_v42  ;;  %v16602_v42 = vld [vmem:[#allocation55_spill] sm:$0xff] }
 0x28b   : > { %11202 = vmatprep.mubr.msk.f32.mxu0 %vm532_vm1, %v16562_v28  ;;  %v16605_v28 = vld [vmem:[#allocation58_spill] sm:$0xff] }
 0x28c   : > { %4994 = vperm.xlu0 %12673, %v500_v50   ;;  %4999 = vperm.xlu1 %12674, %v501_v10   ;;  %v16608_v50 = vld [vmem:[#allocation61_spill] sm:$0xff]  ;;  %v16611_v10 = vld [vmem:[#allocation64_spill] sm:$0xff] }
 0x28e   : > { %11203 = vmatmul.mubr.msk.f32.gmra.mrb[20].mxu0 %vm532_vm1, %v16563_v40  ;;  %v16606_v40 = vld [vmem:[#allocation59_spill] sm:$0xff] }
 0x28f   : > { %11205 = vmatprep.mubr.msk.f32.mxu0 %vm532_vm1, %v16564_v6  ;;  %v16609_v6 = vld [vmem:[#allocation62_spill] sm:$0xff] }
 0x290   : > { %5004 = vperm.xlu0 %12673, %v502_v43   ;;  %5009 = vperm.xlu1 %12674, %v503_v34   ;;  %v16612_v43 = vld [vmem:[#allocation65_spill] sm:$0xff]  ;;  %v16615_v34 = vld [vmem:[#allocation68_spill] sm:$0xff] }
 0x292   : > { %11206 = vmatmul.mubr.msk.f32.gmra.mrb[22].mxu0 %vm532_vm1, %v16565_v36  ;;  %v16610_v36 = vld [vmem:[#allocation63_spill] sm:$0xff] }
 0x293   : > { %11208 = vmatprep.mubr.msk.f32.mxu0 %vm532_vm1, %v16566_v44  ;;  %v16613_v44 = vld [vmem:[#allocation66_spill] sm:$0xff] }
 0x294   : > { %5014 = vperm.xlu0 %12673, %v504_v35   ;;  %5019 = vperm.xlu1 %12674, %v505_v12   ;;  %v16616_v35 = vld [vmem:[#allocation69_spill] sm:$0xff] }
 0x296   : > { %11209 = vmatmul.mubr.msk.f32.gmra.mrb[24].mxu0 %vm532_vm1, %v16567_v29  ;;  %v16614_v29 = vld [vmem:[#allocation67_spill] sm:$0xff] }
 0x297   : > { %11211 = vmatprep.mubr.msk.f32.mxu0 %vm532_vm1, %v16568_v8  ;;  %v16617_v8 = vld [vmem:[#allocation70_spill] sm:$0xff] }
 0x29a   : > { %11212 = vmatmul.mubr.msk.f32.gmra.mrb[26].mxu0 %vm532_vm1, %v16569_v13  ;;  %v12719_v13 = vld [vmem:[%s12821_s12 + $0x170] sm:$0xff] }
 0x29b   : > { %11214 = vmatprep.mubr.msk.f32.mxu0 %vm532_vm1, %v16570_v18  ;;  %v4380_v12 = vrot.slane %v12719_v13, 2  ;;  %v16619_v18 = vld [vmem:[#allocation73_spill] sm:$0xff] }
 0x29e   : > { %11215 = vmatmul.mubr.msk.f32.gmra.mrb[28].mxu0 %vm532_vm1, %v16571_v53  ;;  %v12720_v53 = vld [vmem:[%s12821_s12 + $0x178] sm:$0xff] }
 0x29f   : > { %11217 = vmatprep.mubr.msk.f32.mxu0 %vm532_vm1, %v16572_v59  ;;  %v4382_v59 = vrot.slane %v12720_v53, 2 }
 0x2a2   : > { %11218 = vmatmul.mubr.msk.f32.gmra.mrb[30].mxu0 %vm532_vm1, %v16573_v32  ;;  %v4384_v32 = vrot.slane %v14322_v33, 2 }
 0x2a3   : > { %11220 = vmatprep.mubr.msk.f32.mxu0 %vm532_vm1, %v16574_v39  ;;  %v16620_v39 = vld [vmem:[#allocation72_spill] sm:$0xff] }
 0x2a6   : > { %11221 = vmatmul.mubr.msk.f32.gmra.mrb[32].mxu0 %vm532_vm1, %v16575_v25  ;;  %v4381_v25 = vsel %vm1544_vm2, %v16620_v39, %v4380_v12 }
 0x2a7   : > { %11223 = vmatprep.mubr.msk.f32.mxu0 %vm532_vm1, %v13300_v0  ;;  %v4015_v0 = vsel %vm1016_vm3, %v13319_v56, %v4014_v7  ;;  %v4023_v56 = vsel %vm1016_vm3, %v4020_v58, %v4022_v45  ;;  %v4383_v7 = vsel %vm1544_vm2, %v4380_v12, %v4382_v59 }
 0x2aa   : > { %11224 = vmatmul.mubr.msk.f32.gmra.mrb[34].mxu0 %vm532_vm1, %v16576_v9  ;;  %v16621_v9 = vld [vmem:[#allocation74_spill] sm:$0xff] }
 0x2ab   : > { %11226 = vmatprep.mubr.msk.f32.mxu0 %vm532_vm1, %v16577_v41  ;;  %v4386_v41 = vrot.slane %v14325_v62, 2  ;;  %v14633_v62 = vld [vmem:[%s16325_s5 + $0x4] sm:$0xf] }
 0x2ac   : > { %11374 = vmatprep.subr.msk.mxu1 %vm671_vm0, %v14633_v62 }
 0x2ad   : > { %v4387_v33 = vsel %vm1544_vm2, %v4384_v32, %v4386_v41 }
 0x2ae   : > { %11227 = vmatmul.mubr.msk.f32.gmra.mrb[36].mxu0 %vm532_vm1, %v16578_v52  ;;  %v4388_v52 = vrot.slane %v14338_v38, 2  ;;  %v14637_v38 = vpop.f32.mrb[0].mxu1 }
 0x2af   : > { %11229 = vmatprep.mubr.msk.f32.mxu0 %vm532_vm1, %v16579_v61  ;;  %v4385_v61 = vsel %vm1544_vm2, %v4382_v59, %v4384_v32  ;;  %v14639_v5 = vpop.f32.mrb[1].mxu1 }
 0x2b0   : > { %v4389_v63 = vsel %vm1544_vm2, %v4386_v41, %v4388_v52 }
 0x2b2   : > { %11230 = vmatmul.mubr.msk.f32.gmra.mrb[38].mxu0 %vm532_vm1, %v16580_v37 }
 0x2b3   : > { %11232 = vmatprep.mubr.msk.f32.mxu0 %vm532_vm1, %v4015_v0  ;;  %v14641_v0 = vpop.f32.mrb[2].mxu1 }
 0x2b4   : > { %v14643_v37 = vpop.f32.mrb[3].mxu1 }
 0x2b5   : > { %v14645_v58 = vpop.f32.mrb[4].mxu1 }
 0x2b6   : > { %11233 = vmatmul.mubr.msk.f32.gmra.mrb[40].mxu0 %vm532_vm1, %v4017_v54  ;;  %v14647_v54 = vpop.f32.mrb[5].mxu1 }
 0x2b7   : > { %11235 = vmatprep.mubr.msk.f32.mxu0 %vm532_vm1, %v4019_v49 }
 0x2ba   : > { %11236 = vmatmul.mubr.msk.f32.gmra.mrb[42].mxu0 %vm532_vm1, %v4021_v2 }
 0x2bb   : > { %11238 = vmatprep.mubr.msk.f32.mxu0 %vm532_vm1, %v4023_v56 }
 0x2be   : > { %11239 = vmatmul.mubr.msk.f32.gmra.mrb[44].mxu0 %vm532_vm1, %v4022_v45  ;;  %v14649_v45 = vpop.f32.mrb[6].mxu1 }
 0x2bf   : > { %11243 = vmatprep.mubr.msk.f32.mxu0 %vm532_vm1, %v16581_v22  ;;  %v14651_v49 = vpop.f32.mrb[7].mxu1 }
 0x2c0   : > { %v14653_v2 = vpop.f32.mrb[8].mxu1 }
 0x2c1   : > { %v14655_v56 = vpop.f32.mrb[9].mxu1 }
 0x2c2   : > { %11244 = vmatmul.mubr.msk.f32.vlgmr.msra.gmra.mrb[0].mxu0 %vm532_vm1, %v16582_v46  ;;  %v14657_v22 = vpop.f32.mrb[10].mxu1 }
 0x2c3   : > { %11246 = vmatprep.mubr.msk.f32.mxu0 %vm532_vm1, %v16583_v55  ;;  %v14659_v46 = vpop.f32.mrb[11].mxu1 }
 0x2c4   : > { %v14661_v55 = vpop.f32.mrb[12].mxu1 }
 0x2c6   : > { %11247 = vmatmul.mubr.msk.f32.gmra.mrb[2].mxu0 %vm532_vm1, %v16584_v15  ;;  %v14663_v15 = vpop.f32.mrb[13].mxu1 }
 0x2c7   : > { %11249 = vmatprep.mubr.msk.f32.mxu0 %vm532_vm1, %v16585_v21  ;;  %v14665_v21 = vpop.f32.mrb[14].mxu1 }
 0x2ca   : > { %11250 = vmatmul.mubr.msk.f32.gmra.mrb[4].mxu0 %vm532_vm1, %v16586_v27  ;;  %v14667_v27 = vpop.f32.mrb[15].mxu1 }
 0x2cb   : > { %11252 = vmatprep.mubr.msk.f32.mxu0 %vm532_vm1, %v16587_v60  ;;  %v14669_v60 = vpop.f32.mrb[16].mxu1 }
 0x2ce   : > { %11253 = vmatmul.mubr.msk.f32.gmra.mrb[6].mxu0 %vm532_vm1, %v16588_v19  ;;  %v14671_v19 = vpop.f32.mrb[17].mxu1 }
 0x2cf   : > { %11255 = vmatprep.mubr.msk.f32.mxu0 %vm532_vm1, %v16589_v4  ;;  %v14673_v4 = vpop.f32.mrb[18].mxu1 }
 0x2d2   : > { %11256 = vmatmul.mubr.msk.f32.gmra.mrb[8].mxu0 %vm532_vm1, %v16590_v31  ;;  %v14675_v31 = vpop.f32.mrb[19].mxu1 }
 0x2d3   : > { %11258 = vmatprep.mubr.msk.f32.mxu0 %vm532_vm1, %v16591_v11  ;;  %v14677_v11 = vpop.f32.mrb[20].mxu1 }
 0x2d6   : > { %11259 = vmatmul.mubr.msk.f32.gmra.mrb[10].mxu0 %vm532_vm1, %v16592_v47  ;;  %v14679_v47 = vpop.f32.mrb[21].mxu1 }
 0x2d7   : > { %11261 = vmatprep.mubr.msk.f32.mxu0 %vm532_vm1, %v16593_v24  ;;  %v14681_v24 = vpop.f32.mrb[22].mxu1 }
 0x2da   : > { %11262 = vmatmul.mubr.msk.f32.gmra.mrb[12].mxu0 %vm532_vm1, %v16594_v1  ;;  %v14683_v1 = vpop.f32.mrb[23].mxu1 }
 0x2db   : > { %11264 = vmatprep.mubr.msk.f32.mxu0 %vm532_vm1, %v16595_v20  ;;  %v14685_v20 = vpop.f32.mrb[24].mxu1 }
 0x2de   : > { %11265 = vmatmul.mubr.msk.f32.gmra.mrb[14].mxu0 %vm532_vm1, %v16596_v48  ;;  %v14687_v48 = vpop.f32.mrb[25].mxu1 }
 0x2df   : > { %11267 = vmatprep.mubr.msk.f32.mxu0 %vm532_vm1, %v16597_v26  ;;  %v4795_v26 = vpop.permute.xlu0 %4794 }
 0x2e2   : > { %11268 = vmatmul.mubr.msk.f32.gmra.mrb[16].mxu0 %vm532_vm1, %v16598_v3  ;;  %v4805_v3 = vpop.permute.xlu1 %4804 }
 0x2e3   : > { %11270 = vmatprep.mubr.msk.f32.mxu0 %vm532_vm1, %v16599_v16  ;;  %v4800_v16 = vpop.permute.xlu0 %4799 }
 0x2e6   : > { %11271 = vmatmul.mubr.msk.f32.gmra.mrb[18].mxu0 %vm532_vm1, %v16600_v51  ;;  %v4810_v51 = vpop.permute.xlu1 %4809 }
 0x2e7   : > { %11273 = vmatprep.mubr.msk.f32.mxu0 %vm532_vm1, %v16601_v57  ;;  %v4815_v57 = vpop.permute.xlu0 %4814 }
 0x2ea   : > { %11274 = vmatmul.mubr.msk.f32.gmra.mrb[20].mxu0 %vm532_vm1, %v16602_v42  ;;  %v4820_v42 = vpop.permute.xlu1 %4819 }
 0x2eb   : > { %11276 = vmatprep.mubr.msk.f32.mxu0 %vm532_vm1, %v16603_v23  ;;  %v4825_v23 = vpop.permute.xlu0 %4824 }
 0x2ee   : > { %11277 = vmatmul.mubr.msk.f32.gmra.mrb[22].mxu0 %vm532_vm1, %v16604_v14  ;;  %v4830_v14 = vpop.permute.xlu1 %4829 }
 0x2ef   : > { %11279 = vmatprep.mubr.msk.f32.mxu0 %vm532_vm1, %v16605_v28  ;;  %v14689_v28 = vpop.permute.xlu0 %4834 }
 0x2f2   : > { %11280 = vmatmul.mubr.msk.f32.gmra.mrb[24].mxu0 %vm532_vm1, %v16606_v40  ;;  %v14691_v40 = vpop.permute.xlu1 %4839 }
 0x2f3   : > { %11282 = vmatprep.mubr.msk.f32.mxu0 %vm532_vm1, %v16607_v30  ;;  %v14693_v30 = vpop.permute.xlu0 %4844 }
 0x2f6   : > { %11283 = vmatmul.mubr.msk.f32.gmra.mrb[26].mxu0 %vm532_vm1, %v16608_v50  ;;  %v14695_v50 = vpop.permute.xlu1 %4849 }
 0x2f7   : > { %11285 = vmatprep.mubr.msk.f32.mxu0 %vm532_vm1, %v16609_v6  ;;  %v14700_v6 = vld [vmem:[%s16324_s4] ss:$0 sm:$0xff] }
 0x2fa   : > { %11286 = vmatmul.mubr.msk.f32.gmra.mrb[28].mxu0 %vm532_vm1, %v16610_v36 }
 0x2fb   : > { %11288 = vmatprep.mubr.msk.f32.mxu0 %vm532_vm1, %v16611_v10 }
 0x2fe   : > { %11289 = vmatmul.mubr.msk.f32.gmra.mrb[30].mxu0 %vm532_vm1, %v16612_v43 }
 0x2ff   : > { %11291 = vmatprep.mubr.msk.f32.mxu0 %vm532_vm1, %v16613_v44 }
 0x302   : > { %11292 = vmatmul.mubr.msk.f32.gmra.mrb[32].mxu0 %vm532_vm1, %v16614_v29  ;;  %v14704_v29 = vpop.permute.xlu0 %4854 }
 0x303   : > { %11294 = vmatprep.mubr.msk.f32.mxu0 %vm532_vm1, %v16615_v34 }
 0x306   : > { %11295 = vmatmul.mubr.msk.f32.gmra.mrb[34].mxu0 %vm532_vm1, %v16616_v35  ;;  %v14706_v35 = vpop.permute.xlu1 %4859 }
 0x307   : > { %11297 = vmatprep.mubr.msk.f32.mxu0 %vm532_vm1, %v16617_v8 }
 0x30a   : > { %11298 = vmatmul.mubr.msk.f32.gmra.mrb[36].mxu0 %vm532_vm1, %v16618_v17 }
 0x30b   : > { %11300 = vmatprep.mubr.msk.f32.mxu0 %vm532_vm1, %v16619_v18 }
 0x30e   : > { %11301 = vmatmul.mubr.msk.f32.gmra.mrb[38].mxu0 %vm532_vm1, %v16621_v9 }
 0x30f   : > { %11303 = vmatprep.mubr.msk.f32.mxu0 %vm532_vm1, %v4381_v25 }
 0x312   : > { %11304 = vmatmul.mubr.msk.f32.gmra.mrb[40].mxu0 %vm532_vm1, %v4383_v7 }
 0x313   : > { %11306 = vmatprep.mubr.msk.f32.mxu0 %vm532_vm1, %v4385_v61  ;;  %v14718_v61 = vld [vmem:[%s16325_s5 + $0x8] sm:$0xf] }
 0x316   : > { %11307 = vmatmul.mubr.msk.f32.gmra.mrb[42].mxu0 %vm532_vm1, %v4387_v33  ;;  %v14720_v33 = vpop.permute.xlu0 %4864 }
 0x317   : > { %11309 = vmatprep.mubr.msk.f32.mxu0 %vm532_vm1, %v4389_v63 }
 0x31a   : > { %11310 = vmatmul.mubr.msk.f32.gmra.mrb[44].mxu0 %vm532_vm1, %v4388_v52 }
 0x395   : > { %v11245_v36 = vpop.f32.mrb[0].mxu0 }
 0x396   : > { %v11872_v10 = vadd.f32 %v11245_v36, %v14700_v6  ;;  %v4471_v43 = vpop.f32.mrb[1].mxu0 }
 0x397   : > { %v11873_v44 = vadd.f32 %v14700_v6, %v4471_v43 }
 0x398   : > { %v4747_v34 = vmax.f32 %v11872_v10, 0.0 }
 0x399   : > { %v4746_v8 = vmax.f32 %v11873_v44, 0.0  ;;  %v11248_v13 = vpop.f32.mrb[2].mxu0 }
 0x39a   : > { %v14708_v12 = vmul.f32 %v4800_v16, %v4747_v34  ;;  %v11874_v17 = vadd.f32 %v11248_v13, %v14700_v6  ;;  %v4481_v18 = vpop.f32.mrb[3].mxu0  ;;  %v14725_v16 = vpop.permute.xlu1 %4869 }
 0x39b   : > { %v5022_v53 = vmul.f32 %v4795_v26, %v4746_v8  ;;  %v11875_v59 = vadd.f32 %v14700_v6, %v4481_v18 }
 0x39c   : > { %v16403_v32 = vrot.slane %v14708_v12, 1  ;;  %v16402_v39 = vrot.slane %v14708_v12, 2  ;;  %v4749_v25 = vmax.f32 %v11874_v17, 0.0 }
 0x39d   : > { %v5503_v9 = vrot.slane %v5022_v53, 1  ;;  %v5972_v41 = vrot.slane %v5022_v53, 2  ;;  %v4748_v7 = vmax.f32 %v11875_v59, 0.0  ;;  %v11251_v52 = vpop.f32.mrb[4].mxu0  ;;  %11314 = vmatprep.mubr.msk.f32.mxu1 %vm532_vm1, %v5022_v53  ;;  %v14754_v53 = vpop.permute.xlu0 %4874 }
 0x39e   : > { %v11876_v63 = vadd.f32 %v11251_v52, %v14700_v6  ;;  %v4491_v26 = vpop.f32.mrb[5].mxu0  ;;  %11315 = vmatmul.mubr.msk.f32.vlgmr.msra.gmra.mrb[26].mxu1 %vm532_vm1, %v14708_v12  ;;  %v14742_v34 = vmul.f32 %v4810_v51, %v4749_v25 }
 0x39f   : > { %v14727_v36 = vmul.f32 %v4805_v3, %v4748_v7  ;;  %v11877_v10 = vadd.f32 %v14700_v6, %v4491_v26  ;;  %11375 = vmatpush3.msk.msra.mxu1 %vm671_vm0, %v14633_v62  ;;  %v14735_v43 = vsel %vm1016_vm3, %v5503_v9, %v16403_v32  ;;  %v14740_v44 = vsel %vm1544_vm2, %v5972_v41, %v16402_v39  ;;  %v14758_v9 = vpop.permute.xlu1 %4879 }
 0x3a0   : > { %16622 = vst [vmem:[#allocation2_spill] sm:$0xff] %v14740_v44  ;;  %v4751_v8 = vmax.f32 %v11876_v63, 0.0  ;;  %11436 = vmatprep.subr.msk.mxu1 %vm671_vm0, %v14718_v61  ;;  %v991_v44 = vadd.f32 %v14637_v38, %v14700_v6 }
 0x3a1   : > { %v4750_v3 = vmax.f32 %v11877_v10, 0.0  ;;  %v11254_v13 = vpop.f32.mrb[6].mxu0  ;;  %11317 = vmatprep.mubr.msk.f32.mxu1 %vm532_vm1, %v14727_v36 }
 0x3a2   : > { %v11878_v62 = vadd.f32 %v11254_v13, %v14700_v6  ;;  %v4501_v17 = vpop.f32.mrb[7].mxu0  ;;  %11318 = vmatmul.mubr.msk.f32.gmra.mrb[28].mxu1 %vm532_vm1, %v14742_v34  ;;  %v14756_v59 = vmul.f32 %v4820_v42, %v4751_v8  ;;  %v14772_v13 = vpop.permute.xlu0 %4884 }
 0x3a3   : > { %v14751_v18 = vmul.f32 %v4815_v57, %v4750_v3  ;;  %v11879_v51 = vadd.f32 %v14700_v6, %v4501_v17 }
 0x3a4   : > { %v4753_v25 = vmax.f32 %v11878_v62, 0.0 }
 0x3a5   : > { %v4752_v41 = vmax.f32 %v11879_v51, 0.0  ;;  %v11257_v7 = vpop.f32.mrb[8].mxu0  ;;  %11320 = vmatprep.mubr.msk.f32.mxu1 %vm532_vm1, %v14751_v18 }
 0x3a6   : > { %v11880_v52 = vadd.f32 %v11257_v7, %v14700_v6  ;;  %v4511_v63 = vpop.f32.mrb[9].mxu0  ;;  %11321 = vmatmul.mubr.msk.f32.gmra.mrb[30].mxu1 %vm532_vm1, %v14756_v59  ;;  %v14768_v42 = vmul.f32 %v4830_v14, %v4753_v25 }
 0x3a7   : > { %v14765_v57 = vmul.f32 %v4825_v23, %v4752_v41  ;;  %v11881_v26 = vadd.f32 %v14700_v6, %v4511_v63  ;;  %v14777_v23 = vpop.permute.xlu1 %4889 }
 0x3a8   : > { %v4755_v10 = vmax.f32 %v11880_v52, 0.0 }
 0x3a9   : > { %v4754_v8 = vmax.f32 %v11881_v26, 0.0  ;;  %v11260_v3 = vpop.f32.mrb[10].mxu0  ;;  %11323 = vmatprep.mubr.msk.f32.mxu1 %vm532_vm1, %v14765_v57 }
 0x3aa   : > { %v11882_v62 = vadd.f32 %v11260_v3, %v14700_v6  ;;  %v4521_v17 = vpop.f32.mrb[11].mxu0  ;;  %11324 = vmatmul.mubr.msk.f32.gmra.mrb[32].mxu1 %vm532_vm1, %v14768_v42  ;;  %v14784_v25 = vmul.f32 %v14691_v40, %v4755_v10  ;;  %v4895_v3 = vpop.permute.xlu0 %4894 }
 0x3ab   : > { %v14780_v51 = vmul.f32 %v14689_v28, %v4754_v8  ;;  %v11883_v14 = vadd.f32 %v14700_v6, %v4521_v17 }
 0x3ac   : > { %v4757_v41 = vmax.f32 %v11882_v62, 0.0  ;;  %v4900_v62 = vpop.permute.xlu1 %4899 }
 0x3ad   : > { %v4756_v7 = vmax.f32 %v11883_v14, 0.0  ;;  %v11263_v52 = vpop.f32.mrb[12].mxu0  ;;  %11326 = vmatprep.mubr.msk.f32.mxu1 %vm532_vm1, %v14780_v51 }
 0x3ae   : > { %v11884_v63 = vadd.f32 %v11263_v52, %v14700_v6  ;;  %v4531_v26 = vpop.f32.mrb[13].mxu0  ;;  %11327 = vmatmul.mubr.msk.f32.gmra.mrb[34].mxu1 %vm532_vm1, %v14784_v25  ;;  %v14796_v40 = vmul.f32 %v14695_v50, %v4757_v41 }
 0x3af   : > { %v14792_v28 = vmul.f32 %v14693_v30, %v4756_v7  ;;  %v11885_v8 = vadd.f32 %v14700_v6, %v4531_v26 }
 0x3b0   : > { %v4759_v10 = vmax.f32 %v11884_v63, 0.0 }
 0x3b1   : > { %v4758_v17 = vmax.f32 %v11885_v8, 0.0  ;;  %v11266_v14 = vpop.f32.mrb[14].mxu0  ;;  %11329 = vmatprep.mubr.msk.f32.mxu1 %vm532_vm1, %v14792_v28  ;;  %v4905_v8 = vpop.permute.xlu0 %4904 }
 0x3b2   : > { %v11886_v52 = vadd.f32 %v11266_v14, %v14700_v6  ;;  %v4541_v39 = vpop.f32.mrb[15].mxu0  ;;  %11330 = vmatmul.mubr.msk.f32.gmra.mrb[36].mxu1 %vm532_vm1, %v14796_v40  ;;  %v14808_v50 = vmul.f32 %v14706_v35, %v4759_v10 }
 0x3b3   : > { %v14804_v30 = vmul.f32 %v14704_v29, %v4758_v17  ;;  %v11887_v7 = vadd.f32 %v14700_v6, %v4541_v39  ;;  %v4910_v29 = vpop.permute.xlu1 %4909 }
 0x3b4   : > { %16623 = vst [vmem:[#allocation3_spill] sm:$0xff] %v14808_v50  ;;  %v4761_v41 = vmax.f32 %v11886_v52, 0.0 }
 0x3b5   : > { %v4760_v63 = vmax.f32 %v11887_v7, 0.0  ;;  %v11269_v26 = vpop.f32.mrb[16].mxu0  ;;  %11332 = vmatprep.mubr.msk.f32.mxu1 %vm532_vm1, %v14804_v30 }
 0x3b6   : > { %v11888_v14 = vadd.f32 %v11269_v26, %v14700_v6  ;;  %v4551_v32 = vpop.f32.mrb[17].mxu0  ;;  %11333 = vmatmul.mubr.msk.f32.gmra.mrb[38].mxu1 %vm532_vm1, %v14808_v50  ;;  %v14820_v39 = vmul.f32 %v14725_v16, %v4761_v41  ;;  %v990_v16 = vadd.f32 %v14700_v6, %v14639_v5  ;;  %v4915_v41 = vpop.permute.xlu0 %4914 }
 0x3b7   : > { %v14816_v17 = vmul.f32 %v14720_v33, %v4760_v63  ;;  %v11889_v35 = vadd.f32 %v14700_v6, %v4551_v32 }
 0x3b8   : > { %16624 = vst [vmem:[#allocation4_spill] sm:$0xff] %v14820_v39  ;;  %v4763_v10 = vmax.f32 %v11888_v14, 0.0 }
 0x3b9   : > { %v4762_v52 = vmax.f32 %v11889_v35, 0.0  ;;  %v11272_v7 = vpop.f32.mrb[18].mxu0  ;;  %11335 = vmatprep.mubr.msk.f32.mxu1 %vm532_vm1, %v14816_v17  ;;  %v4920_v35 = vpop.permute.xlu1 %4919 }
 0x3ba   : > { %v11890_v26 = vadd.f32 %v11272_v7, %v14700_v6  ;;  %v4561_v50 = vpop.f32.mrb[19].mxu0  ;;  %11336 = vmatmul.mubr.msk.f32.gmra.mrb[40].mxu1 %vm532_vm1, %v14820_v39  ;;  %v14836_v63 = vmul.f32 %v14758_v9, %v4763_v10 }
 0x3bb   : > { %v14830_v32 = vmul.f32 %v14754_v53, %v4762_v52  ;;  %v11891_v33 = vadd.f32 %v14700_v6, %v4561_v50  ;;  %v993_v53 = vadd.f32 %v14641_v0, %v14700_v6  ;;  %v992_v50 = vadd.f32 %v14700_v6, %v14643_v37  ;;  %v4925_v0 = vpop.permute.xlu0 %4924 }
 0x3bc   : > { %16625 = vst [vmem:[#allocation5_spill] sm:$0xff] %v14836_v63  ;;  %v4765_v14 = vmax.f32 %v11890_v26, 0.0 }
 0x3bd   : > { %v4764_v7 = vmax.f32 %v11891_v33, 0.0  ;;  %v11275_v38 = vpop.f32.mrb[20].mxu0  ;;  %11338 = vmatprep.mubr.msk.f32.mxu1 %vm532_vm1, %v14830_v32 }
 0x3be   : > { %v11893_v39 = vadd.f32 %v11275_v38, %v991_v44  ;;  %v4571_v52 = vpop.f32.mrb[21].mxu0  ;;  %11339 = vmatmul.mubr.msk.f32.gmra.mrb[42].mxu1 %vm532_vm1, %v14836_v63  ;;  %v14850_v10 = vmul.f32 %v14777_v23, %v4765_v14  ;;  %v995_v63 = vadd.f32 %v14645_v58, %v14700_v6 }
 0x3bf   : > { %v14845_v5 = vmul.f32 %v14772_v13, %v4764_v7  ;;  %v11895_v9 = vadd.f32 %v4571_v52, %v990_v16  ;;  %v4930_v16 = vpop.permute.xlu1 %4929 }
 0x3c0   : > { %v4767_v26 = vmax.f32 %v11893_v39, 0.0  ;;  %v994_v39 = vadd.f32 %v14700_v6, %v14647_v54  ;;  %v996_v54 = vadd.f32 %v14700_v6, %v14651_v49 }
 0x3c1   : > { %v4766_v33 = vmax.f32 %v11895_v9, 0.0  ;;  %v11278_v44 = vpop.f32.mrb[22].mxu0  ;;  %11341 = vmatprep.mubr.msk.f32.mxu1 %vm532_vm1, %v14845_v5 }
 0x3c2   : > { %v11897_v38 = vadd.f32 %v11278_v44, %v993_v53  ;;  %v4581_v13 = vpop.f32.mrb[23].mxu0  ;;  %11342 = vmatmul.mubr.msk.f32.gmra.mrb[44].mxu1 %vm532_vm1, %v14850_v10  ;;  %v14862_v14 = vmul.f32 %v4900_v62, %v4767_v26  ;;  %v997_v53 = vadd.f32 %v14649_v45, %v14700_v6  ;;  %v4935_v62 = vpop.permute.xlu0 %4934 }
 0x3c3   : > { %v14858_v37 = vmul.f32 %v4895_v3, %v4766_v33  ;;  %v11899_v23 = vadd.f32 %v4581_v13, %v992_v50 }
 0x3c4   : > { %v4769_v7 = vmax.f32 %v11897_v38, 0.0  ;;  %v4940_v38 = vpop.permute.xlu1 %4939 }
 0x3c5   : > { %v4768_v52 = vmax.f32 %v11899_v23, 0.0  ;;  %v11281_v9 = vpop.f32.mrb[24].mxu0  ;;  %11344 = vmatprep.mubr.msk.f32.mxu1 %vm532_vm1, %v14858_v37  ;;  %v999_v23 = vadd.f32 %v14653_v2, %v14700_v6 }
 0x3c6   : > { %v11901_v58 = vadd.f32 %v11281_v9, %v995_v63  ;;  %v4591_v44 = vpop.f32.mrb[25].mxu0  ;;  %11345 = vmatmul.mubr.msk.f32.gmra.mrb[46].mxu1 %vm532_vm1, %v14862_v14  ;;  %v14874_v26 = vmul.f32 %v4910_v29, %v4769_v7  ;;  %v998_v29 = vadd.f32 %v14700_v6, %v14655_v56 }
 0x3c7   : > { %v14870_v3 = vmul.f32 %v4905_v8, %v4768_v52  ;;  %v11903_v50 = vadd.f32 %v4591_v44, %v994_v39  ;;  %v1001_v44 = vadd.f32 %v14657_v22, %v14700_v6 }
 0x3c8   : > { %v4771_v33 = vmax.f32 %v11901_v58, 0.0 }
 0x3c9   : > { %v4770_v13 = vmax.f32 %v11903_v50, 0.0  ;;  %v11284_v63 = vpop.f32.mrb[26].mxu0  ;;  %11347 = vmatprep.mubr.msk.f32.mxu1 %vm532_vm1, %v14870_v3 }
 0x3ca   : > { %v11905_v45 = vadd.f32 %v11284_v63, %v997_v53  ;;  %v4601_v8 = vpop.f32.mrb[27].mxu0  ;;  %11348 = vmatmul.mubr.msk.f32.gmra.mrb[48].mxu1 %vm532_vm1, %v14874_v26  ;;  %v14886_v7 = vmul.f32 %v4920_v35, %v4771_v33  ;;  %v4945_v53 = vpop.permute.xlu0 %4944  ;;  %v1000_v35 = vadd.f32 %v14700_v6, %v14659_v46  ;;  %v1002_v46 = vadd.f32 %v14700_v6, %v14663_v15 }
 0x3cb   : > { %v14882_v39 = vmul.f32 %v4915_v41, %v4770_v13  ;;  %v11907_v49 = vadd.f32 %v4601_v8, %v996_v54  ;;  %v4950_v41 = vpop.permute.xlu1 %4949 }
 0x3cc   : > { %v4773_v52 = vmax.f32 %v11905_v45, 0.0 }
 0x3cd   : > { %v4772_v9 = vmax.f32 %v11907_v49, 0.0  ;;  %v11287_v58 = vpop.f32.mrb[28].mxu0  ;;  %11350 = vmatprep.mubr.msk.f32.mxu1 %vm532_vm1, %v14882_v39 }
 0x3ce   : > { %v11909_v2 = vadd.f32 %v11287_v58, %v999_v23  ;;  %v4611_v50 = vpop.f32.mrb[29].mxu0  ;;  %11351 = vmatmul.mubr.msk.f32.gmra.mrb[50].mxu1 %vm532_vm1, %v14886_v7  ;;  %v14898_v33 = vmul.f32 %v4930_v16, %v4773_v52  ;;  %v1003_v23 = vadd.f32 %v14661_v55, %v14700_v6  ;;  %v4955_v16 = vpop.permute.xlu0 %4954 }
 0x3cf   : > { %v14894_v54 = vmul.f32 %v4925_v0, %v4772_v9  ;;  %v11911_v56 = vadd.f32 %v4611_v50, %v998_v29  ;;  %v4960_v9 = vpop.permute.xlu1 %4959 }
 0x3d0   : > { %v4775_v13 = vmax.f32 %v11909_v2, 0.0 }
 0x3d1   : > { %v4774_v63 = vmax.f32 %v11911_v56, 0.0  ;;  %v11290_v45 = vpop.f32.mrb[30].mxu0  ;;  %11353 = vmatprep.mubr.msk.f32.mxu1 %vm532_vm1, %v14894_v54 }
 0x3d2   : > { %v11913_v22 = vadd.f32 %v11290_v45, %v1001_v44  ;;  %v4621_v8 = vpop.f32.mrb[31].mxu0  ;;  %11354 = vmatmul.mubr.msk.f32.gmra.mrb[52].mxu1 %vm532_vm1, %v14898_v33  ;;  %v14910_v29 = vmul.f32 %v4940_v38, %v4775_v13  ;;  %v1005_v44 = vadd.f32 %v14665_v21, %v14700_v6  ;;  %v1004_v38 = vadd.f32 %v14700_v6, %v14667_v27  ;;  %v4965_v45 = vpop.permute.xlu0 %4964 }
 0x3d3   : > { %v14906_v0 = vmul.f32 %v4935_v62, %v4774_v63  ;;  %v11915_v49 = vadd.f32 %v4621_v8, %v1000_v35 }
 0x3d4   : > { %v4777_v52 = vmax.f32 %v11913_v22, 0.0  ;;  %v1007_v22 = vadd.f32 %v14669_v60, %v14700_v6 }
 0x3d5   : > { %v4776_v58 = vmax.f32 %v11915_v49, 0.0  ;;  %v11293_v2 = vpop.f32.mrb[32].mxu0  ;;  %11356 = vmatprep.mubr.msk.f32.mxu1 %vm532_vm1, %v14906_v0 }
 0x3d6   : > { %v11917_v55 = vadd.f32 %v11293_v2, %v1003_v23  ;;  %v4631_v62 = vpop.f32.mrb[33].mxu0  ;;  %11357 = vmatmul.mubr.msk.f32.gmra.mrb[54].mxu1 %vm532_vm1, %v14910_v29  ;;  %v14922_v56 = vmul.f32 %v4950_v41, %v4777_v52  ;;  %v1006_v41 = vadd.f32 %v14700_v6, %v14671_v19  ;;  %v1009_v2 = vadd.f32 %v14673_v4, %v14700_v6 }
 0x3d7   : > { %v14918_v50 = vmul.f32 %v4945_v53, %v4776_v58  ;;  %v11919_v15 = vadd.f32 %v4631_v62, %v1002_v46  ;;  %v4970_v53 = vpop.permute.xlu1 %4969  ;;  %v1008_v19 = vadd.f32 %v14700_v6, %v14675_v31 }
 0x3d8   : > { %v4779_v35 = vmax.f32 %v11917_v55, 0.0 }
 0x3d9   : > { %v4778_v13 = vmax.f32 %v11919_v15, 0.0  ;;  %v11296_v63 = vpop.f32.mrb[34].mxu0  ;;  %11359 = vmatprep.mubr.msk.f32.mxu1 %vm532_vm1, %v14918_v50 }
 0x3da   : > { %v11921_v21 = vadd.f32 %v11296_v63, %v1005_v44  ;;  %v4641_v23 = vpop.f32.mrb[35].mxu0  ;;  %11360 = vmatmul.mubr.msk.f32.gmra.mrb[56].mxu1 %vm532_vm1, %v14922_v56  ;;  %v14934_v49 = vmul.f32 %v4960_v9, %v4779_v35  ;;  %v4975_v9 = vpop.permute.xlu0 %4974 }
 0x3db   : > { %v14930_v8 = vmul.f32 %v4955_v16, %v4778_v13  ;;  %v11923_v27 = vadd.f32 %v4641_v23, %v1004_v38  ;;  %v4980_v38 = vpop.permute.xlu1 %4979 }
 0x3dc   : > { %v4781_v46 = vmax.f32 %v11921_v21, 0.0 }
 0x3dd   : > { %v4780_v52 = vmax.f32 %v11923_v27, 0.0  ;;  %v11299_v58 = vpop.f32.mrb[36].mxu0  ;;  %11362 = vmatprep.mubr.msk.f32.mxu1 %vm532_vm1, %v14930_v8 }
 0x3de   : > { %v11925_v60 = vadd.f32 %v11299_v58, %v1007_v22  ;;  %v4651_v55 = vpop.f32.mrb[37].mxu0  ;;  %11363 = vmatmul.mubr.msk.f32.gmra.mrb[58].mxu1 %vm532_vm1, %v14934_v49  ;;  %v14946_v62 = vmul.f32 %v4970_v53, %v4781_v46  ;;  %v1010_v22 = vadd.f32 %v14700_v6, %v14679_v47  ;;  %v4985_v46 = vpop.permute.xlu0 %4984 }
 0x3df   : > { %v14942_v16 = vmul.f32 %v4965_v45, %v4780_v52  ;;  %v11927_v44 = vadd.f32 %v4651_v55, %v1006_v41  ;;  %v1011_v45 = vadd.f32 %v14677_v11, %v14700_v6  ;;  %v1013_v11 = vadd.f32 %v14681_v24, %v14700_v6 }
 0x3e0   : > { %v4783_v15 = vmax.f32 %v11925_v60, 0.0  ;;  %v4990_v60 = vpop.permute.xlu1 %4989  ;;  %v1012_v55 = vadd.f32 %v14700_v6, %v14683_v1  ;;  %v1015_v24 = vadd.f32 %v14685_v20, %v14700_v6  ;;  %v14999_v20 = vld [vmem:[%s16325_s5 + $0xc] sm:$0xf] }
 0x3e1   : > { %v4782_v35 = vmax.f32 %v11927_v44, 0.0  ;;  %v11302_v13 = vpop.f32.mrb[38].mxu0  ;;  %11365 = vmatprep.mubr.msk.f32.mxu1 %vm532_vm1, %v14942_v16 }
 0x3e2   : > { %v11929_v4 = vadd.f32 %v11302_v13, %v1009_v2  ;;  %v4661_v63 = vpop.f32.mrb[39].mxu0  ;;  %11366 = vmatmul.mubr.msk.f32.gmra.mrb[60].mxu1 %vm532_vm1, %v14946_v62  ;;  %v14958_v23 = vmul.f32 %v4980_v38, %v4783_v15  ;;  %v1014_v13 = vadd.f32 %v14700_v6, %v14687_v48  ;;  %v5512_v48 = vrot.slane %v14756_v59, 1 }
 0x3e3   : > { %v14954_v21 = vmul.f32 %v4975_v9, %v4782_v35  ;;  %v11931_v31 = vadd.f32 %v4661_v63, %v1008_v19  ;;  %v5506_v9 = vrot.slane %v14727_v36, 1  ;;  %v5508_v35 = vrot.slane %v14742_v34, 1 }
 0x3e4   : > { %v4785_v53 = vmax.f32 %v11929_v4, 0.0  ;;  %v16626_v63 = vrot.slane %v14708_v12, 1 }
 0x3e5   : > { %v4784_v27 = vmax.f32 %v11931_v31, 0.0  ;;  %v11305_v41 = vpop.f32.mrb[40].mxu0  ;;  %11368 = vmatprep.mubr.msk.f32.mxu1 %vm532_vm1, %v14954_v21  ;;  %v5510_v31 = vrot.slane %v14751_v18, 1 }
 0x3e6   : > { %v14962_v52 = vadd.f32 %v11305_v41, %v1011_v45  ;;  %v4671_v58 = vpop.f32.mrb[41].mxu0  ;;  %11369 = vmatmul.mubr.msk.f32.gmra.mrb[62].mxu1 %vm532_vm1, %v14958_v23  ;;  %v14974_v44 = vmul.f32 %v4990_v60, %v4785_v53  ;;  %v5507_v45 = vsel %vm1016_vm3, %v16626_v63, %v5506_v9  ;;  %v5514_v41 = vrot.slane %v14765_v57, 1  ;;  %v16628_v63 = vld [vmem:[#allocation3_spill] sm:$0xff] }
 0x3e7   : > { %v14968_v47 = vmul.f32 %v4985_v46, %v4784_v27  ;;  %v14970_v2 = vadd.f32 %v4671_v58, %v1010_v22  ;;  %v5511_v27 = vsel %vm1016_vm3, %v5508_v35, %v5510_v31  ;;  %v5513_v46 = vsel %vm1016_vm3, %v5510_v31, %v5512_v48 }
 0x3e8   : > { %v5516_v58 = vrot.slane %v14768_v42, 1 }
 0x3e9   : > { %v11308_v19 = vpop.f32.mrb[42].mxu0  ;;  %11371 = vmatprep.mubr.msk.f32.mxu1 %vm532_vm1, %v14968_v47 }
 0x3ea   : > { %v14979_v15 = vadd.f32 %v11308_v19, %v1013_v11  ;;  %v4681_v38 = vpop.f32.mrb[43].mxu0  ;;  %11372 = vmatmul.mubr.msk.f32.gmra.mrb[64].mxu1 %vm532_vm1, %v14974_v44  ;;  %v15020_v11 = vsel %vm1016_vm3, %v5512_v48, %v5514_v41  ;;  %v15026_v60 = vsel %vm1016_vm3, %v5514_v41, %v5516_v58  ;;  %v16630_v48 = vld [vmem:[#allocation4_spill] sm:$0xff] }
 0x3eb   : > { %v14986_v1 = vadd.f32 %v4681_v38, %v1012_v55  ;;  %11376 = vmatprep.mubr.msk.f32.mxu1 %vm532_vm1, %v14735_v43  ;;  %v5509_v43 = vsel %vm1016_vm3, %v5506_v9, %v5508_v35  ;;  %v5520_v55 = vrot.slane %v14784_v25, 1  ;;  %v5522_v9 = vrot.slane %v14792_v28, 1 }
 0x3ed   : > { %v11311_v4 = vpop.f32.mrb[44].mxu0  ;;  %v15044_v35 = vsel %vm1016_vm3, %v5520_v55, %v5522_v9 }
 0x3ee   : > { %v15001_v22 = vadd.f32 %v11311_v4, %v1015_v24  ;;  %v4691_v53 = vpop.f32.mrb[45].mxu0  ;;  %11377 = vmatmul.mubr.msk.f32.vlgmr.msra.gmra.mrb[26].mxu1 %vm532_vm1, %v5507_v45  ;;  %v5524_v24 = vrot.slane %v14796_v40, 1  ;;  %v5528_v45 = vrot.slane %v16628_v63, 1 }
 0x3ef   : > { %v15006_v6 = vadd.f32 %v4691_v53, %v1014_v13  ;;  %11437 = vmatpush3.msk.msra.mxu1 %vm671_vm0, %v14718_v61  ;;  %11379 = vmatprep.mubr.msk.f32.mxu1 %vm532_vm1, %v5509_v43  ;;  %v5518_v61 = vrot.slane %v14780_v51, 1  ;;  %v5526_v13 = vrot.slane %v14804_v30, 1  ;;  %v5530_v53 = vrot.slane %v14816_v17, 1 }
 0x3f0   : > { %16627 = vst [vmem:[#allocation6_spill] sm:$0xff] %v15001_v22  ;;  %11498 = vmatprep.subr.msk.mxu1 %vm671_vm0, %v14999_v20  ;;  %v15050_v4 = vsel %vm1016_vm3, %v5522_v9, %v5524_v24  ;;  %v5542_v22 = vrot.slane %v14858_v37, 1 }
 0x3f1   : > { %v15032_v19 = vsel %vm1016_vm3, %v5516_v58, %v5518_v61  ;;  %v15038_v38 = vsel %vm1016_vm3, %v5518_v61, %v5520_v55  ;;  %v15056_v31 = vsel %vm1016_vm3, %v5524_v24, %v5526_v13  ;;  %v15062_v43 = vsel %vm1016_vm3, %v5526_v13, %v5528_v45  ;;  %v16633_v61 = vld [vmem:[#allocation5_spill] sm:$0xff] }
 0x3f2   : > { %11380 = vmatmul.mubr.msk.f32.gmra.mrb[28].mxu1 %vm532_vm1, %v5511_v27  ;;  %16629 = vst [vmem:[#allocation7_spill] sm:$0xff] %v15062_v43  ;;  %v5532_v27 = vrot.slane %v16630_v48, 1  ;;  %v15068_v41 = vsel %vm1016_vm3, %v5528_v45, %v5530_v53  ;;  %v5536_v55 = vrot.slane %v16633_v61, 1  ;;  %v5538_v24 = vrot.slane %v14845_v5, 1 }
 0x3f3   : > { %11382 = vmatprep.mubr.msk.f32.mxu1 %vm532_vm1, %v5513_v46  ;;  %16631 = vst [vmem:[#allocation8_spill] sm:$0xff] %v15068_v41  ;;  %v5534_v46 = vrot.slane %v14830_v32, 1  ;;  %v5540_v45 = vrot.slane %v14850_v10, 1 }
 0x3f4   : > { %v15074_v58 = vsel %vm1016_vm3, %v5530_v53, %v5532_v27  ;;  %v15092_v53 = vsel %vm1016_vm3, %v5536_v55, %v5538_v24 }
 0x3f5   : > { %16632 = vst [vmem:[#allocation9_spill] sm:$0xff] %v15074_v58  ;;  %v15080_v9 = vsel %vm1016_vm3, %v5532_v27, %v5534_v46  ;;  %v15086_v13 = vsel %vm1016_vm3, %v5534_v46, %v5536_v55  ;;  %16636 = vst [vmem:[#allocation12_spill] sm:$0xff] %v15092_v53  ;;  %v15098_v27 = vsel %vm1016_vm3, %v5538_v24, %v5540_v45 }
 0x3f6   : > { %11383 = vmatmul.mubr.msk.f32.gmra.mrb[30].mxu1 %vm532_vm1, %v15020_v11  ;;  %16634 = vst [vmem:[#allocation10_spill] sm:$0xff] %v15080_v9  ;;  %16635 = vst [vmem:[#allocation11_spill] sm:$0xff] %v15086_v13  ;;  %v15104_v46 = vsel %vm1016_vm3, %v5540_v45, %v5542_v22 }
 0x3f7   : > { %11385 = vmatprep.mubr.msk.f32.mxu1 %vm532_vm1, %v15026_v60  ;;  %16637 = vst [vmem:[#allocation13_spill] sm:$0xff] %v15098_v27  ;;  %16638 = vst [vmem:[#allocation14_spill] sm:$0xff] %v15104_v46 }
 0x3fa   : > { %11386 = vmatmul.mubr.msk.f32.gmra.mrb[32].mxu1 %vm532_vm1, %v15032_v19 }
 0x3fb   : > { %11388 = vmatprep.mubr.msk.f32.mxu1 %vm532_vm1, %v15038_v38 }
 0x3fe   : > { %11389 = vmatmul.mubr.msk.f32.gmra.mrb[34].mxu1 %vm532_vm1, %v15044_v35 }
 0x3ff   : > { %11391 = vmatprep.mubr.msk.f32.mxu1 %vm532_vm1, %v15050_v4 }
 0x402   : > { %11392 = vmatmul.mubr.msk.f32.gmra.mrb[36].mxu1 %vm532_vm1, %v15056_v31 }
 0x403   : > { %11394 = vmatprep.mubr.msk.f32.mxu1 %vm532_vm1, %v15062_v43 }
 0x406   : > { %11395 = vmatmul.mubr.msk.f32.gmra.mrb[38].mxu1 %vm532_vm1, %v15068_v41 }
 0x407   : > { %11397 = vmatprep.mubr.msk.f32.mxu1 %vm532_vm1, %v15074_v58  ;;  %v4995_v58 = vpop.permute.xlu0 %4994 }
 0x40a   : > { %11398 = vmatmul.mubr.msk.f32.gmra.mrb[40].mxu1 %vm532_vm1, %v15080_v9  ;;  %v5544_v9 = vrot.slane %v14862_v14, 1 }
 0x40b   : > { %11400 = vmatprep.mubr.msk.f32.mxu1 %vm532_vm1, %v15086_v13  ;;  %v5546_v13 = vrot.slane %v14870_v3, 1 }
 0x40c   : > { %v15110_v55 = vsel %vm1016_vm3, %v5542_v22, %v5544_v9 }
 0x40d   : > { %16639 = vst [vmem:[#allocation15_spill] sm:$0xff] %v15110_v55  ;;  %v15116_v24 = vsel %vm1016_vm3, %v5544_v9, %v5546_v13 }
 0x40e   : > { %11401 = vmatmul.mubr.msk.f32.gmra.mrb[42].mxu1 %vm532_vm1, %v15092_v53  ;;  %v5548_v53 = vrot.slane %v14874_v26, 1  ;;  %16640 = vst [vmem:[#allocation16_spill] sm:$0xff] %v15116_v24 }
 0x40f   : > { %11403 = vmatprep.mubr.msk.f32.mxu1 %vm532_vm1, %v15098_v27  ;;  %v5550_v27 = vrot.slane %v14882_v39, 1 }
 0x410   : > { %v15122_v45 = vsel %vm1016_vm3, %v5546_v13, %v5548_v53 }
 0x411   : > { %16641 = vst [vmem:[#allocation17_spill] sm:$0xff] %v15122_v45  ;;  %v15128_v22 = vsel %vm1016_vm3, %v5548_v53, %v5550_v27 }
 0x412   : > { %11404 = vmatmul.mubr.msk.f32.gmra.mrb[44].mxu1 %vm532_vm1, %v15104_v46  ;;  %v5552_v46 = vrot.slane %v14886_v7, 1  ;;  %16642 = vst [vmem:[#allocation18_spill] sm:$0xff] %v15128_v22 }
 0x413   : > { %11406 = vmatprep.mubr.msk.f32.mxu1 %vm532_vm1, %v15110_v55  ;;  %v5554_v55 = vrot.slane %v14894_v54, 1 }
 0x414   : > { %v15134_v9 = vsel %vm1016_vm3, %v5550_v27, %v5552_v46 }
 0x415   : > { %16643 = vst [vmem:[#allocation19_spill] sm:$0xff] %v15134_v9  ;;  %v15140_v13 = vsel %vm1016_vm3, %v5552_v46, %v5554_v55 }
 0x416   : > { %11407 = vmatmul.mubr.msk.f32.gmra.mrb[46].mxu1 %vm532_vm1, %v15116_v24  ;;  %v5556_v24 = vrot.slane %v14898_v33, 1  ;;  %16644 = vst [vmem:[#allocation20_spill] sm:$0xff] %v15140_v13 }
 0x417   : > { %11409 = vmatprep.mubr.msk.f32.mxu1 %vm532_vm1, %v15122_v45  ;;  %v5558_v45 = vrot.slane %v14906_v0, 1 }
 0x418   : > { %v15146_v53 = vsel %vm1016_vm3, %v5554_v55, %v5556_v24 }
 0x419   : > { %16645 = vst [vmem:[#allocation21_spill] sm:$0xff] %v15146_v53  ;;  %v15152_v27 = vsel %vm1016_vm3, %v5556_v24, %v5558_v45 }
 0x41a   : > { %11410 = vmatmul.mubr.msk.f32.gmra.mrb[48].mxu1 %vm532_vm1, %v15128_v22  ;;  %v5560_v22 = vrot.slane %v14910_v29, 1  ;;  %16646 = vst [vmem:[#allocation22_spill] sm:$0xff] %v15152_v27 }
 0x41b   : > { %11412 = vmatprep.mubr.msk.f32.mxu1 %vm532_vm1, %v15134_v9  ;;  %v5562_v9 = vrot.slane %v14918_v50, 1 }
 0x41c   : > { %v15158_v46 = vsel %vm1016_vm3, %v5558_v45, %v5560_v22 }
 0x41d   : > { %16647 = vst [vmem:[#allocation23_spill] sm:$0xff] %v15158_v46  ;;  %v15164_v55 = vsel %vm1016_vm3, %v5560_v22, %v5562_v9 }
 0x41e   : > { %11413 = vmatmul.mubr.msk.f32.gmra.mrb[50].mxu1 %vm532_vm1, %v15140_v13  ;;  %v5564_v13 = vrot.slane %v14922_v56, 1  ;;  %16648 = vst [vmem:[#allocation24_spill] sm:$0xff] %v15164_v55 }
 0x41f   : > { %11415 = vmatprep.mubr.msk.f32.mxu1 %vm532_vm1, %v15146_v53  ;;  %v5566_v53 = vrot.slane %v14930_v8, 1 }
 0x420   : > { %v15170_v24 = vsel %vm1016_vm3, %v5562_v9, %v5564_v13  ;;  %v4786_v9 = vmax.f32 %v14970_v2, 0.0 }
 0x421   : > { %16649 = vst [vmem:[#allocation25_spill] sm:$0xff] %v15170_v24  ;;  %v15176_v45 = vsel %vm1016_vm3, %v5564_v13, %v5566_v53  ;;  %v5574_v13 = vrot.slane %v14954_v21, 1 }
 0x422   : > { %11416 = vmatmul.mubr.msk.f32.gmra.mrb[52].mxu1 %vm532_vm1, %v15152_v27  ;;  %v5568_v27 = vrot.slane %v14934_v49, 1  ;;  %16650 = vst [vmem:[#allocation26_spill] sm:$0xff] %v15176_v45 }
 0x423   : > { %11418 = vmatprep.mubr.msk.f32.mxu1 %vm532_vm1, %v15158_v46  ;;  %v5570_v46 = vrot.slane %v14942_v16, 1 }
 0x424   : > { %v15182_v22 = vsel %vm1016_vm3, %v5566_v53, %v5568_v27  ;;  %v5576_v53 = vrot.slane %v14958_v23, 1 }
 0x425   : > { %16651 = vst [vmem:[#allocation27_spill] sm:$0xff] %v15182_v22 }
 0x426   : > { %11419 = vmatmul.mubr.msk.f32.gmra.mrb[54].mxu1 %vm532_vm1, %v15164_v55  ;;  %v5572_v55 = vrot.slane %v14946_v62, 1 }
 0x427   : > { %11421 = vmatprep.mubr.msk.f32.mxu1 %vm532_vm1, %v15170_v24  ;;  %v15189_v24 = vsel %vm1016_vm3, %v5568_v27, %v5570_v46  ;;  %v5578_v27 = vrot.slane %v14968_v47, 1 }
 0x428   : > { %16652 = vst [vmem:[#allocation28_spill] sm:$0xff] %v15189_v24  ;;  %v15203_v2 = vsel %vm1016_vm3, %v5572_v55, %v5574_v13 }
 0x429   : > { %16654 = vst [vmem:[#allocation30_spill] sm:$0xff] %v15203_v2 }
 0x42a   : > { %11422 = vmatmul.mubr.msk.f32.gmra.mrb[56].mxu1 %vm532_vm1, %v15176_v45  ;;  %v15195_v45 = vsel %vm1016_vm3, %v5570_v46, %v5572_v55  ;;  %v5580_v46 = vrot.slane %v14974_v44, 1 }
 0x42b   : > { %11424 = vmatprep.mubr.msk.f32.mxu1 %vm532_vm1, %v15182_v22  ;;  %16653 = vst [vmem:[#allocation29_spill] sm:$0xff] %v15195_v45  ;;  %v15200_v22 = vmul.f32 %v4995_v58, %v4786_v9 }
 0x42c   : > { %v15221_v55 = vsel %vm1016_vm3, %v5578_v27, %v5580_v46 }
 0x42d   : > { %v16434_v58 = vrot.slane %v15200_v22, 1  ;;  %16657 = vst [vmem:[#allocation33_spill] sm:$0xff] %v15221_v55 }
 0x42e   : > { %11425 = vmatmul.mubr.msk.f32.gmra.mrb[58].mxu1 %vm532_vm1, %v15189_v24  ;;  %v15209_v24 = vsel %vm1016_vm3, %v5574_v13, %v5576_v53  ;;  %v5975_v13 = vrot.slane %v14727_v36, 2 }
 0x42f   : > { %11427 = vmatprep.mubr.msk.f32.mxu1 %vm532_vm1, %v15195_v45  ;;  %16655 = vst [vmem:[#allocation31_spill] sm:$0xff] %v15209_v24  ;;  %v15215_v45 = vsel %vm1016_vm3, %v5576_v53, %v5578_v27  ;;  %v15228_v9 = vsel %vm1016_vm3, %v5580_v46, %v16434_v58  ;;  %v5977_v53 = vrot.slane %v14742_v34, 2  ;;  %v16660_v27 = vrot.slane %v14708_v12, 2  ;;  %v15243_v46 = vld [vmem:[%s16325_s5 + $0x10] sm:$0xf] }
 0x430   : > { %16656 = vst [vmem:[#allocation32_spill] sm:$0xff] %v15215_v45  ;;  %16658 = vst [vmem:[#allocation34_spill] sm:$0xff] %v15228_v9 }
 0x431   : > { %v5978_v58 = vsel %vm1544_vm2, %v5975_v13, %v5977_v53 }
 0x432   : > { %11428 = vmatmul.mubr.msk.f32.gmra.mrb[60].mxu1 %vm532_vm1, %v15203_v2  ;;  %v4787_v2 = vmax.f32 %v14962_v52, 0.0 }
 0x433   : > { %11430 = vmatprep.mubr.msk.f32.mxu1 %vm532_vm1, %v15209_v24  ;;  %v16659_v24 = vld [vmem:[#allocation2_spill] sm:$0xff] }
 0x436   : > { %11431 = vmatmul.mubr.msk.f32.gmra.mrb[62].mxu1 %vm532_vm1, %v15215_v45  ;;  %v5976_v45 = vsel %vm1544_vm2, %v16660_v27, %v5975_v13  ;;  %v5985_v13 = vrot.slane %v14768_v42, 2 }
 0x437   : > { %11433 = vmatprep.mubr.msk.f32.mxu1 %vm532_vm1, %v15221_v55  ;;  %v5979_v55 = vrot.slane %v14751_v18, 2 }
 0x439   : > { %v5980_v12 = vsel %vm1544_vm2, %v5977_v53, %v5979_v55  ;;  %v5989_v53 = vrot.slane %v14784_v25, 2 }
 0x43a   : > { %11434 = vmatmul.mubr.msk.f32.gmra.mrb[64].mxu1 %vm532_vm1, %v15228_v9  ;;  %v5981_v9 = vrot.slane %v14756_v59, 2 }
 0x43b   : > { %11438 = vmatprep.mubr.msk.f32.mxu1 %vm532_vm1, %v16659_v24  ;;  %v5983_v24 = vrot.slane %v14765_v57, 2 }
 0x43d   : > { %v15260_v27 = vsel %vm1544_vm2, %v5981_v9, %v5983_v24 }
 0x43e   : > { %11439 = vmatmul.mubr.msk.f32.vlgmr.msra.gmra.mrb[26].mxu1 %vm532_vm1, %v5976_v45  ;;  %v5982_v45 = vsel %vm1544_vm2, %v5979_v55, %v5981_v9  ;;  %16661 = vst [vmem:[#allocation35_spill] sm:$0xff] %v15260_v27 }
 0x43f   : > { %11499 = vmatpush3.msk.msra.mxu1 %vm671_vm0, %v14999_v20  ;;  %11441 = vmatprep.mubr.msk.f32.mxu1 %vm532_vm1, %v5978_v58  ;;  %v5987_v20 = vrot.slane %v14780_v51, 2  ;;  %v15266_v58 = vsel %vm1544_vm2, %v5983_v24, %v5985_v13 }
 0x440   : > { %11560 = vmatprep.subr.msk.mxu1 %vm671_vm0, %v15243_v46  ;;  %16662 = vst [vmem:[#allocation36_spill] sm:$0xff] %v15266_v58 }
 0x441   : > { %v15272_v55 = vsel %vm1544_vm2, %v5985_v13, %v5987_v20  ;;  %v15278_v9 = vsel %vm1544_vm2, %v5987_v20, %v5989_v53 }
 0x442   : > { %11442 = vmatmul.mubr.msk.f32.gmra.mrb[28].mxu1 %vm532_vm1, %v5980_v12  ;;  %16663 = vst [vmem:[#allocation37_spill] sm:$0xff] %v15272_v55  ;;  %v5991_v12 = vrot.slane %v14792_v28, 2  ;;  %16664 = vst [vmem:[#allocation38_spill] sm:$0xff] %v15278_v9 }
 0x443   : > { %11444 = vmatprep.mubr.msk.f32.mxu1 %vm532_vm1, %v5982_v45  ;;  %v5993_v45 = vrot.slane %v14796_v40, 2 }
 0x444   : > { %v15284_v24 = vsel %vm1544_vm2, %v5989_v53, %v5991_v12 }
 0x445   : > { %16665 = vst [vmem:[#allocation39_spill] sm:$0xff] %v15284_v24  ;;  %v15290_v13 = vsel %vm1544_vm2, %v5991_v12, %v5993_v45 }
 0x446   : > { %11445 = vmatmul.mubr.msk.f32.gmra.mrb[30].mxu1 %vm532_vm1, %v15260_v27  ;;  %16666 = vst [vmem:[#allocation40_spill] sm:$0xff] %v15290_v13 }
 0x447   : > { %11447 = vmatprep.mubr.msk.f32.mxu1 %vm532_vm1, %v15266_v58  ;;  %v5995_v58 = vrot.slane %v14804_v30, 2 }
 0x449   : > { %v15296_v20 = vsel %vm1544_vm2, %v5993_v45, %v5995_v58 }
 0x44a   : > { %11448 = vmatmul.mubr.msk.f32.gmra.mrb[32].mxu1 %vm532_vm1, %v15272_v55  ;;  %v5997_v55 = vrot.slane %v16628_v63, 2  ;;  %16667 = vst [vmem:[#allocation41_spill] sm:$0xff] %v15296_v20 }
 0x44b   : > { %11450 = vmatprep.mubr.msk.f32.mxu1 %vm532_vm1, %v15278_v9  ;;  %v5999_v9 = vrot.slane %v14816_v17, 2 }
 0x44c   : > { %v15302_v53 = vsel %vm1544_vm2, %v5995_v58, %v5997_v55 }
 0x44d   : > { %16668 = vst [vmem:[#allocation42_spill] sm:$0xff] %v15302_v53  ;;  %v15308_v12 = vsel %vm1544_vm2, %v5997_v55, %v5999_v9 }
 0x44e   : > { %11451 = vmatmul.mubr.msk.f32.gmra.mrb[34].mxu1 %vm532_vm1, %v15284_v24  ;;  %v6001_v24 = vrot.slane %v16630_v48, 2  ;;  %16669 = vst [vmem:[#allocation43_spill] sm:$0xff] %v15308_v12 }
 0x44f   : > { %11453 = vmatprep.mubr.msk.f32.mxu1 %vm532_vm1, %v15290_v13  ;;  %v6003_v13 = vrot.slane %v14830_v32, 2 }
 0x450   : > { %v15314_v45 = vsel %vm1544_vm2, %v5999_v9, %v6001_v24 }
 0x451   : > { %16670 = vst [vmem:[#allocation44_spill] sm:$0xff] %v15314_v45  ;;  %v15320_v58 = vsel %vm1544_vm2, %v6001_v24, %v6003_v13 }
 0x452   : > { %11454 = vmatmul.mubr.msk.f32.gmra.mrb[36].mxu1 %vm532_vm1, %v15296_v20  ;;  %v6005_v20 = vrot.slane %v16633_v61, 2  ;;  %16671 = vst [vmem:[#allocation45_spill] sm:$0xff] %v15320_v58 }
 0x453   : > { %11456 = vmatprep.mubr.msk.f32.mxu1 %vm532_vm1, %v15302_v53  ;;  %v6007_v53 = vrot.slane %v14845_v5, 2 }
 0x454   : > { %v15326_v55 = vsel %vm1544_vm2, %v6003_v13, %v6005_v20 }
 0x455   : > { %16672 = vst [vmem:[#allocation46_spill] sm:$0xff] %v15326_v55  ;;  %v15332_v9 = vsel %vm1544_vm2, %v6005_v20, %v6007_v53 }
 0x456   : > { %11457 = vmatmul.mubr.msk.f32.gmra.mrb[38].mxu1 %vm532_vm1, %v15308_v12  ;;  %v6009_v12 = vrot.slane %v14850_v10, 2  ;;  %16673 = vst [vmem:[#allocation47_spill] sm:$0xff] %v15332_v9 }
 0x457   : > { %11459 = vmatprep.mubr.msk.f32.mxu1 %vm532_vm1, %v15314_v45  ;;  %v6011_v45 = vrot.slane %v14858_v37, 2 }
 0x458   : > { %v15338_v24 = vsel %vm1544_vm2, %v6007_v53, %v6009_v12 }
 0x459   : > { %16674 = vst [vmem:[#allocation48_spill] sm:$0xff] %v15338_v24  ;;  %v15344_v13 = vsel %vm1544_vm2, %v6009_v12, %v6011_v45 }
 0x45a   : > { %11460 = vmatmul.mubr.msk.f32.gmra.mrb[40].mxu1 %vm532_vm1, %v15320_v58  ;;  %v6013_v58 = vrot.slane %v14862_v14, 2  ;;  %16675 = vst [vmem:[#allocation49_spill] sm:$0xff] %v15344_v13 }
 0x45b   : > { %11462 = vmatprep.mubr.msk.f32.mxu1 %vm532_vm1, %v15326_v55  ;;  %v6015_v55 = vrot.slane %v14870_v3, 2 }
 0x45c   : > { %v15350_v20 = vsel %vm1544_vm2, %v6011_v45, %v6013_v58 }
 0x45d   : > { %16676 = vst [vmem:[#allocation50_spill] sm:$0xff] %v15350_v20  ;;  %v15356_v53 = vsel %vm1544_vm2, %v6013_v58, %v6015_v55 }
 0x45e   : > { %11463 = vmatmul.mubr.msk.f32.gmra.mrb[42].mxu1 %vm532_vm1, %v15332_v9  ;;  %v6017_v9 = vrot.slane %v14874_v26, 2  ;;  %16677 = vst [vmem:[#allocation51_spill] sm:$0xff] %v15356_v53 }
 0x45f   : > { %11465 = vmatprep.mubr.msk.f32.mxu1 %vm532_vm1, %v15338_v24  ;;  %v6019_v24 = vrot.slane %v14882_v39, 2 }
 0x460   : > { %v15362_v12 = vsel %vm1544_vm2, %v6015_v55, %v6017_v9 }
 0x461   : > { %16678 = vst [vmem:[#allocation52_spill] sm:$0xff] %v15362_v12  ;;  %v15368_v45 = vsel %vm1544_vm2, %v6017_v9, %v6019_v24 }
 0x462   : > { %11466 = vmatmul.mubr.msk.f32.gmra.mrb[44].mxu1 %vm532_vm1, %v15344_v13  ;;  %v6021_v13 = vrot.slane %v14886_v7, 2  ;;  %16679 = vst [vmem:[#allocation53_spill] sm:$0xff] %v15368_v45 }
 0x463   : > { %11468 = vmatprep.mubr.msk.f32.mxu1 %vm532_vm1, %v15350_v20  ;;  %v6023_v20 = vrot.slane %v14894_v54, 2 }
 0x464   : > { %v15374_v58 = vsel %vm1544_vm2, %v6019_v24, %v6021_v13 }
 0x465   : > { %16680 = vst [vmem:[#allocation54_spill] sm:$0xff] %v15374_v58  ;;  %v15380_v55 = vsel %vm1544_vm2, %v6021_v13, %v6023_v20 }
 0x466   : > { %11469 = vmatmul.mubr.msk.f32.gmra.mrb[46].mxu1 %vm532_vm1, %v15356_v53  ;;  %v6025_v53 = vrot.slane %v14898_v33, 2  ;;  %16681 = vst [vmem:[#allocation55_spill] sm:$0xff] %v15380_v55 }
 0x467   : > { %11471 = vmatprep.mubr.msk.f32.mxu1 %vm532_vm1, %v15362_v12  ;;  %v6027_v12 = vrot.slane %v14906_v0, 2 }
 0x468   : > { %v15386_v9 = vsel %vm1544_vm2, %v6023_v20, %v6025_v53 }
 0x469   : > { %16682 = vst [vmem:[#allocation56_spill] sm:$0xff] %v15386_v9  ;;  %v15392_v24 = vsel %vm1544_vm2, %v6025_v53, %v6027_v12 }
 0x46a   : > { %11472 = vmatmul.mubr.msk.f32.gmra.mrb[48].mxu1 %vm532_vm1, %v15368_v45  ;;  %v6029_v45 = vrot.slane %v14910_v29, 2  ;;  %16683 = vst [vmem:[#allocation57_spill] sm:$0xff] %v15392_v24 }
 0x46b   : > { %11474 = vmatprep.mubr.msk.f32.mxu1 %vm532_vm1, %v15374_v58  ;;  %v6031_v58 = vrot.slane %v14918_v50, 2 }
 0x46c   : > { %v15398_v13 = vsel %vm1544_vm2, %v6027_v12, %v6029_v45 }
 0x46d   : > { %16684 = vst [vmem:[#allocation58_spill] sm:$0xff] %v15398_v13  ;;  %v15404_v20 = vsel %vm1544_vm2, %v6029_v45, %v6031_v58 }
 0x46e   : > { %11475 = vmatmul.mubr.msk.f32.gmra.mrb[50].mxu1 %vm532_vm1, %v15380_v55  ;;  %v6033_v55 = vrot.slane %v14922_v56, 2  ;;  %16685 = vst [vmem:[#allocation59_spill] sm:$0xff] %v15404_v20 }
 0x46f   : > { %11477 = vmatprep.mubr.msk.f32.mxu1 %vm532_vm1, %v15386_v9  ;;  %v6035_v9 = vrot.slane %v14930_v8, 2 }
 0x470   : > { %v15410_v53 = vsel %vm1544_vm2, %v6031_v58, %v6033_v55 }
 0x471   : > { %16686 = vst [vmem:[#allocation60_spill] sm:$0xff] %v15410_v53  ;;  %v15416_v12 = vsel %vm1544_vm2, %v6033_v55, %v6035_v9 }
 0x472   : > { %11478 = vmatmul.mubr.msk.f32.gmra.mrb[52].mxu1 %vm532_vm1, %v15392_v24  ;;  %v6037_v24 = vrot.slane %v14934_v49, 2  ;;  %16687 = vst [vmem:[#allocation61_spill] sm:$0xff] %v15416_v12 }
 0x473   : > { %11480 = vmatprep.mubr.msk.f32.mxu1 %vm532_vm1, %v15398_v13  ;;  %v6039_v13 = vrot.slane %v14942_v16, 2 }
 0x474   : > { %v15422_v45 = vsel %vm1544_vm2, %v6035_v9, %v6037_v24 }
 0x475   : > { %16688 = vst [vmem:[#allocation62_spill] sm:$0xff] %v15422_v45  ;;  %v15428_v58 = vsel %vm1544_vm2, %v6037_v24, %v6039_v13 }
 0x476   : > { %11481 = vmatmul.mubr.msk.f32.gmra.mrb[54].mxu1 %vm532_vm1, %v15404_v20  ;;  %v6041_v20 = vrot.slane %v14946_v62, 2  ;;  %16689 = vst [vmem:[#allocation63_spill] sm:$0xff] %v15428_v58 }
 0x477   : > { %11483 = vmatprep.mubr.msk.f32.mxu1 %vm532_vm1, %v15410_v53  ;;  %v6043_v53 = vrot.slane %v14954_v21, 2 }
 0x478   : > { %v15434_v55 = vsel %vm1544_vm2, %v6039_v13, %v6041_v20 }
 0x479   : > { %16690 = vst [vmem:[#allocation64_spill] sm:$0xff] %v15434_v55  ;;  %v15440_v9 = vsel %vm1544_vm2, %v6041_v20, %v6043_v53 }
 0x47a   : > { %11484 = vmatmul.mubr.msk.f32.gmra.mrb[56].mxu1 %vm532_vm1, %v15416_v12  ;;  %v6045_v12 = vrot.slane %v14958_v23, 2  ;;  %16691 = vst [vmem:[#allocation65_spill] sm:$0xff] %v15440_v9 }
 0x47b   : > { %11486 = vmatprep.mubr.msk.f32.mxu1 %vm532_vm1, %v15422_v45  ;;  %v6047_v45 = vrot.slane %v14968_v47, 2 }
 0x47c   : > { %v15446_v24 = vsel %vm1544_vm2, %v6043_v53, %v6045_v12  ;;  %v6444_v53 = vrot.slane %v14742_v34, 4 }
 0x47d   : > { %16692 = vst [vmem:[#allocation66_spill] sm:$0xff] %v15446_v24  ;;  %v15452_v13 = vsel %vm1544_vm2, %v6045_v12, %v6047_v45 }
 0x47e   : > { %11487 = vmatmul.mubr.msk.f32.gmra.mrb[58].mxu1 %vm532_vm1, %v15428_v58  ;;  %v6049_v58 = vrot.slane %v14974_v44, 2  ;;  %16693 = vst [vmem:[#allocation67_spill] sm:$0xff] %v15452_v13 }
 0x47f   : > { %11489 = vmatprep.mubr.msk.f32.mxu1 %vm532_vm1, %v15434_v55  ;;  %v16470_v55 = vrot.slane %v15200_v22, 2 }
 0x480   : > { %v15458_v20 = vsel %vm1544_vm2, %v6047_v45, %v6049_v58 }
 0x481   : > { %16694 = vst [vmem:[#allocation68_spill] sm:$0xff] %v15458_v20  ;;  %v15467_v12 = vsel %vm1544_vm2, %v6049_v58, %v16470_v55  ;;  %v15480_v58 = vld [vmem:[%s16325_s5 + $0x14] sm:$0xf] }
 0x482   : > { %11490 = vmatmul.mubr.msk.f32.gmra.mrb[60].mxu1 %vm532_vm1, %v15440_v9  ;;  %v6443_v9 = vrot.slane %v14727_v36, 4  ;;  %16695 = vst [vmem:[#allocation69_spill] sm:$0xff] %v15467_v12 }
 0x483   : > { %11492 = vmatprep.mubr.msk.f32.mxu1 %vm532_vm1, %v15446_v24  ;;  %v6446_v24 = vrot.slane %v14751_v18, 4 }
 0x484   : > { %v6445_v45 = vsel %vm671_vm0, %v6443_v9, %v6444_v53 }
 0x485   : > { %v6447_v27 = vsel %vm671_vm0, %v6444_v53, %v6446_v24  ;;  %v6454_v53 = vrot.slane %v14780_v51, 4 }
 0x486   : > { %11493 = vmatmul.mubr.msk.f32.gmra.mrb[62].mxu1 %vm532_vm1, %v15452_v13  ;;  %v6448_v13 = vrot.slane %v14756_v59, 4 }
 0x487   : > { %11495 = vmatprep.mubr.msk.f32.mxu1 %vm532_vm1, %v15458_v20  ;;  %v6450_v20 = vrot.slane %v14765_v57, 4 }
 0x488   : > { %v6449_v55 = vsel %vm671_vm0, %v6446_v24, %v6448_v13  ;;  %v6456_v24 = vrot.slane %v14784_v25, 4 }
 0x489   : > { %v6451_v9 = vsel %vm671_vm0, %v6448_v13, %v6450_v20  ;;  %v6460_v13 = vrot.slane %v14796_v40, 4 }
 0x48a   : > { %11496 = vmatmul.mubr.msk.f32.gmra.mrb[64].mxu1 %vm532_vm1, %v15467_v12  ;;  %v6452_v12 = vrot.slane %v14768_v42, 4 }
 0x48b   : > { %11500 = vmatprep.mubr.msk.f32.mxu1 %vm532_vm1, %v6445_v45 }
 0x48c   : > { %v6455_v45 = vsel %vm671_vm0, %v6452_v12, %v6454_v53 }
 0x48e   : > { %11501 = vmatmul.mubr.msk.f32.vlgmr.msra.gmra.mrb[26].mxu1 %vm532_vm1, %v6447_v27  ;;  %v6453_v27 = vsel %vm671_vm0, %v6450_v20, %v6452_v12  ;;  %v6462_v20 = vrot.slane %v14804_v30, 4  ;;  %v6464_v12 = vrot.slane %v16628_v63, 4 }
 0x48f   : > { %11561 = vmatpush3.msk.msra.mxu1 %vm671_vm0, %v15243_v46  ;;  %11503 = vmatprep.mubr.msk.f32.mxu1 %vm532_vm1, %v6449_v55  ;;  %v6458_v46 = vrot.slane %v14792_v28, 4  ;;  %v6457_v55 = vsel %vm671_vm0, %v6454_v53, %v6456_v24  ;;  %v6466_v53 = vrot.slane %v14816_v17, 4 }
 0x490   : > { %11622 = vmatprep.subr.msk.mxu1 %vm671_vm0, %v15480_v58 }
 0x492   : > { %11504 = vmatmul.mubr.msk.f32.gmra.mrb[28].mxu1 %vm532_vm1, %v6451_v9  ;;  %v6459_v9 = vsel %vm671_vm0, %v6456_v24, %v6458_v46  ;;  %v6468_v24 = vrot.slane %v16630_v48, 4 }
 0x493   : > { %11506 = vmatprep.mubr.msk.f32.mxu1 %vm532_vm1, %v6453_v27  ;;  %v6461_v27 = vsel %vm671_vm0, %v6458_v46, %v6460_v13  ;;  %v6470_v46 = vrot.slane %v14830_v32, 4 }
 0x496   : > { %11507 = vmatmul.mubr.msk.f32.gmra.mrb[30].mxu1 %vm532_vm1, %v6455_v45  ;;  %v6463_v45 = vsel %vm671_vm0, %v6460_v13, %v6462_v20  ;;  %v6472_v13 = vrot.slane %v16633_v61, 4 }
 0x497   : > { %11509 = vmatprep.mubr.msk.f32.mxu1 %vm532_vm1, %v6457_v55  ;;  %v6465_v55 = vsel %vm671_vm0, %v6462_v20, %v6464_v12  ;;  %v6474_v20 = vrot.slane %v14845_v5, 4 }
 0x49a   : > { %11510 = vmatmul.mubr.msk.f32.gmra.mrb[32].mxu1 %vm532_vm1, %v6459_v9  ;;  %v6467_v9 = vsel %vm671_vm0, %v6464_v12, %v6466_v53  ;;  %v6476_v12 = vrot.slane %v14850_v10, 4 }
 0x49b   : > { %11512 = vmatprep.mubr.msk.f32.mxu1 %vm532_vm1, %v6461_v27  ;;  %v6469_v27 = vsel %vm671_vm0, %v6466_v53, %v6468_v24  ;;  %v6478_v53 = vrot.slane %v14858_v37, 4 }
 0x49e   : > { %11513 = vmatmul.mubr.msk.f32.gmra.mrb[34].mxu1 %vm532_vm1, %v6463_v45  ;;  %v6471_v45 = vsel %vm671_vm0, %v6468_v24, %v6470_v46  ;;  %v6480_v24 = vrot.slane %v14862_v14, 4 }
 0x49f   : > { %11515 = vmatprep.mubr.msk.f32.mxu1 %vm532_vm1, %v6465_v55  ;;  %v6473_v55 = vsel %vm671_vm0, %v6470_v46, %v6472_v13  ;;  %v6482_v46 = vrot.slane %v14870_v3, 4 }
 0x4a2   : > { %11516 = vmatmul.mubr.msk.f32.gmra.mrb[36].mxu1 %vm532_vm1, %v6467_v9  ;;  %v6475_v9 = vsel %vm671_vm0, %v6472_v13, %v6474_v20  ;;  %v6484_v13 = vrot.slane %v14874_v26, 4 }
 0x4a3   : > { %11518 = vmatprep.mubr.msk.f32.mxu1 %vm532_vm1, %v6469_v27  ;;  %v6477_v27 = vsel %vm671_vm0, %v6474_v20, %v6476_v12  ;;  %v6486_v20 = vrot.slane %v14882_v39, 4 }
 0x4a6   : > { %11519 = vmatmul.mubr.msk.f32.gmra.mrb[38].mxu1 %vm532_vm1, %v6471_v45  ;;  %v6479_v45 = vsel %vm671_vm0, %v6476_v12, %v6478_v53  ;;  %v6488_v12 = vrot.slane %v14886_v7, 4 }
 0x4a7   : > { %11521 = vmatprep.mubr.msk.f32.mxu1 %vm532_vm1, %v6473_v55  ;;  %v6481_v55 = vsel %vm671_vm0, %v6478_v53, %v6480_v24  ;;  %v6490_v53 = vrot.slane %v14894_v54, 4 }
 0x4aa   : > { %11522 = vmatmul.mubr.msk.f32.gmra.mrb[40].mxu1 %vm532_vm1, %v6475_v9  ;;  %v6483_v9 = vsel %vm671_vm0, %v6480_v24, %v6482_v46  ;;  %v6492_v24 = vrot.slane %v14898_v33, 4 }
 0x4ab   : > { %11524 = vmatprep.mubr.msk.f32.mxu1 %vm532_vm1, %v6477_v27  ;;  %v6485_v27 = vsel %vm671_vm0, %v6482_v46, %v6484_v13  ;;  %v6494_v46 = vrot.slane %v14906_v0, 4 }
 0x4ae   : > { %11525 = vmatmul.mubr.msk.f32.gmra.mrb[42].mxu1 %vm532_vm1, %v6479_v45  ;;  %v6487_v45 = vsel %vm671_vm0, %v6484_v13, %v6486_v20  ;;  %v6496_v13 = vrot.slane %v14910_v29, 4 }
 0x4af   : > { %11527 = vmatprep.mubr.msk.f32.mxu1 %vm532_vm1, %v6481_v55  ;;  %v6489_v55 = vsel %vm671_vm0, %v6486_v20, %v6488_v12  ;;  %v6498_v20 = vrot.slane %v14918_v50, 4 }
 0x4b2   : > { %11528 = vmatmul.mubr.msk.f32.gmra.mrb[44].mxu1 %vm532_vm1, %v6483_v9  ;;  %v6491_v9 = vsel %vm671_vm0, %v6488_v12, %v6490_v53  ;;  %v6500_v12 = vrot.slane %v14922_v56, 4 }
 0x4b3   : > { %11530 = vmatprep.mubr.msk.f32.mxu1 %vm532_vm1, %v6485_v27  ;;  %v6493_v27 = vsel %vm671_vm0, %v6490_v53, %v6492_v24  ;;  %v6502_v53 = vrot.slane %v14930_v8, 4 }
 0x4b6   : > { %11531 = vmatmul.mubr.msk.f32.gmra.mrb[46].mxu1 %vm532_vm1, %v6487_v45  ;;  %v6495_v45 = vsel %vm671_vm0, %v6492_v24, %v6494_v46  ;;  %v6504_v24 = vrot.slane %v14934_v49, 4 }
 0x4b7   : > { %11533 = vmatprep.mubr.msk.f32.mxu1 %vm532_vm1, %v6489_v55  ;;  %v6497_v55 = vsel %vm671_vm0, %v6494_v46, %v6496_v13  ;;  %v6506_v46 = vrot.slane %v14942_v16, 4 }
 0x4ba   : > { %11534 = vmatmul.mubr.msk.f32.gmra.mrb[48].mxu1 %vm532_vm1, %v6491_v9  ;;  %v6499_v9 = vsel %vm671_vm0, %v6496_v13, %v6498_v20  ;;  %v6508_v13 = vrot.slane %v14946_v62, 4 }
 0x4bb   : > { %11536 = vmatprep.mubr.msk.f32.mxu1 %vm532_vm1, %v6493_v27  ;;  %v6501_v27 = vsel %vm671_vm0, %v6498_v20, %v6500_v12  ;;  %v6510_v20 = vrot.slane %v14954_v21, 4 }
 0x4bd   : > { %v6511_v41 = vsel %vm671_vm0, %v6508_v13, %v6510_v20 }
 0x4be   : > { %11537 = vmatmul.mubr.msk.f32.gmra.mrb[50].mxu1 %vm532_vm1, %v6495_v45  ;;  %v6503_v45 = vsel %vm671_vm0, %v6500_v12, %v6502_v53  ;;  %v6509_v12 = vsel %vm671_vm0, %v6506_v46, %v6508_v13 }
 0x4bf   : > { %11539 = vmatprep.mubr.msk.f32.mxu1 %vm532_vm1, %v6497_v55  ;;  %v6505_v55 = vsel %vm671_vm0, %v6502_v53, %v6504_v24  ;;  %v4788_v53 = vmax.f32 %v14986_v1, 0.0  ;;  %v6518_v1 = vrot.slane %v15200_v22, 4 }
 0x4c2   : > { %11540 = vmatmul.mubr.msk.f32.gmra.mrb[52].mxu1 %vm532_vm1, %v6499_v9  ;;  %v6507_v9 = vsel %vm671_vm0, %v6504_v24, %v6506_v46  ;;  %v5005_v46 = vpop.permute.xlu0 %5004 }
 0x4c3   : > { %11542 = vmatprep.mubr.msk.f32.mxu1 %vm532_vm1, %v6501_v27  ;;  %v6512_v27 = vrot.slane %v14958_v23, 4  ;;  %v15590_v43 = vmul.f32 %v5005_v46, %v4788_v53  ;;  %v6913_v53 = vrot.slane %v14742_v34, 5  ;;  %v6917_v46 = vrot.slane %v14756_v59, 5 }
 0x4c5   : > { %v6513_v52 = vsel %vm671_vm0, %v6510_v20, %v6512_v27  ;;  %v6522_v20 = vrot.slane %v15590_v43, 4 }
 0x4c6   : > { %11543 = vmatmul.mubr.msk.f32.gmra.mrb[54].mxu1 %vm532_vm1, %v6503_v45  ;;  %v5000_v45 = vpop.permute.xlu1 %4999 }
 0x4c7   : > { %11545 = vmatprep.mubr.msk.f32.mxu1 %vm532_vm1, %v6505_v55  ;;  %v6514_v55 = vrot.slane %v14968_v47, 4  ;;  %v15584_v24 = vmul.f32 %v5000_v45, %v4787_v2 }
 0x4c9   : > { %v6520_v13 = vrot.slane %v15584_v24, 4 }
 0x4ca   : > { %11546 = vmatmul.mubr.msk.f32.gmra.mrb[56].mxu1 %vm532_vm1, %v6507_v9  ;;  %v6516_v9 = vrot.slane %v14974_v44, 4 }
 0x4cb   : > { %11548 = vmatprep.mubr.msk.f32.mxu1 %vm532_vm1, %v6509_v12  ;;  %v6515_v12 = vsel %vm671_vm0, %v6512_v27, %v6514_v55  ;;  %v6521_v45 = vsel %vm671_vm0, %v6518_v1, %v6520_v13  ;;  %v6912_v27 = vrot.slane %v14727_v36, 5 }
 0x4cc   : > { %v6517_v2 = vsel %vm671_vm0, %v6514_v55, %v6516_v9  ;;  %v6523_v55 = vsel %vm671_vm0, %v6520_v13, %v6522_v20 }
 0x4ce   : > { %11549 = vmatmul.mubr.msk.f32.gmra.mrb[58].mxu1 %vm532_vm1, %v6511_v41  ;;  %v6519_v41 = vsel %vm671_vm0, %v6516_v9, %v6518_v1  ;;  %v6914_v9 = vsel %vm2601_vm4, %v6912_v27, %v6913_v53  ;;  %v6919_v1 = vrot.slane %v14765_v57, 5 }
 0x4cf   : > { %11551 = vmatprep.mubr.msk.f32.mxu1 %vm532_vm1, %v6513_v52  ;;  %v6915_v52 = vrot.slane %v14751_v18, 5 }
 0x4d0   : > { %v6920_v20 = vsel %vm2601_vm4, %v6917_v46, %v6919_v1 }
 0x4d1   : > { %v6918_v13 = vsel %vm2601_vm4, %v6915_v52, %v6917_v46 }
 0x4d2   : > { %11552 = vmatmul.mubr.msk.f32.gmra.mrb[60].mxu1 %vm532_vm1, %v6515_v12  ;;  %v6916_v12 = vsel %vm2601_vm4, %v6913_v53, %v6915_v52  ;;  %v6925_v53 = vrot.slane %v14784_v25, 5 }
 0x4d3   : > { %11554 = vmatprep.mubr.msk.f32.mxu1 %vm532_vm1, %v6517_v2  ;;  %v15616_v2 = vld [vmem:[%s16325_s5 + $0x18] sm:$0xf] }
 0x4d6   : > { %11555 = vmatmul.mubr.msk.f32.gmra.mrb[62].mxu1 %vm532_vm1, %v6519_v41  ;;  %v6921_v41 = vrot.slane %v14768_v42, 5 }
 0x4d7   : > { %11557 = vmatprep.mubr.msk.f32.mxu1 %vm532_vm1, %v6521_v45  ;;  %v6923_v45 = vrot.slane %v14780_v51, 5 }
 0x4d8   : > { %v6922_v27 = vsel %vm2601_vm4, %v6919_v1, %v6921_v41 }
 0x4d9   : > { %v6926_v52 = vsel %vm2601_vm4, %v6923_v45, %v6925_v53 }
 0x4da   : > { %11558 = vmatmul.mubr.msk.f32.gmra.mrb[64].mxu1 %vm532_vm1, %v6523_v55  ;;  %v6924_v55 = vsel %vm2601_vm4, %v6921_v41, %v6923_v45 }
 0x4db   : > { %11562 = vmatprep.mubr.msk.f32.mxu1 %vm532_vm1, %v6914_v9  ;;  %v6929_v9 = vrot.slane %v14796_v40, 5 }
 0x4de   : > { %11563 = vmatmul.mubr.msk.f32.vlgmr.msra.gmra.mrb[26].mxu1 %vm532_vm1, %v6916_v12  ;;  %v6931_v12 = vrot.slane %v14804_v30, 5 }
 0x4df   : > { %11623 = vmatpush3.msk.msra.mxu1 %vm671_vm0, %v15480_v58  ;;  %11565 = vmatprep.mubr.msk.f32.mxu1 %vm532_vm1, %v6918_v13  ;;  %v6927_v58 = vrot.slane %v14792_v28, 5  ;;  %v6933_v13 = vrot.slane %v16628_v63, 5 }
 0x4e0   : > { %11684 = vmatprep.subr.msk.mxu1 %vm671_vm0, %v15616_v2  ;;  %v6932_v41 = vsel %vm2601_vm4, %v6929_v9, %v6931_v12 }
 0x4e1   : > { %v6928_v46 = vsel %vm2601_vm4, %v6925_v53, %v6927_v58  ;;  %v6930_v1 = vsel %vm2601_vm4, %v6927_v58, %v6929_v9  ;;  %v6934_v45 = vsel %vm2601_vm4, %v6931_v12, %v6933_v13 }
 0x4e2   : > { %11566 = vmatmul.mubr.msk.f32.gmra.mrb[28].mxu1 %vm532_vm1, %v6920_v20  ;;  %v6935_v20 = vrot.slane %v14816_v17, 5 }
 0x4e3   : > { %11568 = vmatprep.mubr.msk.f32.mxu1 %vm532_vm1, %v6922_v27  ;;  %v6937_v27 = vrot.slane %v16630_v48, 5 }
 0x4e4   : > { %v6936_v53 = vsel %vm2601_vm4, %v6933_v13, %v6935_v20 }
 0x4e5   : > { %v6938_v58 = vsel %vm2601_vm4, %v6935_v20, %v6937_v27 }
 0x4e6   : > { %11569 = vmatmul.mubr.msk.f32.gmra.mrb[30].mxu1 %vm532_vm1, %v6924_v55  ;;  %v6939_v55 = vrot.slane %v14830_v32, 5 }
 0x4e7   : > { %11571 = vmatprep.mubr.msk.f32.mxu1 %vm532_vm1, %v6926_v52  ;;  %v6941_v52 = vrot.slane %v16633_v61, 5 }
 0x4e8   : > { %v6940_v9 = vsel %vm2601_vm4, %v6937_v27, %v6939_v55 }
 0x4e9   : > { %v6942_v12 = vsel %vm2601_vm4, %v6939_v55, %v6941_v52 }
 0x4ea   : > { %11572 = vmatmul.mubr.msk.f32.gmra.mrb[32].mxu1 %vm532_vm1, %v6928_v46  ;;  %v6943_v46 = vrot.slane %v14845_v5, 5 }
 0x4eb   : > { %11574 = vmatprep.mubr.msk.f32.mxu1 %vm532_vm1, %v6930_v1  ;;  %v6945_v1 = vrot.slane %v14850_v10, 5 }
 0x4ec   : > { %v6944_v13 = vsel %vm2601_vm4, %v6941_v52, %v6943_v46 }
 0x4ed   : > { %v6946_v20 = vsel %vm2601_vm4, %v6943_v46, %v6945_v1 }
 0x4ee   : > { %11575 = vmatmul.mubr.msk.f32.gmra.mrb[34].mxu1 %vm532_vm1, %v6932_v41  ;;  %v6947_v41 = vrot.slane %v14858_v37, 5 }
 0x4ef   : > { %11577 = vmatprep.mubr.msk.f32.mxu1 %vm532_vm1, %v6934_v45  ;;  %v6949_v45 = vrot.slane %v14862_v14, 5 }
 0x4f0   : > { %v6948_v27 = vsel %vm2601_vm4, %v6945_v1, %v6947_v41 }
 0x4f1   : > { %v6950_v55 = vsel %vm2601_vm4, %v6947_v41, %v6949_v45 }
 0x4f2   : > { %11578 = vmatmul.mubr.msk.f32.gmra.mrb[36].mxu1 %vm532_vm1, %v6936_v53  ;;  %v6951_v53 = vrot.slane %v14870_v3, 5 }
 0x4f3   : > { %11580 = vmatprep.mubr.msk.f32.mxu1 %vm532_vm1, %v6938_v58  ;;  %v6953_v58 = vrot.slane %v14874_v26, 5 }
 0x4f4   : > { %v6952_v52 = vsel %vm2601_vm4, %v6949_v45, %v6951_v53 }
 0x4f5   : > { %v6954_v46 = vsel %vm2601_vm4, %v6951_v53, %v6953_v58 }
 0x4f6   : > { %11581 = vmatmul.mubr.msk.f32.gmra.mrb[38].mxu1 %vm532_vm1, %v6940_v9  ;;  %v6955_v9 = vrot.slane %v14882_v39, 5 }
 0x4f7   : > { %11583 = vmatprep.mubr.msk.f32.mxu1 %vm532_vm1, %v6942_v12  ;;  %v6957_v12 = vrot.slane %v14886_v7, 5 }
 0x4f8   : > { %v6956_v1 = vsel %vm2601_vm4, %v6953_v58, %v6955_v9 }
 0x4f9   : > { %v6958_v41 = vsel %vm2601_vm4, %v6955_v9, %v6957_v12 }
 0x4fa   : > { %11584 = vmatmul.mubr.msk.f32.gmra.mrb[40].mxu1 %vm532_vm1, %v6944_v13  ;;  %v6959_v13 = vrot.slane %v14894_v54, 5 }
 0x4fb   : > { %11586 = vmatprep.mubr.msk.f32.mxu1 %vm532_vm1, %v6946_v20  ;;  %v6961_v20 = vrot.slane %v14898_v33, 5 }
 0x4fc   : > { %v6960_v45 = vsel %vm2601_vm4, %v6957_v12, %v6959_v13 }
 0x4fd   : > { %v6962_v53 = vsel %vm2601_vm4, %v6959_v13, %v6961_v20 }
 0x4fe   : > { %11587 = vmatmul.mubr.msk.f32.gmra.mrb[42].mxu1 %vm532_vm1, %v6948_v27  ;;  %v6963_v27 = vrot.slane %v14906_v0, 5 }
 0x4ff   : > { %11589 = vmatprep.mubr.msk.f32.mxu1 %vm532_vm1, %v6950_v55  ;;  %v6965_v55 = vrot.slane %v14910_v29, 5 }
 0x500   : > { %v6964_v58 = vsel %vm2601_vm4, %v6961_v20, %v6963_v27 }
 0x501   : > { %v6966_v9 = vsel %vm2601_vm4, %v6963_v27, %v6965_v55 }
 0x502   : > { %11590 = vmatmul.mubr.msk.f32.gmra.mrb[44].mxu1 %vm532_vm1, %v6952_v52  ;;  %v6967_v52 = vrot.slane %v14918_v50, 5 }
 0x503   : > { %11592 = vmatprep.mubr.msk.f32.mxu1 %vm532_vm1, %v6954_v46  ;;  %v6969_v46 = vrot.slane %v14922_v56, 5 }
 0x504   : > { %v6968_v12 = vsel %vm2601_vm4, %v6965_v55, %v6967_v52 }
 0x505   : > { %v6970_v13 = vsel %vm2601_vm4, %v6967_v52, %v6969_v46 }
 0x506   : > { %11593 = vmatmul.mubr.msk.f32.gmra.mrb[46].mxu1 %vm532_vm1, %v6956_v1  ;;  %v6971_v1 = vrot.slane %v14930_v8, 5 }
 0x507   : > { %11595 = vmatprep.mubr.msk.f32.mxu1 %vm532_vm1, %v6958_v41  ;;  %v6973_v41 = vrot.slane %v14934_v49, 5 }
 0x508   : > { %v6972_v20 = vsel %vm2601_vm4, %v6969_v46, %v6971_v1 }
 0x509   : > { %v6974_v27 = vsel %vm2601_vm4, %v6971_v1, %v6973_v41 }
 0x50a   : > { %11596 = vmatmul.mubr.msk.f32.gmra.mrb[48].mxu1 %vm532_vm1, %v6960_v45  ;;  %v6975_v45 = vrot.slane %v14942_v16, 5 }
 0x50b   : > { %11598 = vmatprep.mubr.msk.f32.mxu1 %vm532_vm1, %v6962_v53  ;;  %v6977_v53 = vrot.slane %v14946_v62, 5 }
 0x50c   : > { %v6976_v55 = vsel %vm2601_vm4, %v6973_v41, %v6975_v45 }
 0x50d   : > { %v6978_v52 = vsel %vm2601_vm4, %v6975_v45, %v6977_v53 }
 0x50e   : > { %11599 = vmatmul.mubr.msk.f32.gmra.mrb[50].mxu1 %vm532_vm1, %v6964_v58  ;;  %v6979_v58 = vrot.slane %v14954_v21, 5 }
 0x50f   : > { %11601 = vmatprep.mubr.msk.f32.mxu1 %vm532_vm1, %v6966_v9  ;;  %v6981_v9 = vrot.slane %v14958_v23, 5 }
 0x510   : > { %v6980_v46 = vsel %vm2601_vm4, %v6977_v53, %v6979_v58 }
 0x511   : > { %v6982_v1 = vsel %vm2601_vm4, %v6979_v58, %v6981_v9 }
 0x512   : > { %11602 = vmatmul.mubr.msk.f32.gmra.mrb[52].mxu1 %vm532_vm1, %v6968_v12  ;;  %v6983_v12 = vrot.slane %v14968_v47, 5 }
 0x513   : > { %11604 = vmatprep.mubr.msk.f32.mxu1 %vm532_vm1, %v6970_v13  ;;  %v6985_v13 = vrot.slane %v14974_v44, 5 }
 0x514   : > { %v6984_v41 = vsel %vm2601_vm4, %v6981_v9, %v6983_v12  ;;  %v7382_v9 = vrot.slane %v14742_v34, 6  ;;  %v15746_v34 = vld [vmem:[%s16325_s5 + $0x1c] sm:$0xf] }
 0x515   : > { %v6986_v45 = vsel %vm2601_vm4, %v6983_v12, %v6985_v13  ;;  %v7384_v12 = vrot.slane %v14751_v18, 6 }
 0x516   : > { %11605 = vmatmul.mubr.msk.f32.gmra.mrb[54].mxu1 %vm532_vm1, %v6972_v20  ;;  %v6987_v20 = vrot.slane %v15200_v22, 5 }
 0x517   : > { %11607 = vmatprep.mubr.msk.f32.mxu1 %vm532_vm1, %v6974_v27  ;;  %v6989_v27 = vrot.slane %v15584_v24, 5 }
 0x518   : > { %v6988_v53 = vsel %vm2601_vm4, %v6985_v13, %v6987_v20  ;;  %v7386_v13 = vrot.slane %v14756_v59, 6 }
 0x519   : > { %v6990_v58 = vsel %vm2601_vm4, %v6987_v20, %v6989_v27  ;;  %v7390_v20 = vrot.slane %v14768_v42, 6 }
 0x51a   : > { %11608 = vmatmul.mubr.msk.f32.gmra.mrb[56].mxu1 %vm532_vm1, %v6976_v55  ;;  %v6991_v55 = vrot.slane %v15590_v43, 5  ;;  %v7387_v18 = vsel %vm3129_vm5, %v7384_v12, %v7386_v13 }
 0x51b   : > { %11610 = vmatprep.mubr.msk.f32.mxu1 %vm532_vm1, %v6978_v52  ;;  %v7381_v52 = vrot.slane %v14727_v36, 6  ;;  %v7388_v36 = vrot.slane %v14765_v57, 6 }
 0x51e   : > { %11611 = vmatmul.mubr.msk.f32.gmra.mrb[58].mxu1 %vm532_vm1, %v6980_v46  ;;  %v6992_v46 = vsel %vm2601_vm4, %v6989_v27, %v6991_v55  ;;  %v7392_v27 = vrot.slane %v14780_v51, 6  ;;  %v7394_v55 = vrot.slane %v14784_v25, 6 }
 0x51f   : > { %11613 = vmatprep.mubr.msk.f32.mxu1 %vm532_vm1, %v6982_v1  ;;  %v7383_v1 = vsel %vm3129_vm5, %v7381_v52, %v7382_v9 }
 0x520   : > { %v7395_v52 = vsel %vm3129_vm5, %v7392_v27, %v7394_v55 }
 0x522   : > { %11614 = vmatmul.mubr.msk.f32.gmra.mrb[60].mxu1 %vm532_vm1, %v6984_v41  ;;  %v7385_v41 = vsel %vm3129_vm5, %v7382_v9, %v7384_v12  ;;  %v7398_v9 = vrot.slane %v14796_v40, 6  ;;  %v7400_v12 = vrot.slane %v14804_v30, 6 }
 0x523   : > { %11616 = vmatprep.mubr.msk.f32.mxu1 %vm532_vm1, %v6986_v45  ;;  %v7389_v45 = vsel %vm3129_vm5, %v7386_v13, %v7388_v36  ;;  %v7402_v13 = vrot.slane %v16628_v63, 6 }
 0x526   : > { %11617 = vmatmul.mubr.msk.f32.gmra.mrb[62].mxu1 %vm532_vm1, %v6988_v53  ;;  %v7391_v53 = vsel %vm3129_vm5, %v7388_v36, %v7390_v20  ;;  %v7404_v36 = vrot.slane %v14816_v17, 6 }
 0x527   : > { %11619 = vmatprep.mubr.msk.f32.mxu1 %vm532_vm1, %v6990_v58  ;;  %v7393_v58 = vsel %vm3129_vm5, %v7390_v20, %v7392_v27  ;;  %v7406_v20 = vrot.slane %v16630_v48, 6  ;;  %v7408_v27 = vrot.slane %v14830_v32, 6 }
 0x52a   : > { %11620 = vmatmul.mubr.msk.f32.gmra.mrb[64].mxu1 %vm532_vm1, %v6992_v46 }
 0x52b   : > { %11624 = vmatprep.mubr.msk.f32.mxu1 %vm532_vm1, %v7383_v1 }
 0x52e   : > { %11625 = vmatmul.mubr.msk.f32.vlgmr.msra.gmra.mrb[26].mxu1 %vm532_vm1, %v7385_v41  ;;  %v7401_v41 = vsel %vm3129_vm5, %v7398_v9, %v7400_v12 }
 0x52f   : > { %11685 = vmatpush3.msk.msra.mxu1 %vm671_vm0, %v15616_v2  ;;  %11627 = vmatprep.mubr.msk.f32.mxu1 %vm532_vm1, %v7387_v18  ;;  %v7396_v2 = vrot.slane %v14792_v28, 6  ;;  %v7403_v18 = vsel %vm3129_vm5, %v7400_v12, %v7402_v13  ;;  %v7416_v12 = vrot.slane %v14858_v37, 6 }
 0x530   : > { %11746 = vmatprep.subr.msk.mxu1 %vm671_vm0, %v15746_v34 }
 0x531   : > { %v7397_v46 = vsel %vm3129_vm5, %v7394_v55, %v7396_v2  ;;  %v7399_v1 = vsel %vm3129_vm5, %v7396_v2, %v7398_v9  ;;  %v7410_v55 = vrot.slane %v16633_v61, 6  ;;  %v7412_v2 = vrot.slane %v14845_v5, 6 }
 0x532   : > { %11628 = vmatmul.mubr.msk.f32.gmra.mrb[28].mxu1 %vm532_vm1, %v7389_v45  ;;  %v7405_v45 = vsel %vm3129_vm5, %v7402_v13, %v7404_v36  ;;  %v7414_v9 = vrot.slane %v14850_v10, 6  ;;  %v7418_v13 = vrot.slane %v14862_v14, 6 }
 0x533   : > { %11630 = vmatprep.mubr.msk.f32.mxu1 %vm532_vm1, %v7391_v53  ;;  %v7407_v53 = vsel %vm3129_vm5, %v7404_v36, %v7406_v20  ;;  %v7420_v36 = vrot.slane %v14870_v3, 6 }
 0x536   : > { %11631 = vmatmul.mubr.msk.f32.gmra.mrb[30].mxu1 %vm532_vm1, %v7393_v58  ;;  %v7409_v58 = vsel %vm3129_vm5, %v7406_v20, %v7408_v27  ;;  %v7422_v20 = vrot.slane %v14874_v26, 6 }
 0x537   : > { %11633 = vmatprep.mubr.msk.f32.mxu1 %vm532_vm1, %v7395_v52  ;;  %v7411_v52 = vsel %vm3129_vm5, %v7408_v27, %v7410_v55  ;;  %v7424_v27 = vrot.slane %v14882_v39, 6 }
 0x53a   : > { %11634 = vmatmul.mubr.msk.f32.gmra.mrb[32].mxu1 %vm532_vm1, %v7397_v46  ;;  %v7413_v46 = vsel %vm3129_vm5, %v7410_v55, %v7412_v2  ;;  %v7426_v55 = vrot.slane %v14886_v7, 6 }
 0x53b   : > { %11636 = vmatprep.mubr.msk.f32.mxu1 %vm532_vm1, %v7399_v1  ;;  %v7415_v1 = vsel %vm3129_vm5, %v7412_v2, %v7414_v9  ;;  %v7428_v2 = vrot.slane %v14894_v54, 6 }
 0x53e   : > { %11637 = vmatmul.mubr.msk.f32.gmra.mrb[34].mxu1 %vm532_vm1, %v7401_v41  ;;  %v7417_v41 = vsel %vm3129_vm5, %v7414_v9, %v7416_v12  ;;  %v7430_v9 = vrot.slane %v14898_v33, 6 }
 0x53f   : > { %11639 = vmatprep.mubr.msk.f32.mxu1 %vm532_vm1, %v7403_v18  ;;  %v7419_v18 = vsel %vm3129_vm5, %v7416_v12, %v7418_v13  ;;  %v7432_v12 = vrot.slane %v14906_v0, 6 }
 0x542   : > { %11640 = vmatmul.mubr.msk.f32.gmra.mrb[36].mxu1 %vm532_vm1, %v7405_v45  ;;  %v7421_v45 = vsel %vm3129_vm5, %v7418_v13, %v7420_v36  ;;  %v7434_v13 = vrot.slane %v14910_v29, 6 }
 0x543   : > { %11642 = vmatprep.mubr.msk.f32.mxu1 %vm532_vm1, %v7407_v53  ;;  %v7423_v53 = vsel %vm3129_vm5, %v7420_v36, %v7422_v20  ;;  %v7436_v36 = vrot.slane %v14918_v50, 6 }
 0x546   : > { %11643 = vmatmul.mubr.msk.f32.gmra.mrb[38].mxu1 %vm532_vm1, %v7409_v58  ;;  %v7425_v58 = vsel %vm3129_vm5, %v7422_v20, %v7424_v27  ;;  %v7438_v20 = vrot.slane %v14922_v56, 6 }
 0x547   : > { %11645 = vmatprep.mubr.msk.f32.mxu1 %vm532_vm1, %v7411_v52  ;;  %v7427_v52 = vsel %vm3129_vm5, %v7424_v27, %v7426_v55  ;;  %v7440_v27 = vrot.slane %v14930_v8, 6 }
 0x54a   : > { %11646 = vmatmul.mubr.msk.f32.gmra.mrb[40].mxu1 %vm532_vm1, %v7413_v46  ;;  %v7429_v46 = vsel %vm3129_vm5, %v7426_v55, %v7428_v2  ;;  %v7442_v55 = vrot.slane %v14934_v49, 6 }
 0x54b   : > { %11648 = vmatprep.mubr.msk.f32.mxu1 %vm532_vm1, %v7415_v1  ;;  %v7431_v1 = vsel %vm3129_vm5, %v7428_v2, %v7430_v9  ;;  %v7444_v2 = vrot.slane %v14942_v16, 6 }
 0x54e   : > { %11649 = vmatmul.mubr.msk.f32.gmra.mrb[42].mxu1 %vm532_vm1, %v7417_v41  ;;  %v7433_v41 = vsel %vm3129_vm5, %v7430_v9, %v7432_v12  ;;  %v7446_v9 = vrot.slane %v14946_v62, 6 }
 0x54f   : > { %11651 = vmatprep.mubr.msk.f32.mxu1 %vm532_vm1, %v7419_v18  ;;  %v7435_v18 = vsel %vm3129_vm5, %v7432_v12, %v7434_v13  ;;  %v7448_v12 = vrot.slane %v14954_v21, 6 }
 0x552   : > { %11652 = vmatmul.mubr.msk.f32.gmra.mrb[44].mxu1 %vm532_vm1, %v7421_v45  ;;  %v7437_v45 = vsel %vm3129_vm5, %v7434_v13, %v7436_v36  ;;  %v7450_v13 = vrot.slane %v14958_v23, 6 }
 0x553   : > { %11654 = vmatprep.mubr.msk.f32.mxu1 %vm532_vm1, %v7423_v53  ;;  %v7439_v53 = vsel %vm3129_vm5, %v7436_v36, %v7438_v20  ;;  %v7452_v36 = vrot.slane %v14968_v47, 6 }
 0x556   : > { %11655 = vmatmul.mubr.msk.f32.gmra.mrb[46].mxu1 %vm532_vm1, %v7425_v58  ;;  %v7441_v58 = vsel %vm3129_vm5, %v7438_v20, %v7440_v27  ;;  %v7454_v20 = vrot.slane %v14974_v44, 6 }
 0x557   : > { %11657 = vmatprep.mubr.msk.f32.mxu1 %vm532_vm1, %v7427_v52  ;;  %v7443_v52 = vsel %vm3129_vm5, %v7440_v27, %v7442_v55  ;;  %v7456_v27 = vrot.slane %v15200_v22, 6 }
 0x55a   : > { %11658 = vmatmul.mubr.msk.f32.gmra.mrb[48].mxu1 %vm532_vm1, %v7429_v46  ;;  %v7445_v46 = vsel %vm3129_vm5, %v7442_v55, %v7444_v2  ;;  %v7458_v55 = vrot.slane %v15584_v24, 6 }
 0x55b   : > { %11660 = vmatprep.mubr.msk.f32.mxu1 %vm532_vm1, %v7431_v1  ;;  %v7447_v1 = vsel %vm3129_vm5, %v7444_v2, %v7446_v9  ;;  %v7460_v2 = vrot.slane %v15590_v43, 6 }
 0x55e   : > { %11661 = vmatmul.mubr.msk.f32.gmra.mrb[50].mxu1 %vm532_vm1, %v7433_v41  ;;  %v7449_v41 = vsel %vm3129_vm5, %v7446_v9, %v7448_v12  ;;  %v7461_v9 = vsel %vm3129_vm5, %v7458_v55, %v7460_v2  ;;  %v16734_v2 = vld [vmem:[#allocation43_spill] sm:$0xff] }
 0x55f   : > { %11663 = vmatprep.mubr.msk.f32.mxu1 %vm532_vm1, %v7435_v18  ;;  %v7451_v18 = vsel %vm3129_vm5, %v7448_v12, %v7450_v13 }
 0x562   : > { %11664 = vmatmul.mubr.msk.f32.gmra.mrb[52].mxu1 %vm532_vm1, %v7437_v45  ;;  %v7453_v45 = vsel %vm3129_vm5, %v7450_v13, %v7452_v36 }
 0x563   : > { %11666 = vmatprep.mubr.msk.f32.mxu1 %vm532_vm1, %v7439_v53  ;;  %v7455_v53 = vsel %vm3129_vm5, %v7452_v36, %v7454_v20  ;;  %v16726_v36 = vld [vmem:[#allocation35_spill] sm:$0xff] }
 0x566   : > { %11667 = vmatmul.mubr.msk.f32.gmra.mrb[54].mxu1 %vm532_vm1, %v7441_v58  ;;  %v7457_v58 = vsel %vm3129_vm5, %v7454_v20, %v7456_v27  ;;  %v16728_v20 = vld [vmem:[#allocation37_spill] sm:$0xff] }
 0x567   : > { %11669 = vmatprep.mubr.msk.f32.mxu1 %vm532_vm1, %v7443_v52  ;;  %v7459_v52 = vsel %vm3129_vm5, %v7456_v27, %v7458_v55  ;;  %v16730_v27 = vld [vmem:[#allocation39_spill] sm:$0xff]  ;;  %v16732_v55 = vld [vmem:[#allocation41_spill] sm:$0xff] }
 0x56a   : > { %11670 = vmatmul.mubr.msk.f32.gmra.mrb[56].mxu1 %vm532_vm1, %v7445_v46  ;;  %v523_v46 = vld [vmem:[%s16325_s5 + $0x20] sm:$0xf] }
 0x56b   : > { %11672 = vmatprep.mubr.msk.f32.mxu1 %vm532_vm1, %v7447_v1 }
 0x56e   : > { %11673 = vmatmul.mubr.msk.f32.gmra.mrb[58].mxu1 %vm532_vm1, %v7449_v41 }
 0x56f   : > { %11675 = vmatprep.mubr.msk.f32.mxu1 %vm532_vm1, %v7451_v18  ;;  %v16727_v18 = vld [vmem:[#allocation36_spill] sm:$0xff] }
 0x572   : > { %11676 = vmatmul.mubr.msk.f32.gmra.mrb[60].mxu1 %vm532_vm1, %v7453_v45  ;;  %v16729_v45 = vld [vmem:[#allocation38_spill] sm:$0xff] }
 0x573   : > { %11678 = vmatprep.mubr.msk.f32.mxu1 %vm532_vm1, %v7455_v53  ;;  %v16731_v53 = vld [vmem:[#allocation40_spill] sm:$0xff] }
 0x576   : > { %11679 = vmatmul.mubr.msk.f32.gmra.mrb[62].mxu1 %vm532_vm1, %v7457_v58  ;;  %v16733_v58 = vld [vmem:[#allocation42_spill] sm:$0xff] }
 0x577   : > { %11681 = vmatprep.mubr.msk.f32.mxu1 %vm532_vm1, %v7459_v52  ;;  %v16735_v52 = vld [vmem:[#allocation44_spill] sm:$0xff] }
 0x57a   : > { %11682 = vmatmul.mubr.msk.f32.gmra.mrb[64].mxu1 %vm532_vm1, %v7461_v9  ;;  %v16736_v9 = vld [vmem:[#allocation45_spill] sm:$0xff] }
 0x57b   : > { %11686 = vmatprep.mubr.msk.f32.mxu1 %vm532_vm1, %v14756_v59  ;;  %v4789_v59 = vmax.f32 %v14979_v15, 0.0  ;;  %v16722_v15 = vld [vmem:[#allocation6_spill] sm:$0xff] }
 0x57e   : > { %11687 = vmatmul.mubr.msk.f32.vlgmr.msra.gmra.mrb[26].mxu1 %vm532_vm1, %v14765_v57  ;;  %v5010_v57 = vpop.permute.xlu1 %5009 }
 0x57f   : > { %11747 = vmatpush3.msk.msra.mxu1 %vm671_vm0, %v15746_v34  ;;  %11689 = vmatprep.mubr.msk.f32.mxu1 %vm532_vm1, %v14768_v42  ;;  %v4790_v42 = vmax.f32 %v15006_v6, 0.0  ;;  %v4791_v6 = vmax.f32 %v16722_v15, 0.0  ;;  %v421_v15 = vld [vmem:[%s16139_s14 + $0x8] sm:$0xff] }
 0x580   : > { %11808 = vmatprep.subr.msk.mxu1 %vm671_vm0, %v523_v46 }
 0x582   : > { %11690 = vmatmul.mubr.msk.f32.gmra.mrb[28].mxu1 %vm532_vm1, %v14780_v51  ;;  %v15947_v51 = vmul.f32 %v5010_v57, %v4789_v59  ;;  %v16738_v59 = vld [vmem:[#allocation47_spill] sm:$0xff]  ;;  %v16739_v57 = vld [vmem:[#allocation48_spill] sm:$0xff] }
 0x583   : > { %11692 = vmatprep.mubr.msk.f32.mxu1 %vm532_vm1, %v14784_v25  ;;  %v5015_v25 = vpop.permute.xlu0 %5014 }
 0x586   : > { %11693 = vmatmul.mubr.msk.f32.gmra.mrb[30].mxu1 %vm532_vm1, %v14792_v28  ;;  %v15953_v28 = vmul.f32 %v5015_v25, %v4790_v42  ;;  %v16740_v42 = vld [vmem:[#allocation49_spill] sm:$0xff]  ;;  %v16741_v25 = vld [vmem:[#allocation50_spill] sm:$0xff] }
 0x587   : > { %11695 = vmatprep.mubr.msk.f32.mxu1 %vm532_vm1, %v14796_v40  ;;  %v16696_v40 = vld [vmem:[#allocation7_spill] sm:$0xff] }
 0x58a   : > { %11696 = vmatmul.mubr.msk.f32.gmra.mrb[32].mxu1 %vm532_vm1, %v14804_v30  ;;  %v16697_v30 = vld [vmem:[#allocation8_spill] sm:$0xff] }
 0x58b   : > { %11698 = vmatprep.mubr.msk.f32.mxu1 %vm532_vm1, %v16628_v63 }
 0x58e   : > { %11699 = vmatmul.mubr.msk.f32.gmra.mrb[34].mxu1 %vm532_vm1, %v14816_v17  ;;  %v16698_v17 = vld [vmem:[#allocation9_spill] sm:$0xff] }
 0x58f   : > { %11701 = vmatprep.mubr.msk.f32.mxu1 %vm532_vm1, %v16630_v48 }
 0x592   : > { %11702 = vmatmul.mubr.msk.f32.gmra.mrb[36].mxu1 %vm532_vm1, %v14830_v32  ;;  %v16699_v32 = vld [vmem:[#allocation10_spill] sm:$0xff] }
 0x593   : > { %11704 = vmatprep.mubr.msk.f32.mxu1 %vm532_vm1, %v16633_v61  ;;  %v8177_v61 = vrot.slane %v15953_v28, 1 }
 0x596   : > { %11705 = vmatmul.mubr.msk.f32.gmra.mrb[38].mxu1 %vm532_vm1, %v14845_v5  ;;  %v16700_v5 = vld [vmem:[#allocation11_spill] sm:$0xff] }
 0x597   : > { %11707 = vmatprep.mubr.msk.f32.mxu1 %vm532_vm1, %v14850_v10  ;;  %v16701_v10 = vld [vmem:[#allocation12_spill] sm:$0xff] }
 0x59a   : > { %11708 = vmatmul.mubr.msk.f32.gmra.mrb[40].mxu1 %vm532_vm1, %v14858_v37  ;;  %v16702_v37 = vld [vmem:[#allocation13_spill] sm:$0xff] }
 0x59b   : > { %11710 = vmatprep.mubr.msk.f32.mxu1 %vm532_vm1, %v14862_v14  ;;  %v16703_v14 = vld [vmem:[#allocation14_spill] sm:$0xff] }
 0x59e   : > { %11711 = vmatmul.mubr.msk.f32.gmra.mrb[42].mxu1 %vm532_vm1, %v14870_v3  ;;  %v16704_v3 = vld [vmem:[#allocation15_spill] sm:$0xff] }
 0x59f   : > { %11713 = vmatprep.mubr.msk.f32.mxu1 %vm532_vm1, %v14874_v26  ;;  %v16705_v26 = vld [vmem:[#allocation16_spill] sm:$0xff] }
 0x5a2   : > { %11714 = vmatmul.mubr.msk.f32.gmra.mrb[44].mxu1 %vm532_vm1, %v14882_v39  ;;  %v16706_v39 = vld [vmem:[#allocation17_spill] sm:$0xff] }
 0x5a3   : > { %11716 = vmatprep.mubr.msk.f32.mxu1 %vm532_vm1, %v14886_v7  ;;  %v16707_v7 = vld [vmem:[#allocation18_spill] sm:$0xff] }
 0x5a6   : > { %11717 = vmatmul.mubr.msk.f32.gmra.mrb[46].mxu1 %vm532_vm1, %v14894_v54  ;;  %v16708_v54 = vld [vmem:[#allocation19_spill] sm:$0xff] }
 0x5a7   : > { %11719 = vmatprep.mubr.msk.f32.mxu1 %vm532_vm1, %v14898_v33  ;;  %v16709_v33 = vld [vmem:[#allocation20_spill] sm:$0xff] }
 0x5aa   : > { %11720 = vmatmul.mubr.msk.f32.gmra.mrb[48].mxu1 %vm532_vm1, %v14906_v0  ;;  %v16710_v0 = vld [vmem:[#allocation21_spill] sm:$0xff] }
 0x5ab   : > { %11722 = vmatprep.mubr.msk.f32.mxu1 %vm532_vm1, %v14910_v29  ;;  %v16711_v29 = vld [vmem:[#allocation22_spill] sm:$0xff] }
 0x5ae   : > { %11723 = vmatmul.mubr.msk.f32.gmra.mrb[50].mxu1 %vm532_vm1, %v14918_v50  ;;  %v16712_v50 = vld [vmem:[#allocation23_spill] sm:$0xff] }
 0x5af   : > { %11725 = vmatprep.mubr.msk.f32.mxu1 %vm532_vm1, %v14922_v56  ;;  %v16713_v56 = vld [vmem:[#allocation24_spill] sm:$0xff] }
 0x5b2   : > { %11726 = vmatmul.mubr.msk.f32.gmra.mrb[52].mxu1 %vm532_vm1, %v14930_v8  ;;  %v16714_v8 = vld [vmem:[#allocation25_spill] sm:$0xff] }
 0x5b3   : > { %11728 = vmatprep.mubr.msk.f32.mxu1 %vm532_vm1, %v14934_v49  ;;  %v16715_v49 = vld [vmem:[#allocation26_spill] sm:$0xff] }
 0x5b6   : > { %11729 = vmatmul.mubr.msk.f32.gmra.mrb[54].mxu1 %vm532_vm1, %v14942_v16  ;;  %v16716_v16 = vld [vmem:[#allocation27_spill] sm:$0xff] }
 0x5b7   : > { %11731 = vmatprep.mubr.msk.f32.mxu1 %vm532_vm1, %v14946_v62  ;;  %v16717_v62 = vld [vmem:[#allocation28_spill] sm:$0xff] }
 0x5ba   : > { %11732 = vmatmul.mubr.msk.f32.gmra.mrb[56].mxu1 %vm532_vm1, %v14954_v21  ;;  %v16718_v21 = vld [vmem:[#allocation29_spill] sm:$0xff] }
 0x5bb   : > { %11734 = vmatprep.mubr.msk.f32.mxu1 %vm532_vm1, %v14958_v23  ;;  %v16719_v23 = vld [vmem:[#allocation30_spill] sm:$0xff] }
 0x5be   : > { %11735 = vmatmul.mubr.msk.f32.gmra.mrb[58].mxu1 %vm532_vm1, %v14968_v47  ;;  %v16720_v47 = vld [vmem:[#allocation31_spill] sm:$0xff] }
 0x5bf   : > { %11737 = vmatprep.mubr.msk.f32.mxu1 %vm532_vm1, %v14974_v44  ;;  %v16721_v44 = vld [vmem:[#allocation32_spill] sm:$0xff] }
 0x5c2   : > { %11738 = vmatmul.mubr.msk.f32.gmra.mrb[60].mxu1 %vm532_vm1, %v15200_v22 }
 0x5c3   : > { %11740 = vmatprep.mubr.msk.f32.mxu1 %vm532_vm1, %v15584_v24 }
 0x5c6   : > { %11741 = vmatmul.mubr.msk.f32.gmra.mrb[62].mxu1 %vm532_vm1, %v15590_v43 }
 0x5c7   : > { %11743 = vmatprep.mubr.msk.f32.mxu1 %vm532_vm1, %v15947_v51 }
 0x5ca   : > { %11744 = vmatmul.mubr.msk.f32.gmra.mrb[64].mxu1 %vm532_vm1, %v15953_v28 }
 0x5cb   : > { %11748 = vmatprep.mubr.msk.f32.mxu1 %vm532_vm1, %v15020_v11  ;;  %v8171_v11 = vrot.slane %v15584_v24, 1 }
 0x5ce   : > { %11749 = vmatmul.mubr.msk.f32.vlgmr.msra.gmra.mrb[26].mxu1 %vm532_vm1, %v15026_v60  ;;  %v16723_v60 = vld [vmem:[#allocation33_spill] sm:$0xff] }
 0x5cf   : > { %11809 = vmatpush3.msk.msra.mxu1 %vm671_vm0, %v523_v46  ;;  %11751 = vmatprep.mubr.msk.f32.mxu1 %vm532_vm1, %v15032_v19  ;;  %v8173_v19 = vrot.slane %v15590_v43, 1  ;;  %v16737_v46 = vld [vmem:[#allocation46_spill] sm:$0xff] }
 0x5d1   : > { %v8174_v34 = vsel %vm1016_vm3, %v8171_v11, %v8173_v19 }
 0x5d2   : > { %11752 = vmatmul.mubr.msk.f32.gmra.mrb[28].mxu1 %vm532_vm1, %v15038_v38  ;;  %v16724_v38 = vld [vmem:[#allocation34_spill] sm:$0xff] }
 0x5d3   : > { %11754 = vmatprep.mubr.msk.f32.mxu1 %vm532_vm1, %v15044_v35  ;;  %v5020_v35 = vpop.permute.xlu1 %5019 }
 0x5d4   : > { %v16032_v63 = vmul.f32 %v5020_v35, %v4791_v6 }
 0x5d6   : > { %11755 = vmatmul.mubr.msk.f32.gmra.mrb[30].mxu1 %vm532_vm1, %v15050_v4  ;;  %v8175_v4 = vrot.slane %v15947_v51, 1  ;;  %v8179_v12 = vrot.slane %v16032_v63, 1 }
 0x5d7   : > { %11757 = vmatprep.mubr.msk.f32.mxu1 %vm532_vm1, %v15056_v31  ;;  %v16725_v31 = vrot.slane %v15200_v22, 1 }
 0x5d8   : > { %v8176_v1 = vsel %vm1016_vm3, %v8173_v19, %v8175_v4  ;;  %v8178_v13 = vsel %vm1016_vm3, %v8175_v4, %v8177_v61  ;;  %v8180_v41 = vsel %vm1016_vm3, %v8177_v61, %v8179_v12 }
 0x5d9   : > { %v8172_v48 = vsel %vm1016_vm3, %v16725_v31, %v8171_v11 }
 0x5da   : > { %11758 = vmatmul.mubr.msk.f32.gmra.mrb[32].mxu1 %vm532_vm1, %v16696_v40  ;;  %v16742_v40 = vld [vmem:[#allocation51_spill] sm:$0xff] }
 0x5db   : > { %11760 = vmatprep.mubr.msk.f32.mxu1 %vm532_vm1, %v16697_v30  ;;  %v16743_v30 = vld [vmem:[#allocation52_spill] sm:$0xff] }
 0x5de   : > { %11761 = vmatmul.mubr.msk.f32.gmra.mrb[34].mxu1 %vm532_vm1, %v16698_v17  ;;  %v16744_v17 = vld [vmem:[#allocation53_spill] sm:$0xff] }
 0x5df   : > { %11763 = vmatprep.mubr.msk.f32.mxu1 %vm532_vm1, %v16699_v32  ;;  %v16745_v32 = vld [vmem:[#allocation54_spill] sm:$0xff] }
 0x5e2   : > { %11764 = vmatmul.mubr.msk.f32.gmra.mrb[36].mxu1 %vm532_vm1, %v16700_v5  ;;  %v16746_v5 = vld [vmem:[#allocation55_spill] sm:$0xff] }
 0x5e3   : > { %11766 = vmatprep.mubr.msk.f32.mxu1 %vm532_vm1, %v16701_v10  ;;  %v16747_v10 = vld [vmem:[#allocation56_spill] sm:$0xff] }
 0x5e6   : > { %11767 = vmatmul.mubr.msk.f32.gmra.mrb[38].mxu1 %vm532_vm1, %v16702_v37  ;;  %v16748_v37 = vld [vmem:[#allocation57_spill] sm:$0xff] }
 0x5e7   : > { %11769 = vmatprep.mubr.msk.f32.mxu1 %vm532_vm1, %v16703_v14  ;;  %v16749_v14 = vld [vmem:[#allocation58_spill] sm:$0xff] }
 0x5ea   : > { %11770 = vmatmul.mubr.msk.f32.gmra.mrb[40].mxu1 %vm532_vm1, %v16704_v3  ;;  %v16750_v3 = vld [vmem:[#allocation59_spill] sm:$0xff] }
 0x5eb   : > { %11772 = vmatprep.mubr.msk.f32.mxu1 %vm532_vm1, %v16705_v26  ;;  %v16751_v26 = vld [vmem:[#allocation60_spill] sm:$0xff] }
 0x5ee   : > { %11773 = vmatmul.mubr.msk.f32.gmra.mrb[42].mxu1 %vm532_vm1, %v16706_v39  ;;  %v16752_v39 = vld [vmem:[#allocation61_spill] sm:$0xff] }
 0x5ef   : > { %11775 = vmatprep.mubr.msk.f32.mxu1 %vm532_vm1, %v16707_v7  ;;  %v16753_v7 = vld [vmem:[#allocation62_spill] sm:$0xff] }
 0x5f2   : > { %11776 = vmatmul.mubr.msk.f32.gmra.mrb[44].mxu1 %vm532_vm1, %v16708_v54  ;;  %v16754_v54 = vld [vmem:[#allocation63_spill] sm:$0xff] }
 0x5f3   : > { %11778 = vmatprep.mubr.msk.f32.mxu1 %vm532_vm1, %v16709_v33  ;;  %v16755_v33 = vld [vmem:[#allocation64_spill] sm:$0xff] }
 0x5f6   : > { %11779 = vmatmul.mubr.msk.f32.gmra.mrb[46].mxu1 %vm532_vm1, %v16710_v0  ;;  %v16756_v0 = vld [vmem:[#allocation65_spill] sm:$0xff] }
 0x5f7   : > { %11781 = vmatprep.mubr.msk.f32.mxu1 %vm532_vm1, %v16711_v29  ;;  %v16757_v29 = vld [vmem:[#allocation66_spill] sm:$0xff] }
 0x5fa   : > { %11782 = vmatmul.mubr.msk.f32.gmra.mrb[48].mxu1 %vm532_vm1, %v16712_v50  ;;  %v16758_v50 = vld [vmem:[#allocation67_spill] sm:$0xff] }
 0x5fb   : > { %11784 = vmatprep.mubr.msk.f32.mxu1 %vm532_vm1, %v16713_v56  ;;  %v8499_v56 = vrot.slane %v15584_v24, 2 }
 0x5fe   : > { %11785 = vmatmul.mubr.msk.f32.gmra.mrb[50].mxu1 %vm532_vm1, %v16714_v8  ;;  %v16759_v8 = vld [vmem:[#allocation68_spill] sm:$0xff] }
 0x5ff   : > { %11787 = vmatprep.mubr.msk.f32.mxu1 %vm532_vm1, %v16715_v49  ;;  %v8501_v49 = vrot.slane %v15590_v43, 2 }
 0x601   : > { %v8502_v24 = vsel %vm1544_vm2, %v8499_v56, %v8501_v49 }
 0x602   : > { %11788 = vmatmul.mubr.msk.f32.gmra.mrb[52].mxu1 %vm532_vm1, %v16716_v16  ;;  %v16760_v16 = vld [vmem:[#allocation69_spill] sm:$0xff] }
 0x603   : > { %11790 = vmatprep.mubr.msk.f32.mxu1 %vm532_vm1, %v16717_v62  ;;  %v8503_v62 = vrot.slane %v15947_v51, 2 }
 0x605   : > { %v8504_v43 = vsel %vm1544_vm2, %v8501_v49, %v8503_v62  ;;  %v430_v49 = vld [vmem:[%s16139_s14 + $0x50] sm:$0xff] }
 0x606   : > { %11791 = vmatmul.mubr.msk.f32.gmra.mrb[54].mxu1 %vm532_vm1, %v16718_v21  ;;  %v16761_v21 = vrot.slane %v15200_v22, 2 }
 0x607   : > { %11793 = vmatprep.mubr.msk.f32.mxu1 %vm532_vm1, %v16719_v23 }
 0x608   : > { %v8500_v23 = vsel %vm1544_vm2, %v16761_v21, %v8499_v56 }
 0x60a   : > { %11794 = vmatmul.mubr.msk.f32.gmra.mrb[56].mxu1 %vm532_vm1, %v16720_v47  ;;  %v8505_v47 = vrot.slane %v15953_v28, 2  ;;  %v16144_v28 = vld [vmem:[%s16326_s6] ss:$0 sm:$0xff] }
 0x60b   : > { %11796 = vmatprep.mubr.msk.f32.mxu1 %vm532_vm1, %v16721_v44  ;;  %v8507_v44 = vrot.slane %v16032_v63, 2  ;;  %v423_v63 = vld [vmem:[%s16139_s14 + $0x18] sm:$0xff] }
 0x60c   : > { %v8506_v51 = vsel %vm1544_vm2, %v8503_v62, %v8505_v47 }
 0x60d   : > { %v8508_v22 = vsel %vm1544_vm2, %v8505_v47, %v8507_v44 }
 0x60e   : > { %11797 = vmatmul.mubr.msk.f32.gmra.mrb[58].mxu1 %vm532_vm1, %v16723_v60  ;;  %v420_v60 = vld [vmem:[%s16139_s14] sm:$0xff] }
 0x60f   : > { %11799 = vmatprep.mubr.msk.f32.mxu1 %vm532_vm1, %v16724_v38 }
 0x612   : > { %11800 = vmatmul.mubr.msk.f32.gmra.mrb[60].mxu1 %vm532_vm1, %v8172_v48 }
 0x613   : > { %11802 = vmatprep.mubr.msk.f32.mxu1 %vm532_vm1, %v8174_v34  ;;  %v422_v34 = vld [vmem:[%s16139_s14 + $0x10] sm:$0xff] }
 0x616   : > { %11803 = vmatmul.mubr.msk.f32.gmra.mrb[62].mxu1 %vm532_vm1, %v8176_v1 }
 0x617   : > { %11805 = vmatprep.mubr.msk.f32.mxu1 %vm532_vm1, %v8178_v13 }
 0x61a   : > { %11806 = vmatmul.mubr.msk.f32.gmra.mrb[64].mxu1 %vm532_vm1, %v8180_v41 }
 0x61b   : > { %11810 = vmatprep.mubr.msk.f32.mxu1 %vm532_vm1, %v16726_v36 }
 0x61e   : > { %11811 = vmatmul.mubr.msk.f32.vlgmr.msra.gmra.mrb[26].mxu1 %vm532_vm1, %v16727_v18  ;;  %v425_v18 = vld [vmem:[%s16139_s14 + $0x28] sm:$0xff] }
 0x61f   : > { %11813 = vmatprep.mubr.msk.f32.mxu1 %vm532_vm1, %v16728_v20 }
 0x622   : > { %11814 = vmatmul.mubr.msk.f32.gmra.mrb[28].mxu1 %vm532_vm1, %v16729_v45 }
 0x623   : > { %11816 = vmatprep.mubr.msk.f32.mxu1 %vm532_vm1, %v16730_v27 }
 0x626   : > { %11817 = vmatmul.mubr.msk.f32.gmra.mrb[30].mxu1 %vm532_vm1, %v16731_v53  ;;  %v424_v53 = vld [vmem:[%s16139_s14 + $0x20] sm:$0xff] }
 0x627   : > { %11819 = vmatprep.mubr.msk.f32.mxu1 %vm532_vm1, %v16732_v55 }
 0x62a   : > { %11820 = vmatmul.mubr.msk.f32.gmra.mrb[32].mxu1 %vm532_vm1, %v16733_v58 }
 0x62b   : > { %11822 = vmatprep.mubr.msk.f32.mxu1 %vm532_vm1, %v16734_v2 }
 0x62e   : > { %11823 = vmatmul.mubr.msk.f32.gmra.mrb[34].mxu1 %vm532_vm1, %v16735_v52 }
 0x62f   : > { %11825 = vmatprep.mubr.msk.f32.mxu1 %vm532_vm1, %v16736_v9 }
 0x632   : > { %11826 = vmatmul.mubr.msk.f32.gmra.mrb[36].mxu1 %vm532_vm1, %v16737_v46  ;;  %v427_v46 = vld [vmem:[%s16139_s14 + $0x38] sm:$0xff] }
 0x633   : > { %11828 = vmatprep.mubr.msk.f32.mxu1 %vm532_vm1, %v16738_v59 }
 0x636   : > { %11829 = vmatmul.mubr.msk.f32.gmra.mrb[38].mxu1 %vm532_vm1, %v16739_v57 }
 0x637   : > { %11831 = vmatprep.mubr.msk.f32.mxu1 %vm532_vm1, %v16740_v42 }
 0x63a   : > { %11832 = vmatmul.mubr.msk.f32.gmra.mrb[40].mxu1 %vm532_vm1, %v16741_v25  ;;  %v426_v25 = vld [vmem:[%s16139_s14 + $0x30] sm:$0xff] }
 0x63b   : > { %11834 = vmatprep.mubr.msk.f32.mxu1 %vm532_vm1, %v16742_v40 }
 0x63e   : > { %11835 = vmatmul.mubr.msk.f32.gmra.mrb[42].mxu1 %vm532_vm1, %v16743_v30 }
 0x63f   : > { %11837 = vmatprep.mubr.msk.f32.mxu1 %vm532_vm1, %v16744_v17 }
 0x642   : > { %11838 = vmatmul.mubr.msk.f32.gmra.mrb[44].mxu1 %vm532_vm1, %v16745_v32 }
 0x643   : > { %11840 = vmatprep.mubr.msk.f32.mxu1 %vm532_vm1, %v16746_v5 }
 0x646   : > { %11841 = vmatmul.mubr.msk.f32.gmra.mrb[46].mxu1 %vm532_vm1, %v16747_v10  ;;  %v429_v10 = vld [vmem:[%s16139_s14 + $0x48] sm:$0xff] }
 0x647   : > { %11843 = vmatprep.mubr.msk.f32.mxu1 %vm532_vm1, %v16748_v37 }
 0x64a   : > { %11844 = vmatmul.mubr.msk.f32.gmra.mrb[48].mxu1 %vm532_vm1, %v16749_v14 }
 0x64b   : > { %11846 = vmatprep.mubr.msk.f32.mxu1 %vm532_vm1, %v16750_v3 }
 0x64e   : > { %11847 = vmatmul.mubr.msk.f32.gmra.mrb[50].mxu1 %vm532_vm1, %v16751_v26  ;;  %v428_v26 = vld [vmem:[%s16139_s14 + $0x40] sm:$0xff] }
 0x64f   : > { %11849 = vmatprep.mubr.msk.f32.mxu1 %vm532_vm1, %v16752_v39 }
 0x652   : > { %11850 = vmatmul.mubr.msk.f32.gmra.mrb[52].mxu1 %vm532_vm1, %v16753_v7 }
 0x653   : > { %11852 = vmatprep.mubr.msk.f32.mxu1 %vm532_vm1, %v16754_v54 }
 0x656   : > { %11853 = vmatmul.mubr.msk.f32.gmra.mrb[54].mxu1 %vm532_vm1, %v16755_v33 }
 0x657   : > { %11855 = vmatprep.mubr.msk.f32.mxu1 %vm532_vm1, %v16756_v0 }
 0x65a   : > { %11856 = vmatmul.mubr.msk.f32.gmra.mrb[56].mxu1 %vm532_vm1, %v16757_v29  ;;  %v431_v29 = vld [vmem:[%s16139_s14 + $0x58] sm:$0xff] }
 0x65b   : > { %11858 = vmatprep.mubr.msk.f32.mxu1 %vm532_vm1, %v16758_v50 }
 0x65e   : > { %11859 = vmatmul.mubr.msk.f32.gmra.mrb[58].mxu1 %vm532_vm1, %v16759_v8 }
 0x65f   : > { %11861 = vmatprep.mubr.msk.f32.mxu1 %vm532_vm1, %v16760_v16 }
 0x662   : > { %11862 = vmatmul.mubr.msk.f32.gmra.mrb[60].mxu1 %vm532_vm1, %v8500_v23 }
 0x663   : > { %11864 = vmatprep.mubr.msk.f32.mxu1 %vm532_vm1, %v8502_v24  ;;  %v433_v24 = vld [vmem:[%s16139_s14 + $0x68] sm:$0xff] }
 0x666   : > { %11865 = vmatmul.mubr.msk.f32.gmra.mrb[62].mxu1 %vm532_vm1, %v8504_v43 }
 0x667   : > { %11867 = vmatprep.mubr.msk.f32.mxu1 %vm532_vm1, %v8506_v51 }
 0x66a   : > { %11868 = vmatmul.mubr.msk.f32.gmra.mrb[64].mxu1 %vm532_vm1, %v8508_v22  ;;  %v432_v22 = vld [vmem:[%s16139_s14 + $0x60] sm:$0xff] }
 0x6f1   : > { %v11812_v6 = vpop.f32.mrb[26].mxu1 }
 0x6f2   : > { %v11944_v11 = vadd.f32 %v11812_v6, %v16144_v28  ;;  %v8588_v19 = vpop.f32.mrb[27].mxu1 }
 0x6f3   : > { %v11945_v38 = vadd.f32 %v16144_v28, %v8588_v19 }
 0x6f4   : > { %v8828_v35 = vadd.f32 %v11944_v11, %v421_v15 }
 0x6f5   : > { %v8827_v4 = vadd.f32 %v11945_v38, %v420_v60  ;;  %v11815_v31 = vpop.f32.mrb[28].mxu1  ;;  %v435_v38 = vld [vmem:[%s16139_s14 + $0x78] sm:$0xff] }
 0x6f6   : > { %v8868_v48 = vmax.f32 %v8828_v35, 0.0  ;;  %v11946_v61 = vadd.f32 %v11815_v31, %v16144_v28  ;;  %v8598_v12 = vpop.f32.mrb[29].mxu1  ;;  %v434_v31 = vld [vmem:[%s16139_s14 + $0x70] sm:$0xff] }
 0x6f7   : > { %v8867_v1 = vmax.f32 %v8827_v4, 0.0  ;;  %v11947_v13 = vadd.f32 %v16144_v28, %v8598_v12 }
 0x6f8   : > { %8908 = vst.msk [vmem:[%s16153_s18 + $0x8] sm:$0xff] %vm532_vm1, %v8868_v48  ;;  %v8830_v41 = vadd.f32 %v11946_v61, %v423_v63 }
 0x6f9   : > { %8907 = vst.msk [vmem:[%s16153_s18] sm:$0xff] %vm532_vm1, %v8867_v1  ;;  %v8829_v36 = vadd.f32 %v11947_v13, %v422_v34  ;;  %v11818_v20 = vpop.f32.mrb[30].mxu1  ;;  %v437_v13 = vld [vmem:[%s16139_s14 + $0x88] sm:$0xff] }
 0x6fa   : > { %v8870_v45 = vmax.f32 %v8830_v41, 0.0  ;;  %v11948_v27 = vadd.f32 %v11818_v20, %v16144_v28  ;;  %v8608_v55 = vpop.f32.mrb[31].mxu1  ;;  %v436_v20 = vld [vmem:[%s16139_s14 + $0x80] sm:$0xff] }
 0x6fb   : > { %v8869_v58 = vmax.f32 %v8829_v36, 0.0  ;;  %v11949_v2 = vadd.f32 %v16144_v28, %v8608_v55 }
 0x6fc   : > { %8910 = vst.msk [vmem:[%s16153_s18 + $0x18] sm:$0xff] %vm532_vm1, %v8870_v45  ;;  %v8832_v52 = vadd.f32 %v11948_v27, %v425_v18 }
 0x6fd   : > { %8909 = vst.msk [vmem:[%s16153_s18 + $0x10] sm:$0xff] %vm532_vm1, %v8869_v58  ;;  %v8831_v9 = vadd.f32 %v11949_v2, %v424_v53  ;;  %v11821_v59 = vpop.f32.mrb[32].mxu1  ;;  %v439_v2 = vld [vmem:[%s16139_s14 + $0x98] sm:$0xff] }
 0x6fe   : > { %v8872_v57 = vmax.f32 %v8832_v52, 0.0  ;;  %v11950_v42 = vadd.f32 %v11821_v59, %v16144_v28  ;;  %v8618_v40 = vpop.f32.mrb[33].mxu1  ;;  %v438_v59 = vld [vmem:[%s16139_s14 + $0x90] sm:$0xff] }
 0x6ff   : > { %v8871_v30 = vmax.f32 %v8831_v9, 0.0  ;;  %v11951_v17 = vadd.f32 %v16144_v28, %v8618_v40 }
 0x700   : > { %8912 = vst.msk [vmem:[%s16153_s18 + $0x28] sm:$0xff] %vm532_vm1, %v8872_v57  ;;  %v8834_v32 = vadd.f32 %v11950_v42, %v427_v46 }
 0x701   : > { %8911 = vst.msk [vmem:[%s16153_s18 + $0x20] sm:$0xff] %vm532_vm1, %v8871_v30  ;;  %v8833_v5 = vadd.f32 %v11951_v17, %v426_v25  ;;  %v11824_v37 = vpop.f32.mrb[34].mxu1  ;;  %v441_v17 = vld [vmem:[%s16139_s14 + $0xa8] sm:$0xff] }
 0x702   : > { %v8874_v14 = vmax.f32 %v8834_v32, 0.0  ;;  %v11952_v3 = vadd.f32 %v11824_v37, %v16144_v28  ;;  %v8628_v39 = vpop.f32.mrb[35].mxu1  ;;  %v440_v37 = vld [vmem:[%s16139_s14 + $0xa0] sm:$0xff] }
 0x703   : > { %v8873_v7 = vmax.f32 %v8833_v5, 0.0  ;;  %v11953_v54 = vadd.f32 %v16144_v28, %v8628_v39 }
 0x704   : > { %8914 = vst.msk [vmem:[%s16153_s18 + $0x38] sm:$0xff] %vm532_vm1, %v8874_v14  ;;  %v8836_v33 = vadd.f32 %v11952_v3, %v429_v10 }
 0x705   : > { %8913 = vst.msk [vmem:[%s16153_s18 + $0x30] sm:$0xff] %vm532_vm1, %v8873_v7  ;;  %v8835_v0 = vadd.f32 %v11953_v54, %v428_v26  ;;  %v11827_v50 = vpop.f32.mrb[36].mxu1  ;;  %v443_v54 = vld [vmem:[%s16139_s14 + $0xb8] sm:$0xff] }
 0x706   : > { %v8876_v56 = vmax.f32 %v8836_v33, 0.0  ;;  %v11954_v8 = vadd.f32 %v11827_v50, %v16144_v28  ;;  %v8638_v16 = vpop.f32.mrb[37].mxu1  ;;  %v442_v50 = vld [vmem:[%s16139_s14 + $0xb0] sm:$0xff] }
 0x707   : > { %v8875_v62 = vmax.f32 %v8835_v0, 0.0  ;;  %v11955_v21 = vadd.f32 %v16144_v28, %v8638_v16 }
 0x708   : > { %8916 = vst.msk [vmem:[%s16153_s18 + $0x48] sm:$0xff] %vm532_vm1, %v8876_v56  ;;  %v8838_v23 = vadd.f32 %v11954_v8, %v431_v29 }
 0x709   : > { %8915 = vst.msk [vmem:[%s16153_s18 + $0x40] sm:$0xff] %vm532_vm1, %v8875_v62  ;;  %v8837_v47 = vadd.f32 %v11955_v21, %v430_v49  ;;  %v11830_v44 = vpop.f32.mrb[38].mxu1  ;;  %v445_v21 = vld [vmem:[%s16139_s14 + $0xc8] sm:$0xff] }
 0x70a   : > { %v8878_v43 = vmax.f32 %v8838_v23, 0.0  ;;  %v11956_v51 = vadd.f32 %v11830_v44, %v16144_v28  ;;  %v8648_v15 = vpop.f32.mrb[39].mxu1  ;;  %v444_v44 = vld [vmem:[%s16139_s14 + $0xc0] sm:$0xff] }
 0x70b   : > { %v8877_v6 = vmax.f32 %v8837_v47, 0.0  ;;  %v11957_v11 = vadd.f32 %v16144_v28, %v8648_v15 }
 0x70c   : > { %8918 = vst.msk [vmem:[%s16153_s18 + $0x58] sm:$0xff] %vm532_vm1, %v8878_v43  ;;  %v8840_v60 = vadd.f32 %v11956_v51, %v433_v24 }
 0x70d   : > { %8917 = vst.msk [vmem:[%s16153_s18 + $0x50] sm:$0xff] %vm532_vm1, %v8877_v6  ;;  %v8839_v19 = vadd.f32 %v11957_v11, %v432_v22  ;;  %v11833_v35 = vpop.f32.mrb[40].mxu1  ;;  %v447_v11 = vld [vmem:[%s16139_s14 + $0xd8] sm:$0xff] }
 0x70e   : > { %v8880_v4 = vmax.f32 %v8840_v60, 0.0  ;;  %v11958_v63 = vadd.f32 %v11833_v35, %v16144_v28  ;;  %v8658_v48 = vpop.f32.mrb[41].mxu1  ;;  %v446_v35 = vld [vmem:[%s16139_s14 + $0xd0] sm:$0xff] }
 0x70f   : > { %v8879_v61 = vmax.f32 %v8839_v19, 0.0  ;;  %v11959_v34 = vadd.f32 %v16144_v28, %v8658_v48 }
 0x710   : > { %8920 = vst.msk [vmem:[%s16153_s18 + $0x68] sm:$0xff] %vm532_vm1, %v8880_v4  ;;  %v8842_v12 = vadd.f32 %v11958_v63, %v435_v38 }
 0x711   : > { %8919 = vst.msk [vmem:[%s16153_s18 + $0x60] sm:$0xff] %vm532_vm1, %v8879_v61  ;;  %v8841_v1 = vadd.f32 %v11959_v34, %v434_v31  ;;  %v11836_v41 = vpop.f32.mrb[42].mxu1  ;;  %v449_v34 = vld [vmem:[%s16139_s14 + $0xe8] sm:$0xff] }
 0x712   : > { %v8882_v36 = vmax.f32 %v8842_v12, 0.0  ;;  %v11960_v18 = vadd.f32 %v11836_v41, %v16144_v28  ;;  %v8668_v45 = vpop.f32.mrb[43].mxu1  ;;  %v448_v41 = vld [vmem:[%s16139_s14 + $0xe0] sm:$0xff] }
 0x713   : > { %v8881_v27 = vmax.f32 %v8841_v1, 0.0  ;;  %v11961_v53 = vadd.f32 %v16144_v28, %v8668_v45 }
 0x714   : > { %8922 = vst.msk [vmem:[%s16153_s18 + $0x78] sm:$0xff] %vm532_vm1, %v8882_v36  ;;  %v8844_v55 = vadd.f32 %v11960_v18, %v437_v13 }
 0x715   : > { %8921 = vst.msk [vmem:[%s16153_s18 + $0x70] sm:$0xff] %vm532_vm1, %v8881_v27  ;;  %v8843_v58 = vadd.f32 %v11961_v53, %v436_v20  ;;  %v11839_v52 = vpop.f32.mrb[44].mxu1  ;;  %v451_v53 = vld [vmem:[%s16139_s14 + $0xf8] sm:$0xff] }
 0x716   : > { %v8884_v9 = vmax.f32 %v8844_v55, 0.0  ;;  %v11962_v46 = vadd.f32 %v11839_v52, %v16144_v28  ;;  %v8678_v57 = vpop.f32.mrb[45].mxu1  ;;  %v450_v52 = vld [vmem:[%s16139_s14 + $0xf0] sm:$0xff] }
 0x717   : > { %v8883_v42 = vmax.f32 %v8843_v58, 0.0  ;;  %v11963_v25 = vadd.f32 %v16144_v28, %v8678_v57 }
 0x718   : > { %8924 = vst.msk [vmem:[%s16153_s18 + $0x88] sm:$0xff] %vm532_vm1, %v8884_v9  ;;  %v8846_v40 = vadd.f32 %v11962_v46, %v439_v2 }
 0x719   : > { %8923 = vst.msk [vmem:[%s16153_s18 + $0x80] sm:$0xff] %vm532_vm1, %v8883_v42  ;;  %v8845_v30 = vadd.f32 %v11963_v25, %v438_v59  ;;  %v11842_v32 = vpop.f32.mrb[46].mxu1  ;;  %v453_v25 = vld [vmem:[%s16139_s14 + $0x108] sm:$0xff] }
 0x71a   : > { %v8886_v5 = vmax.f32 %v8846_v40, 0.0  ;;  %v11964_v10 = vadd.f32 %v11842_v32, %v16144_v28  ;;  %v8688_v14 = vpop.f32.mrb[47].mxu1  ;;  %v452_v32 = vld [vmem:[%s16139_s14 + $0x100] sm:$0xff] }
 0x71b   : > { %v8885_v3 = vmax.f32 %v8845_v30, 0.0  ;;  %v11965_v26 = vadd.f32 %v16144_v28, %v8688_v14 }
 0x71c   : > { %8926 = vst.msk [vmem:[%s16153_s18 + $0x98] sm:$0xff] %vm532_vm1, %v8886_v5  ;;  %v8848_v39 = vadd.f32 %v11964_v10, %v441_v17 }
 0x71d   : > { %8925 = vst.msk [vmem:[%s16153_s18 + $0x90] sm:$0xff] %vm532_vm1, %v8885_v3  ;;  %v8847_v7 = vadd.f32 %v11965_v26, %v440_v37  ;;  %v11845_v33 = vpop.f32.mrb[48].mxu1  ;;  %v455_v26 = vld [vmem:[%s16139_s14 + $0x118] sm:$0xff] }
 0x71e   : > { %v8888_v0 = vmax.f32 %v8848_v39, 0.0  ;;  %v11966_v29 = vadd.f32 %v11845_v33, %v16144_v28  ;;  %v8698_v56 = vpop.f32.mrb[49].mxu1  ;;  %v454_v33 = vld [vmem:[%s16139_s14 + $0x110] sm:$0xff] }
 0x71f   : > { %v8887_v8 = vmax.f32 %v8847_v7, 0.0  ;;  %v11967_v49 = vadd.f32 %v16144_v28, %v8698_v56 }
 0x720   : > { %8928 = vst.msk [vmem:[%s16153_s18 + $0xa8] sm:$0xff] %vm532_vm1, %v8888_v0  ;;  %v8850_v16 = vadd.f32 %v11966_v29, %v443_v54 }
 0x721   : > { %8927 = vst.msk [vmem:[%s16153_s18 + $0xa0] sm:$0xff] %vm532_vm1, %v8887_v8  ;;  %v8849_v62 = vadd.f32 %v11967_v49, %v442_v50  ;;  %v11848_v23 = vpop.f32.mrb[50].mxu1  ;;  %v457_v49 = vld [vmem:[%s16139_s14 + $0x128] sm:$0xff] }
 0x722   : > { %v8890_v47 = vmax.f32 %v8850_v16, 0.0  ;;  %v11968_v24 = vadd.f32 %v11848_v23, %v16144_v28  ;;  %v8708_v43 = vpop.f32.mrb[51].mxu1  ;;  %v456_v23 = vld [vmem:[%s16139_s14 + $0x120] sm:$0xff] }
 0x723   : > { %v8889_v51 = vmax.f32 %v8849_v62, 0.0  ;;  %v11969_v22 = vadd.f32 %v16144_v28, %v8708_v43 }
 0x724   : > { %8930 = vst.msk [vmem:[%s16153_s18 + $0xb8] sm:$0xff] %vm532_vm1, %v8890_v47  ;;  %v8852_v15 = vadd.f32 %v11968_v24, %v445_v21 }
 0x725   : > { %8929 = vst.msk [vmem:[%s16153_s18 + $0xb0] sm:$0xff] %vm532_vm1, %v8889_v51  ;;  %v8851_v6 = vadd.f32 %v11969_v22, %v444_v44  ;;  %v11851_v60 = vpop.f32.mrb[52].mxu1  ;;  %v459_v22 = vld [vmem:[%s16139_s14 + $0x138] sm:$0xff] }
 0x726   : > { %v8892_v19 = vmax.f32 %v8852_v15, 0.0  ;;  %v11970_v38 = vadd.f32 %v11851_v60, %v16144_v28  ;;  %v8718_v4 = vpop.f32.mrb[53].mxu1  ;;  %v458_v60 = vld [vmem:[%s16139_s14 + $0x130] sm:$0xff] }
 0x727   : > { %v8891_v63 = vmax.f32 %v8851_v6, 0.0  ;;  %v11971_v31 = vadd.f32 %v16144_v28, %v8718_v4 }
 0x728   : > { %8932 = vst.msk [vmem:[%s16153_s18 + $0xc8] sm:$0xff] %vm532_vm1, %v8892_v19  ;;  %v8854_v48 = vadd.f32 %v11970_v38, %v447_v11 }
 0x729   : > { %8931 = vst.msk [vmem:[%s16153_s18 + $0xc0] sm:$0xff] %vm532_vm1, %v8891_v63  ;;  %v8853_v61 = vadd.f32 %v11971_v31, %v446_v35  ;;  %v11854_v12 = vpop.f32.mrb[54].mxu1 }
 0x72a   : > { %v8894_v1 = vmax.f32 %v8854_v48, 0.0  ;;  %v11972_v13 = vadd.f32 %v11854_v12, %v16144_v28  ;;  %v8728_v36 = vpop.f32.mrb[55].mxu1 }
 0x72b   : > { %v8893_v18 = vmax.f32 %v8853_v61, 0.0  ;;  %v11973_v20 = vadd.f32 %v16144_v28, %v8728_v36 }
 0x72c   : > { %8934 = vst.msk [vmem:[%s16153_s18 + $0xd8] sm:$0xff] %vm532_vm1, %v8894_v1  ;;  %v8856_v45 = vadd.f32 %v11972_v13, %v449_v34 }
 0x72d   : > { %8933 = vst.msk [vmem:[%s16153_s18 + $0xd0] sm:$0xff] %vm532_vm1, %v8893_v18  ;;  %v8855_v27 = vadd.f32 %v11973_v20, %v448_v41  ;;  %v11857_v55 = vpop.f32.mrb[56].mxu1 }
 0x72e   : > { %v8896_v58 = vmax.f32 %v8856_v45, 0.0  ;;  %v11974_v2 = vadd.f32 %v11857_v55, %v16144_v28  ;;  %v8738_v9 = vpop.f32.mrb[57].mxu1 }
 0x72f   : > { %v8895_v46 = vmax.f32 %v8855_v27, 0.0  ;;  %v11975_v59 = vadd.f32 %v16144_v28, %v8738_v9 }
 0x730   : > { %8936 = vst.msk [vmem:[%s16153_s18 + $0xe8] sm:$0xff] %vm532_vm1, %v8896_v58  ;;  %v8858_v57 = vadd.f32 %v11974_v2, %v451_v53 }
 0x731   : > { %8935 = vst.msk [vmem:[%s16153_s18 + $0xe0] sm:$0xff] %vm532_vm1, %v8895_v46  ;;  %v8857_v42 = vadd.f32 %v11975_v59, %v450_v52  ;;  %v11860_v40 = vpop.f32.mrb[58].mxu1 }
 0x732   : > { %v8898_v30 = vmax.f32 %v8858_v57, 0.0  ;;  %v11976_v17 = vadd.f32 %v11860_v40, %v16144_v28  ;;  %v8748_v5 = vpop.f32.mrb[59].mxu1 }
 0x733   : > { %v8897_v10 = vmax.f32 %v8857_v42, 0.0  ;;  %v11977_v37 = vadd.f32 %v16144_v28, %v8748_v5 }
 0x734   : > { %8938 = vst.msk [vmem:[%s16153_s18 + $0xf8] sm:$0xff] %vm532_vm1, %v8898_v30  ;;  %v8860_v14 = vadd.f32 %v11976_v17, %v453_v25 }
 0x735   : > { %8937 = vst.msk [vmem:[%s16153_s18 + $0xf0] sm:$0xff] %vm532_vm1, %v8897_v10  ;;  %v8859_v3 = vadd.f32 %v11977_v37, %v452_v32  ;;  %v11863_v39 = vpop.f32.mrb[60].mxu1 }
 0x736   : > { %v8900_v7 = vmax.f32 %v8860_v14, 0.0  ;;  %v11978_v54 = vadd.f32 %v11863_v39, %v16144_v28  ;;  %v8758_v0 = vpop.f32.mrb[61].mxu1 }
 0x737   : > { %v8899_v29 = vmax.f32 %v8859_v3, 0.0  ;;  %v11979_v50 = vadd.f32 %v16144_v28, %v8758_v0 }
 0x738   : > { %8940 = vst.msk [vmem:[%s16153_s18 + $0x108] sm:$0xff] %vm532_vm1, %v8900_v7  ;;  %v8862_v56 = vadd.f32 %v11978_v54, %v455_v26 }
 0x739   : > { %8939 = vst.msk [vmem:[%s16153_s18 + $0x100] sm:$0xff] %vm532_vm1, %v8899_v29  ;;  %v8861_v8 = vadd.f32 %v11979_v50, %v454_v33  ;;  %v11866_v16 = vpop.f32.mrb[62].mxu1 }
 0x73a   : > { %v8902_v62 = vmax.f32 %v8862_v56, 0.0  ;;  %v11980_v21 = vadd.f32 %v11866_v16, %v16144_v28  ;;  %v8768_v47 = vpop.f32.mrb[63].mxu1 }
 0x73b   : > { %v8901_v24 = vmax.f32 %v8861_v8, 0.0  ;;  %v11981_v44 = vadd.f32 %v16144_v28, %v8768_v47 }
 0x73c   : > { %8942 = vst.msk [vmem:[%s16153_s18 + $0x118] sm:$0xff] %vm532_vm1, %v8902_v62  ;;  %v8864_v43 = vadd.f32 %v11980_v21, %v457_v49 }
 0x73d   : > { %8941 = vst.msk [vmem:[%s16153_s18 + $0x110] sm:$0xff] %vm532_vm1, %v8901_v24  ;;  %v8863_v51 = vadd.f32 %v11981_v44, %v456_v23  ;;  %v11869_v15 = vpop.f32.mrb[64].mxu1 }
 0x73e   : > { %v8904_v6 = vmax.f32 %v8864_v43, 0.0  ;;  %v11982_v11 = vadd.f32 %v11869_v15, %v16144_v28  ;;  %v8778_v19 = vpop.f32.mrb[65].mxu1 }
 0x73f   : > { %v8903_v38 = vmax.f32 %v8863_v51, 0.0  ;;  %v11983_v35 = vadd.f32 %v16144_v28, %v8778_v19 }
 0x740   : > { %8944 = vst.msk [vmem:[%s16153_s18 + $0x128] sm:$0xff] %vm532_vm1, %v8904_v6  ;;  %v8866_v4 = vadd.f32 %v11982_v11, %v459_v22 }
 0x741   : > { %8943 = vst.msk [vmem:[%s16153_s18 + $0x120] sm:$0xff] %vm532_vm1, %v8903_v38  ;;  %v8865_v63 = vadd.f32 %v11983_v35, %v458_v60 }
 0x742   : > { %v8906_v31 = vmax.f32 %v8866_v4, 0.0 }
 0x743   : > { %v8905_v48 = vmax.f32 %v8865_v63, 0.0 }
 0x744   : > { %8946 = vst.msk [vmem:[%s16153_s18 + $0x138] sm:$0xff] %vm532_vm1, %v8906_v31 }
 0x745   : > { %8945 = vst.msk [vmem:[%s16153_s18 + $0x130] sm:$0xff] %vm532_vm1, %v8905_v48 }
 0x746 PF: > { %s17_s26 = sadd.s32 1, %s12743_s26   ;;  %s16762_s24 = smov %s12739_s25 }
 0x747   : > { %p14_p5 = scmp.ge.s32.totalorder %s17_s26, 4   ;;  %s16763_s25 = smov %s16765_s27 }
 0x749   :  { %16 = sbr.rel (!%p14_p5) target bundleno = 2 (0x2), region = 84 }

</bundles_post_ra>
